<compile_context>
chip_gen: v5e
topology: v5e:2x2
jax: 0.10.0
libtpu: 0.0.40
codegen_flags: <defaults>
</compile_context>

<pallas_src>
import jax
import jax.numpy as jnp
from jax.experimental import pallas as pl
from jax.experimental.pallas import tpu as pltpu

EMBEDDING_DIM = 768
HIDDEN_DIM = 256
REDUCED_DIM = 128


def _textumc_proj_kernel(x_ref, w1_ref, b1_ref, w2_ref, b2_ref, o_ref):
    """One row-tile of: ReLU(x @ W1 + b1) @ W2 + b2, then L2-normalize rows."""
    # In-kernel f32 -> bf16 cast (VPU on the VMEM tile; no extra HBM pass).
    x = x_ref[...].astype(jnp.bfloat16)                   # [tile, 768] bf16
    # Linear 1 (bf16 MXU operands, f32 accumulate) + bias + ReLU in f32.
    h = jnp.dot(x, w1_ref[...], preferred_element_type=jnp.float32)
    h = jnp.maximum(h + b1_ref[...], 0.0)                 # [tile, 256] f32
    # Linear 2 (re-quantize hidden to bf16 for the MXU).
    z = jnp.dot(h.astype(jnp.bfloat16), w2_ref[...],
                preferred_element_type=jnp.float32)
    z = z + b2_ref[...]                                   # [tile, 128] f32
    # F.normalize(dim=1, eps=1e-12):  z / max(||z||, 1e-12)
    #   == z * rsqrt(max(sum(z*z), 1e-24))   (rsqrt runs on the EUP slot)
    sq = jnp.sum(z * z, axis=-1, keepdims=True)           # [tile, 1]
    z = z * jax.lax.rsqrt(jnp.maximum(sq, 1e-24))
    # torch.nan_to_num(nan=0.0)
    z = jnp.where(jnp.isnan(z), jnp.zeros_like(z), z)
    o_ref[...] = z.astype(o_ref.dtype)


def _round_up(x, m):
    return ((x + m - 1) // m) * m


def _pick_tile(n, row_tile):
    """Row tile: big (amortize ~0.35us/step overhead), 8-aligned, but small
    enough that the batch still yields >= 4 grid steps (2 per TC on v7x)."""
    tile = max(8, min(row_tile, _round_up(n, 8)))
    tile = _round_up(tile, 8)
    while tile > 128 and pl.cdiv(n, tile) < 4:
        tile //= 2
    return max(8, (tile // 8) * 8)


def textumc_forward(x, w1, b1, w2, b2, *, row_tile=512, out_dtype=jnp.float32):
    """x: [N, 768] f32 CLS embeddings -> [N, 128] L2-normalized projections."""
    n, d = x.shape
    assert d == EMBEDDING_DIM

    # x stays f32 (cast to bf16 inside the kernel); weights DMA'd as bf16.
    x = x.astype(jnp.float32)
    w1_bf = w1.astype(jnp.bfloat16)
    w2_bf = w2.astype(jnp.bfloat16)
    b1_2d = b1.reshape(1, HIDDEN_DIM).astype(jnp.float32)
    b2_2d = b2.reshape(1, REDUCED_DIM).astype(jnp.float32)

    tile = _pick_tile(n, row_tile)
    grid = (pl.cdiv(n, tile),)   # ragged last block handled by Pallas masking

    out_bytes = jnp.dtype(out_dtype).itemsize
    cost = pl.CostEstimate(
        flops=2 * n * (EMBEDDING_DIM * HIDDEN_DIM + HIDDEN_DIM * REDUCED_DIM),
        transcendentals=n,  # one rsqrt per row
        bytes_accessed=(n * EMBEDDING_DIM * 4                # x (f32, read once)
                        + EMBEDDING_DIM * HIDDEN_DIM * 2     # W1 (bf16)
                        + HIDDEN_DIM * REDUCED_DIM * 2       # W2 (bf16)
                        + (HIDDEN_DIM + REDUCED_DIM) * 4     # biases (f32)
                        + n * REDUCED_DIM * out_bytes),      # output
    )

    def _call(buffered_weights):
        if buffered_weights:
            # Constant index_map -> single pipeline buffer (no redundant DMA /
            # second VMEM copy for the resident weights).
            def wspec(shape):
                return pl.BlockSpec(shape, lambda i: (0, 0),
                                    pipeline_mode=pl.Buffered(1))
        else:
            def wspec(shape):
                return pl.BlockSpec(shape, lambda i: (0, 0))

        return pl.pallas_call(
            _textumc_proj_kernel,
            out_shape=jax.ShapeDtypeStruct((n, REDUCED_DIM), out_dtype),
            grid_spec=pltpu.PrefetchScalarGridSpec(
                num_scalar_prefetch=0,
                grid=grid,
                in_specs=[
                    pl.BlockSpec((tile, EMBEDDING_DIM), lambda i: (i, 0)),  # x tile
                    wspec((EMBEDDING_DIM, HIDDEN_DIM)),                     # W1
                    wspec((1, HIDDEN_DIM)),                                 # b1
                    wspec((HIDDEN_DIM, REDUCED_DIM)),                       # W2
                    wspec((1, REDUCED_DIM)),                                # b2
                ],
                out_specs=pl.BlockSpec((tile, REDUCED_DIM), lambda i: (i, 0)),
            ),
            compiler_params=pltpu.CompilerParams(
                dimension_semantics=("parallel",),
            ),
            cost_estimate=cost,
        )(x, w1_bf, b1_2d, w2_bf, b2_2d)

    try:
        return _call(buffered_weights=True)
    except Exception:
        # pl.Buffered(1) on resident weights not accepted by this jax version;
        # double-buffering them only costs ~0.5 MiB VMEM, so fall back.
        return _call(buffered_weights=False)


def _init_linear(key, fan_in, fan_out):
    """Deterministic init mimicking nn.Linear default: U(-1/sqrt(fan_in), +)."""
    kw, kb = jax.random.split(key)
    bound = 1.0 / jnp.sqrt(fan_in)
    w = jax.random.uniform(kw, (fan_in, fan_out), jnp.float32, -bound, bound)
    b = jax.random.uniform(kb, (fan_out,), jnp.float32, -bound, bound)
    return w, b


def _reference_forward_f32(x, w1, b1, w2, b2):
    h = jnp.maximum(x @ w1 + b1, 0.0)
    z = h @ w2 + b2
    norm = jnp.sqrt(jnp.sum(z * z, axis=1, keepdims=True))
    z = z / jnp.maximum(norm, 1e-12)
    return jnp.where(jnp.isnan(z), 0.0, z)


def _reference_forward_bf16(x, w1, b1, w2, b2):
    """Same bf16-operand / f32-accumulate recipe as the kernel."""
    xb, w1b, w2b = (t.astype(jnp.bfloat16) for t in (x, w1, w2))
    h = jnp.dot(xb, w1b, preferred_element_type=jnp.float32) + b1
    h = jnp.maximum(h, 0.0)
    z = jnp.dot(h.astype(jnp.bfloat16), w2b, preferred_element_type=jnp.float32) + b2
    sq = jnp.sum(z * z, axis=1, keepdims=True)
    z = z * jax.lax.rsqrt(jnp.maximum(sq, 1e-24))
    return jnp.where(jnp.isnan(z), 0.0, z)


if __name__ == "__main__":
    key = jax.random.PRNGKey(0)
    k_x, k_l1, k_l2 = jax.random.split(key, 3)

    # All 16-row chunks of the PyTorch loop batched into a single pallas_call.
    # N=512 with the tile heuristic -> tile=128, grid=4 (>= 2 steps per TC on v7x).
    N = 512
    x = jax.random.normal(k_x, (N, EMBEDDING_DIM), jnp.float32)

    w1, b1 = _init_linear(k_l1, EMBEDDING_DIM, HIDDEN_DIM)   # Linear(768, 256)
    w2, b2 = _init_linear(k_l2, HIDDEN_DIM, REDUCED_DIM)     # Linear(256, 128)

    out = textumc_forward(x, w1, b1, w2, b2)
    out = jax.block_until_ready(out)

    assert out.shape == (N, REDUCED_DIM)

    # Tight check against a bf16-operand reference (same numerics as kernel).
    ref_bf16 = _reference_forward_bf16(x, w1, b1, w2, b2)
    assert jnp.allclose(out, ref_bf16, atol=1e-4, rtol=1e-4)

    # Looser check against the full-f32 reference (bf16 operand quantization).
    ref_f32 = _reference_forward_f32(x, w1, b1, w2, b2)
    assert jnp.allclose(out, ref_f32, atol=2e-2, rtol=2e-2)

    # Rows are unit-norm.
    assert jnp.allclose(jnp.linalg.norm(out, axis=1), 1.0, atol=1e-3)

    print("KERNEL_OK")
</pallas_src>

<mosaic_0001>
module attributes {stable_mosaic.version = 11 : i64} {
  func.func @_textumc_proj_kernel(%arg0: i32, %arg1: memref<128x768xf32, #tpu.memory_space<vmem>>, %arg2: memref<768x256xbf16, #tpu.memory_space<vmem>>, %arg3: memref<1x256xf32, #tpu.memory_space<vmem>>, %arg4: memref<256x128xbf16, #tpu.memory_space<vmem>>, %arg5: memref<1x128xf32, #tpu.memory_space<vmem>>, %arg6: memref<128x128xf32, #tpu.memory_space<vmem>>) attributes {dimension_semantics = [#tpu.dimension_semantics<parallel>], iteration_bounds = array<i64: 4>, scalar_prefetch = 0 : i64, scratch_operands = 0 : i64, tpu.core_type = #tpu.core_type<tc>, window_params = [{transform_indices = @transform_0, window_bounds = array<i64: 128, 768>}, {pipeline_mode = #tpu.pipeline_mode<synchronous>, transform_indices = @transform_1, window_bounds = array<i64: 768, 256>}, {pipeline_mode = #tpu.pipeline_mode<synchronous>, transform_indices = @transform_2, window_bounds = array<i64: 1, 256>}, {pipeline_mode = #tpu.pipeline_mode<synchronous>, transform_indices = @transform_3, window_bounds = array<i64: 256, 128>}, {pipeline_mode = #tpu.pipeline_mode<synchronous>, transform_indices = @transform_4, window_bounds = array<i64: 1, 128>}, {transform_indices = @transform_5, window_bounds = array<i64: 128, 128>}]} {
    %c0 = arith.constant 0 : index
    %c0_0 = arith.constant 0 : index
    %0 = vector.load %arg1[%c0, %c0_0] : memref<128x768xf32, #tpu.memory_space<vmem>>, vector<128x768xf32>
    %1 = arith.truncf %0 : vector<128x768xf32> to vector<128x768xbf16>
    %c0_1 = arith.constant 0 : index
    %c0_2 = arith.constant 0 : index
    %2 = vector.load %arg2[%c0_1, %c0_2] : memref<768x256xbf16, #tpu.memory_space<vmem>>, vector<768x256xbf16>
    %cst = arith.constant dense<0.000000e+00> : vector<128x256xf32>
    %3 = tpu.matmul %1, %2, %cst {dimension_numbers = #tpu.dot_dimension_numbers<[1], [0], [0], [1], [0, 0, 1, 1], [], []>} : vector<128x768xbf16>, vector<768x256xbf16>, vector<128x256xf32> -> vector<128x256xf32>
    %c0_3 = arith.constant 0 : index
    %c0_4 = arith.constant 0 : index
    %4 = vector.load %arg3[%c0_3, %c0_4] : memref<1x256xf32, #tpu.memory_space<vmem>>, vector<1x256xf32>
    %5 = vector.broadcast %4 : vector<1x256xf32> to vector<128x256xf32>
    %6 = arith.addf %3, %5 : vector<128x256xf32>
    %cst_5 = arith.constant 0.000000e+00 : f32
    %7 = vector.broadcast %cst_5 : f32 to vector<128x256xf32>
    %8 = arith.maximumf %6, %7 : vector<128x256xf32>
    %9 = arith.truncf %8 : vector<128x256xf32> to vector<128x256xbf16>
    %c0_6 = arith.constant 0 : index
    %c0_7 = arith.constant 0 : index
    %10 = vector.load %arg4[%c0_6, %c0_7] : memref<256x128xbf16, #tpu.memory_space<vmem>>, vector<256x128xbf16>
    %cst_8 = arith.constant dense<0.000000e+00> : vector<128x128xf32>
    %11 = tpu.matmul %9, %10, %cst_8 {dimension_numbers = #tpu.dot_dimension_numbers<[1], [0], [0], [1], [0, 0, 1, 1], [], []>} : vector<128x256xbf16>, vector<256x128xbf16>, vector<128x128xf32> -> vector<128x128xf32>
    %c0_9 = arith.constant 0 : index
    %c0_10 = arith.constant 0 : index
    %12 = vector.load %arg5[%c0_9, %c0_10] : memref<1x128xf32, #tpu.memory_space<vmem>>, vector<1x128xf32>
    %13 = vector.broadcast %12 : vector<1x128xf32> to vector<128x128xf32>
    %14 = arith.addf %11, %13 : vector<128x128xf32>
    %15 = arith.mulf %14, %14 : vector<128x128xf32>
    %cst_11 = arith.constant dense<0.000000e+00> : vector<128xf32>
    %16 = vector.multi_reduction <add>, %15, %cst_11 [1] : vector<128x128xf32> to vector<128xf32>
    %17 = vector.shape_cast %16 : vector<128xf32> to vector<128x1xf32>
    %cst_12 = arith.constant 1.000000e-24 : f32
    %18 = vector.broadcast %cst_12 : f32 to vector<128x1xf32>
    %19 = arith.maximumf %17, %18 : vector<128x1xf32>
    %20 = math.rsqrt %19 : vector<128x1xf32>
    %21 = vector.broadcast %20 : vector<128x1xf32> to vector<128x128xf32>
    %22 = arith.mulf %14, %21 : vector<128x128xf32>
    %23 = arith.cmpf one, %22, %22 : vector<128x128xf32>
    %cst_13 = arith.constant 0.000000e+00 : f32
    %24 = vector.broadcast %cst_13 : f32 to vector<128x128xf32>
    %25 = arith.select %23, %24, %22 : vector<128x128xi1>, vector<128x128xf32>
    %c0_14 = arith.constant 0 : index
    %c0_15 = arith.constant 0 : index
    %26 = vector.load %arg6[%c0_14, %c0_15] : memref<128x128xf32, #tpu.memory_space<vmem>>, vector<128x128xf32>
    tpu.vector_store %arg6[%c0_14, %c0_15], %25 {strides = array<i32>} : memref<128x128xf32, #tpu.memory_space<vmem>>, vector<128x128xf32>,
    return
  }
  func.func @transform_0(%arg0: i32) -> (i32, i32) {
    %c0_i32 = arith.constant 0 : i32
    %c0_i32_0 = arith.constant 0 : i32
    return %arg0, %c0_i32 : i32, i32
  }
  func.func @transform_1(%arg0: i32) -> (i32, i32) {
    %c0_i32 = arith.constant 0 : i32
    %c0_i32_0 = arith.constant 0 : i32
    %c0_i32_1 = arith.constant 0 : i32
    return %c0_i32, %c0_i32_0 : i32, i32
  }
  func.func @transform_2(%arg0: i32) -> (i32, i32) {
    %c0_i32 = arith.constant 0 : i32
    %c0_i32_0 = arith.constant 0 : i32
    %c0_i32_1 = arith.constant 0 : i32
    return %c0_i32, %c0_i32_0 : i32, i32
  }
  func.func @transform_3(%arg0: i32) -> (i32, i32) {
    %c0_i32 = arith.constant 0 : i32
    %c0_i32_0 = arith.constant 0 : i32
    %c0_i32_1 = arith.constant 0 : i32
    return %c0_i32, %c0_i32_0 : i32, i32
  }
  func.func @transform_4(%arg0: i32) -> (i32, i32) {
    %c0_i32 = arith.constant 0 : i32
    %c0_i32_0 = arith.constant 0 : i32
    %c0_i32_1 = arith.constant 0 : i32
    return %c0_i32, %c0_i32_0 : i32, i32
  }
  func.func @transform_5(%arg0: i32) -> (i32, i32) {
    %c0_i32 = arith.constant 0 : i32
    %c0_i32_0 = arith.constant 0 : i32
    return %arg0, %c0_i32 : i32, i32
  }
}

module attributes {stable_mosaic.version = 11 : i64} {
  func.func @_textumc_proj_kernel(%arg0: i32, %arg1: memref<128x768xf32, #tpu.memory_space<vmem>>, %arg2: memref<768x256xbf16, #tpu.memory_space<vmem>>, %arg3: memref<1x256xf32, #tpu.memory_space<vmem>>, %arg4: memref<256x128xbf16, #tpu.memory_space<vmem>>, %arg5: memref<1x128xf32, #tpu.memory_space<vmem>>, %arg6: memref<128x128xf32, #tpu.memory_space<vmem>>) attributes {dimension_semantics = [#tpu.dimension_semantics<parallel>], iteration_bounds = array<i64: 4>, scalar_prefetch = 0 : i64, scratch_operands = 0 : i64, tpu.core_type = #tpu.core_type<tc>, window_params = [{transform_indices = @transform_0, window_bounds = array<i64: 128, 768>}, {pipeline_mode = #tpu.pipeline_mode<synchronous>, transform_indices = @transform_1, window_bounds = array<i64: 768, 256>}, {pipeline_mode = #tpu.pipeline_mode<synchronous>, transform_indices = @transform_2, window_bounds = array<i64: 1, 256>}, {pipeline_mode = #tpu.pipeline_mode<synchronous>, transform_indices = @transform_3, window_bounds = array<i64: 256, 128>}, {pipeline_mode = #tpu.pipeline_mode<synchronous>, transform_indices = @transform_4, window_bounds = array<i64: 1, 128>}, {transform_indices = @transform_5, window_bounds = array<i64: 128, 128>}]} {
    %c0 = arith.constant 0 : index
    %c0_0 = arith.constant 0 : index
    %0 = vector.load %arg1[%c0, %c0_0] : memref<128x768xf32, #tpu.memory_space<vmem>>, vector<128x768xf32>
    %1 = arith.truncf %0 : vector<128x768xf32> to vector<128x768xbf16>
    %c0_1 = arith.constant 0 : index
    %c0_2 = arith.constant 0 : index
    %2 = vector.load %arg2[%c0_1, %c0_2] : memref<768x256xbf16, #tpu.memory_space<vmem>>, vector<768x256xbf16>
    %cst = arith.constant dense<0.000000e+00> : vector<128x256xf32>
    %3 = tpu.matmul %1, %2, %cst {dimension_numbers = #tpu.dot_dimension_numbers<[1], [0], [0], [1], [0, 0, 1, 1], [], []>} : vector<128x768xbf16>, vector<768x256xbf16>, vector<128x256xf32> -> vector<128x256xf32>
    %c0_3 = arith.constant 0 : index
    %c0_4 = arith.constant 0 : index
    %4 = vector.load %arg3[%c0_3, %c0_4] : memref<1x256xf32, #tpu.memory_space<vmem>>, vector<1x256xf32>
    %5 = vector.broadcast %4 : vector<1x256xf32> to vector<128x256xf32>
    %6 = arith.addf %3, %5 : vector<128x256xf32>
    %cst_5 = arith.constant 0.000000e+00 : f32
    %7 = vector.broadcast %cst_5 : f32 to vector<128x256xf32>
    %8 = arith.maximumf %6, %7 : vector<128x256xf32>
    %9 = arith.truncf %8 : vector<128x256xf32> to vector<128x256xbf16>
    %c0_6 = arith.constant 0 : index
    %c0_7 = arith.constant 0 : index
    %10 = vector.load %arg4[%c0_6, %c0_7] : memref<256x128xbf16, #tpu.memory_space<vmem>>, vector<256x128xbf16>
    %cst_8 = arith.constant dense<0.000000e+00> : vector<128x128xf32>
    %11 = tpu.matmul %9, %10, %cst_8 {dimension_numbers = #tpu.dot_dimension_numbers<[1], [0], [0], [1], [0, 0, 1, 1], [], []>} : vector<128x256xbf16>, vector<256x128xbf16>, vector<128x128xf32> -> vector<128x128xf32>
    %c0_9 = arith.constant 0 : index
    %c0_10 = arith.constant 0 : index
    %12 = vector.load %arg5[%c0_9, %c0_10] : memref<1x128xf32, #tpu.memory_space<vmem>>, vector<1x128xf32>
    %13 = vector.broadcast %12 : vector<1x128xf32> to vector<128x128xf32>
    %14 = arith.addf %11, %13 : vector<128x128xf32>
    %15 = arith.mulf %14, %14 : vector<128x128xf32>
    %cst_11 = arith.constant dense<0.000000e+00> : vector<128xf32>
    %16 = vector.multi_reduction <add>, %15, %cst_11 [1] : vector<128x128xf32> to vector<128xf32>
    %17 = vector.shape_cast %16 : vector<128xf32> to vector<128x1xf32>
    %cst_12 = arith.constant 1.000000e-24 : f32
    %18 = vector.broadcast %cst_12 : f32 to vector<128x1xf32>
    %19 = arith.maximumf %17, %18 : vector<128x1xf32>
    %20 = math.rsqrt %19 : vector<128x1xf32>
    %21 = vector.broadcast %20 : vector<128x1xf32> to vector<128x128xf32>
    %22 = arith.mulf %14, %21 : vector<128x128xf32>
    %23 = arith.cmpf one, %22, %22 : vector<128x128xf32>
    %cst_13 = arith.constant 0.000000e+00 : f32
    %24 = vector.broadcast %cst_13 : f32 to vector<128x128xf32>
    %25 = arith.select %23, %24, %22 : vector<128x128xi1>, vector<128x128xf32>
    %c0_14 = arith.constant 0 : index
    %c0_15 = arith.constant 0 : index
    %26 = vector.load %arg6[%c0_14, %c0_15] : memref<128x128xf32, #tpu.memory_space<vmem>>, vector<128x128xf32>
    tpu.vector_store %arg6[%c0_14, %c0_15], %25 {strides = array<i32>} : memref<128x128xf32, #tpu.memory_space<vmem>>, vector<128x128xf32>,
    return
  }
  func.func @transform_0(%arg0: i32) -> (i32, i32) {
    %c0_i32 = arith.constant 0 : i32
    %c0_i32_0 = arith.constant 0 : i32
    return %arg0, %c0_i32 : i32, i32
  }
  func.func @transform_1(%arg0: i32) -> (i32, i32) {
    %c0_i32 = arith.constant 0 : i32
    %c0_i32_0 = arith.constant 0 : i32
    %c0_i32_1 = arith.constant 0 : i32
    return %c0_i32, %c0_i32_0 : i32, i32
  }
  func.func @transform_2(%arg0: i32) -> (i32, i32) {
    %c0_i32 = arith.constant 0 : i32
    %c0_i32_0 = arith.constant 0 : i32
    %c0_i32_1 = arith.constant 0 : i32
    return %c0_i32, %c0_i32_0 : i32, i32
  }
  func.func @transform_3(%arg0: i32) -> (i32, i32) {
    %c0_i32 = arith.constant 0 : i32
    %c0_i32_0 = arith.constant 0 : i32
    %c0_i32_1 = arith.constant 0 : i32
    return %c0_i32, %c0_i32_0 : i32, i32
  }
  func.func @transform_4(%arg0: i32) -> (i32, i32) {
    %c0_i32 = arith.constant 0 : i32
    %c0_i32_0 = arith.constant 0 : i32
    %c0_i32_1 = arith.constant 0 : i32
    return %c0_i32, %c0_i32_0 : i32, i32
  }
  func.func @transform_5(%arg0: i32) -> (i32, i32) {
    %c0_i32 = arith.constant 0 : i32
    %c0_i32_0 = arith.constant 0 : i32
    return %arg0, %c0_i32 : i32, i32
  }
}

</mosaic_0001>

<bundles_post_ra>
// kernel: tpu_custom_call.1
= control target key start
LH: loop header
LB: loop body
LE: loop exit
PB: predicated region body
PF: predicated region fallthrough
CT: control target
= control target key end

     0   :  { %s4043_s0 = inlined_call_operand.hbm [shape: f32[512,768], index: 0, kind: input, shape index: {}]   ;;  %s4044_s1 = inlined_call_operand.hbm [shape: bf16[768,256], index: 1, kind: input, shape index: {}]   ;;  %s4045_s2 = inlined_call_operand.hbm [shape: f32[1,256], index: 2, kind: input, shape index: {}]   ;;  %s4046_s3 = inlined_call_operand.hbm [shape: bf16[256,128], index: 3, kind: input, shape index: {}]   ;;  %s4047_s4 = inlined_call_operand.hbm [shape: f32[1,128], index: 4, kind: input, shape index: {}]   ;;  %s4048_s5 = inlined_call_operand.hbm [shape: f32[512,128], index: 5, kind: output, shape index: {}]  }
   0x1   :  { %4066 = sst [smem:[#allocation33_spill]] %s4044_s1 }
   0x2   :  { %10 = vsyncpa [#allocation3], 0 }
   0x3   :  { %12 = vsyncpa [#allocation3 + $0x1], 0 }
   0x4   :  { %13 = vsyncpa [#allocation6], 0 }
   0x5   :  { %14 = vsyncpa [#allocation9], 0 }
   0x6   :  { %15 = vsyncpa [#allocation4], 0 }
   0x7   :  { %17 = vsyncpa [#allocation4 + $0x1], 0  ;;  %s3314_s18 = smov 0   ;;  %s3316_s19 = smov 0  }
   0x8   :  { %s3318_s20 = smov 0   ;;  %s3320_s21 = smov 0  }
   0x9 LB: > { %s3335_s22 = sadd.s32 4294967295, %s3270_s21   ;;  %s2317_s23 = sadd.s32 4294967294, %s3270_s21   ;;  %s3270_s21 = sphi %s3320_s21, %s4111_s21   ;;  %s3266_s20 = sphi %s3318_s20, %s4110_s20   ;;  %s3262_s19 = sphi %s3316_s19, %s4109_s19   ;;  %s3258_s18 = sphi %s3314_s18, %s4108_s18  }
   0xa   : > { %p43_p0 = scmp.ne.s32.totalorder %s3262_s19, %s3258_s18  ;;  %p44_p1 = scmp.eq.s32.totalorder %s3335_s22, 0 }
   0xb   : > { %p151_p2 = scmp.eq.s32.totalorder %s3335_s22, 3  ;;  %p157_p3 = scmp.eq.s32.totalorder %s2317_s23, 3 }
   0xc   : > { %p3344_p4 = por %p44_p1, %p43_p0  ;;  %p2318_p5 = scmp.ge.s32.totalorder %s3270_s21, 1 }
   0xd   : > { %p3349_p6 = por %p157_p3, %p43_p0  ;;  %p164_p7 = scmp.lt.s32.totalorder %s3270_s21, 5 }
   0xe   : > { %s4069_s1 = sld [smem:[#allocation33_spill]]  ;;  %s3272_s30 = smov [#allocation5]  }
   0xf   : > { %p3357_p8 = pnand %p2318_p5, %p164_p7  ;;  %s177_s6 = sshll.u32 %s3272_s30, 4  ;;  %s178_s6 = int_to_ptr.vmem [resolvable:$true] %s177_s6 }
  0x10   : > { %s201_s10 = sshll.u32 %s4046_s3, 4  ;;  %s3273_s11 = smov 128   ;;  %s202_s10 = int_to_ptr.hbm [resolvable:$true] %s201_s10 }
  0x11   : > { %p2938_p9 = pneg %p3357_p8  ;;  %s3274_s12 = smov 8  }
  0x12   : > { %s3275_s13 = smov [#allocation8]   ;;  %s3276_s15 = smov 64  }
  0x13   : > { %p3365_p10 = pnand %p2938_p9, %p44_p1  ;;  %s203_s14 = sshll.u32 %s3275_s13, 4  ;;  %s204_s14 = int_to_ptr.vmem [resolvable:$true] %s203_s14 }
  0x14   : > { %s175_s28 = sshll.u32 %s4069_s1, 4  ;;  %s3277_s16 = smov 4   ;;  %s176_s28 = int_to_ptr.hbm [resolvable:$true] %s175_s28 }
  0x15   : > { %2941 = dma.hbm_to_vmem [thread:$0]  (!%p3365_p10), %s176_s28, 12288, %s178_s6, [#allocation6], %s3273_s11, %s3273_s11, %s3274_s12  }
  0x16   : > { %2947 = dma.hbm_to_vmem [thread:$0]  (!%p3365_p10), %s202_s10, 2048, %s204_s14, [#allocation9], %s3276_s15, %s3276_s15, %s3277_s16  }
  0x17   : > { %s190_s26 = sshll.u32 %s4045_s2, 4  ;;  %s3278_s27 = smov [#allocation7]   ;;  %s191_s26 = int_to_ptr.hbm [resolvable:$true] %s190_s26 }
  0x18   : > { %s192_s28 = sshll.u32 %s3278_s27, 4  ;;  %s216_s8 = sshll.u32 %s4047_s4, 4  ;;  %s193_s28 = int_to_ptr.vmem [resolvable:$true] %s192_s28  ;;  %s217_s8 = int_to_ptr.hbm [resolvable:$true] %s216_s8 }
  0x19   : > { %2944 = dma.hbm_to_vmem [thread:$0]  (!%p3365_p10), %s191_s26, 32, %s193_s28, [#allocation6]  }
  0x1a   : > { %s3279_s9 = smov [#allocation10]   ;;  %s3387_s11 = sadd.s32 1, %s3270_s21  }
  0x1b   : > { %s218_s10 = sshll.u32 %s3279_s9, 4  ;;  %s30_s12 = sadd.s32 1, %s3266_s20  ;;  %s219_s10 = int_to_ptr.vmem [resolvable:$true] %s218_s10 }
  0x1c   : > { %2950 = dma.hbm_to_vmem [thread:$0]  (!%p3365_p10), %s217_s8, 16, %s219_s10, [#allocation9]  }
  0x1d   : > { %s27_s13 = ssub.s32 %s3270_s21, %s3387_s11  ;;  %p37_p11 = scmp.ne.s32.totalorder %s3266_s20, %s3262_s19 }
  0x1e   : > { %p28_p12 = scmp.eq.s32.totalorder %s27_s13, 0  ;;  %p38_p13 = scmp.eq.s32.totalorder %s3270_s21, 0 }
  0x1f   : > { %p3397_p0 = por %p151_p2, %p37_p11  ;;  %p2963_p3 = scmp.lt.s32.totalorder %s3270_s21, 4 }
  0x20   : > { %s3403_s15 = scalar_select %p28_p12, %s3266_s20, %s30_s12  }
  0x21   : > { %p39_p5 = por %p38_p13, %p37_p11  ;;  %s229_s16 = sand.u32 1, %s3266_s20  }
  0x22   : > { %s2915_s7 = smul.u32 768, %s229_s16  ;;  %s230_s9 = scalar_lea.sflag [#allocation3], %s229_s16 }
  0x23   : > { %s2916_s17 = smul.u32 768, %s3270_s21  ;;  %p3407_p7 = pnand %p2963_p3, %p39_p5 }
  0x24   : > { %s233_s30 = scalar_lea.vmem [#allocation2], %s2915_s7  ;;  %s3173_s26 = scalar_lea.hbm %s4043_s0, 3072 }
  0x25   : > { %s239_s28 = scalar_lea.hbm %s4043_s0, %s2916_s17  ;;  %s242_s6 = sshll.u32 %s233_s30, 4  ;;  %s243_s6 = int_to_ptr.vmem [resolvable:$true] %s242_s6 }
  0x26   : > { %s240_s8 = sshll.u32 %s239_s28, 4  ;;  %p3170_p9 = pneg %p3407_p7  ;;  %s241_s8 = int_to_ptr.hbm [resolvable:$true] %s240_s8 }
  0x27   : > { %s3166_s10 = sshra.s32 %s241_s8, 4  ;;  %s3167_s10 = int_to_ptr.hbm [resolvable:$true] %s3166_s10 }
  0x28   : > { %s3168_s12 = scalar_lea.hbm %s3167_s10, 768  ;;  %p3174_p12 = scmp.lt.s32.totalorder %s3167_s10, %s4043_s0 }
  0x29   : > { %p3169_p2 = scmp.ne.s32.totalorder %s3167_s10, %s3168_s12  ;;  %p3175_p13 = scmp.lt.s32.totalorder %s3173_s26, %s3168_s12 }
  0x2b   : > { %p3171_p10 = pnand %p3170_p9, %p3169_p2  ;;  %p3176_p3 = por %p3175_p13, %p3174_p12 }
  0x2d   : > { %p3172_p11 = pneg %p3171_p10 }
  0x2f   : > { %p3177_p5 = pnand %p3176_p3, %p3172_p11 }
  0x31   : > { %3180 = shalt.err (!%p3177_p5)
}
  0x32   : > { %s3280_s16 = smov 768   ;;  %s3281_s7 = smov 48  }
  0x33   : > { %2954 = dma.hbm_to_vmem [thread:$0]  (!%p3407_p7), %s241_s8, 12288, %s243_s6, %s230_s9, %s3280_s16, %s3280_s16, %s3281_s7  }
  0x34   : > { %254 = sbr.rel (%p3357_p8) target bundleno = 962 (0x3c2), region = 40 }
  0x39   : > { %s3427_s1 = sand.u32 1, %s3262_s19  }
  0x3a   : > { %s2917_s28 = smul.u32 768, %s3427_s1  ;;  %s257_s30 = scalar_lea.sflag [#allocation3], %s3427_s1 }
  0x3c   : > { %s3431_s10 = scalar_lea.vmem [#allocation2], %s2917_s28 }
  0x3d   : > { %3241 = dma.done.wait (%p3344_p4), %s257_s30, 12288  }
  0x3e   : > { %3243 = vsyncadd (%p3344_p4), %s257_s30, 4294955008 }
  0x3f   : > { %3245 = dma.done.wait (%p44_p1), [#allocation6], 12320  }
  0x40   : > { %3247 = vsyncadd (%p44_p1), [#allocation6], 4294954976 }
  0x41   : > { %3249 = dma.done.wait (%p44_p1), [#allocation9], 2064  }
  0x42   : > { %3251 = vsyncadd (%p44_p1), [#allocation9], 4294965232  ;;  %v2391_v0 = vld [vmem:[#allocation5 + $0x70] sm:$0xf]  ;;  %v2801_v1 = vld [vmem:[#allocation5 + $0x74] sm:$0xf0] }
  0x43   : > { %v2455_v2 = vld [vmem:[#allocation5 + $0xf0] sm:$0xf]  ;;  %v2392_v3 = vor.u32 %v2801_v1, %v2391_v0  ;;  %v2817_v4 = vld [vmem:[#allocation5 + $0xf4] sm:$0xf0]  ;;  %v2383_v5 = vld [vmem:[#allocation5 + $0x60] sm:$0xf] }
  0x44   : > { %v2799_v6 = vld [vmem:[#allocation5 + $0x64] sm:$0xf0]  ;;  %v2456_v7 = vor.u32 %v2817_v4, %v2455_v2  ;;  %v2447_v8 = vld [vmem:[#allocation5 + $0xe0] sm:$0xf]  ;;  %v2375_v12 = vld [vmem:[#allocation5 + $0x50] sm:$0xf] }
  0x45   : > { %v2815_v9 = vld [vmem:[#allocation5 + $0xe4] sm:$0xf0]  ;;  %1036 = vmatpush.bf16.msra.mxu0 %v2392_v3  ;;  %2899 = vmatpush.bf16.msra.mxu2 %v2392_v3  ;;  %v2384_v10 = vor.u32 %v2799_v6, %v2383_v5  ;;  %v2797_v13 = vld [vmem:[#allocation5 + $0x54] sm:$0xf0]  ;;  %v2439_v14 = vld [vmem:[#allocation5 + $0xd0] sm:$0xf] }
  0x46   : > { %2907 = vmatpush.bf16.msra.mxu3 %v2456_v7  ;;  %v2448_v11 = vor.u32 %v2815_v9, %v2447_v8  ;;  %1085 = vmatpush.bf16.msra.mxu1 %v2456_v7  ;;  %v2813_v15 = vld [vmem:[#allocation5 + $0xd4] sm:$0xf0]  ;;  %v2376_v16 = vor.u32 %v2797_v13, %v2375_v12  ;;  %v2367_v18 = vld [vmem:[#allocation5 + $0x40] sm:$0xf]  ;;  %v2795_v19 = vld [vmem:[#allocation5 + $0x44] sm:$0xf0] }
  0x47   : > { %v2440_v17 = vor.u32 %v2813_v15, %v2439_v14  ;;  %v2431_v20 = vld [vmem:[#allocation5 + $0xc0] sm:$0xf]  ;;  %v2811_v21 = vld [vmem:[#allocation5 + $0xc4] sm:$0xf0]  ;;  %v2368_v22 = vor.u32 %v2795_v19, %v2367_v18  ;;  %v2359_v24 = vld [vmem:[#allocation5 + $0x30] sm:$0xf] }
  0x48   : > { %v2432_v23 = vor.u32 %v2811_v21, %v2431_v20  ;;  %v2793_v25 = vld [vmem:[#allocation5 + $0x34] sm:$0xf0]  ;;  %v2423_v26 = vld [vmem:[#allocation5 + $0xb0] sm:$0xf]  ;;  %v2351_v30 = vld [vmem:[#allocation5 + $0x20] sm:$0xf] }
  0x49   : > { %1037 = vmatpush.bf16.msra.mxu0 %v2384_v10  ;;  %2900 = vmatpush.bf16.msra.mxu2 %v2384_v10  ;;  %v2809_v27 = vld [vmem:[#allocation5 + $0xb4] sm:$0xf0]  ;;  %v2360_v28 = vor.u32 %v2793_v25, %v2359_v24  ;;  %v2791_v31 = vld [vmem:[#allocation5 + $0x24] sm:$0xf0]  ;;  %v2415_v32 = vld [vmem:[#allocation5 + $0xa0] sm:$0xf] }
  0x4a   : > { %2908 = vmatpush.bf16.msra.mxu3 %v2448_v11  ;;  %1086 = vmatpush.bf16.msra.mxu1 %v2448_v11  ;;  %v2424_v29 = vor.u32 %v2809_v27, %v2423_v26  ;;  %v2807_v33 = vld [vmem:[#allocation5 + $0xa4] sm:$0xf0]  ;;  %v2352_v34 = vor.u32 %v2791_v31, %v2351_v30  ;;  %v2343_v36 = vld [vmem:[#allocation5 + $0x10] sm:$0xf]  ;;  %v2789_v37 = vld [vmem:[#allocation5 + $0x14] sm:$0xf0] }
  0x4b   : > { %v2416_v35 = vor.u32 %v2807_v33, %v2415_v32  ;;  %v2407_v38 = vld [vmem:[#allocation5 + $0x90] sm:$0xf]  ;;  %v2805_v39 = vld [vmem:[#allocation5 + $0x94] sm:$0xf0]  ;;  %v2344_v40 = vor.u32 %v2789_v37, %v2343_v36  ;;  %v2335_v42 = vld [vmem:[#allocation5] sm:$0xf] }
  0x4c   : > { %v2408_v41 = vor.u32 %v2805_v39, %v2407_v38  ;;  %v2787_v43 = vld [vmem:[#allocation5 + $0x4] sm:$0xf0]  ;;  %v2399_v44 = vld [vmem:[#allocation5 + $0x80] sm:$0xf]  ;;  %v2519_v46 = vld [vmem:[#allocation5 + $0x170] sm:$0xf] }
  0x4d   : > { %1038 = vmatpush.bf16.msra.mxu0 %v2376_v16  ;;  %2901 = vmatpush.bf16.msra.mxu2 %v2376_v16  ;;  %v2803_v45 = vld [vmem:[#allocation5 + $0x84] sm:$0xf0]  ;;  %v2833_v47 = vld [vmem:[#allocation5 + $0x174] sm:$0xf0]  ;;  %v310_v48 = vld [vmem:[%s3431_s10] sm:$0xff]  ;;  %v2336_v51 = vor.u32 %v2787_v43, %v2335_v42  ;;  %s2332_s24 = sshll.u32 %s3427_s1, 7 }
  0x4e   : > { %2909 = vmatpush.bf16.msra.mxu3 %v2440_v17  ;;  %1087 = vmatpush.bf16.msra.mxu1 %v2440_v17  ;;  %v2583_v49 = vld [vmem:[#allocation5 + $0x1f0] sm:$0xf]  ;;  %v2849_v50 = vld [vmem:[#allocation5 + $0x1f4] sm:$0xf0]  ;;  %v358_v53 = vld [vmem:[%s3431_s10 + $0x180] sm:$0xff]  ;;  %v2400_v55 = vor.u32 %v2803_v45, %v2399_v44  ;;  %v2520_v58 = vor.u32 %v2833_v47, %v2519_v46  ;;  %s3977_s29 = scalar_lea.vmem [#allocation11], %s2332_s24 }
  0x4f   : > { %v316_v52 = vld [vmem:[%s3431_s10 + $0x30] sm:$0xff]  ;;  %v359_v56 = vld [vmem:[%s3431_s10 + $0x188] sm:$0xff]  ;;  %v365_v57 = vld [vmem:[%s3431_s10 + $0x1b8] sm:$0xff]  ;;  %v2584_v60 = vor.u32 %v2849_v50, %v2583_v49  ;;  %s2898_s23 = sshll.u32 %s3335_s22, 7  ;;  %s2203_s12 = sshll.u32 %s3977_s29, 4  ;;  %s2204_s12 = int_to_ptr.vmem [resolvable:$true] %s2203_s12 }
  0x50   : > { %v364_v54 = vld [vmem:[%s3431_s10 + $0x1b0] sm:$0xff]  ;;  %v2511_v59 = vld [vmem:[#allocation5 + $0x160] sm:$0xf]  ;;  %v2831_v61 = vld [vmem:[#allocation5 + $0x164] sm:$0xf0]  ;;  %v3453_v0 = vpack.c.bf16 %v316_v52, %v310_v48  ;;  %v3457_v4 = vpack.c.bf16 %v365_v57, %v359_v56  ;;  %s2202_s9 = scalar_lea.hbm %s4048_s5, %s2898_s23  ;;  %s2191_s22 = scalar_lea.sflag [#allocation4], %s3427_s1 }
  0x51   : > { %1039 = vmatpush.bf16.msra.mxu0 %v2368_v22  ;;  %2902 = vmatpush.bf16.msra.mxu2 %v2368_v22  ;;  %v311_v62 = vld [vmem:[%s3431_s10 + $0x8] sm:$0xff]  ;;  %v317_v63 = vld [vmem:[%s3431_s10 + $0x38] sm:$0xff]  ;;  %v3455_v1 = vpack.c.bf16 %v364_v54, %v358_v53  ;;  %v2575_v2 = vld [vmem:[#allocation5 + $0x1e0] sm:$0xf]  ;;  %v2512_v5 = vor.u32 %v2831_v61, %v2511_v59  ;;  %s2205_s13 = sshll.u32 %s2202_s9, 4  ;;  %s3216_s7 = scalar_lea.hbm %s4048_s5, 512  ;;  %s2206_s13 = int_to_ptr.hbm [resolvable:$true] %s2205_s13 }
  0x52   : > { %2910 = vmatpush.bf16.msra.mxu3 %v2432_v23  ;;  %1088 = vmatpush.bf16.msra.mxu1 %v2432_v23  ;;  %v2847_v3 = vld [vmem:[#allocation5 + $0x1e4] sm:$0xf0]  ;;  %v3459_v6 = vpack.c.bf16 %v317_v63, %v311_v62  ;;  %v2503_v7 = vld [vmem:[#allocation5 + $0x150] sm:$0xf]  ;;  %v2829_v9 = vld [vmem:[#allocation5 + $0x154] sm:$0xf0] }
  0x53   : > { %v2576_v8 = vor.u32 %v2847_v3, %v2575_v2  ;;  %v2647_v10 = vld [vmem:[#allocation5 + $0x270] sm:$0xf]  ;;  %v2865_v11 = vld [vmem:[#allocation5 + $0x274] sm:$0xf0]  ;;  %v2504_v15 = vor.u32 %v2829_v9, %v2503_v7  ;;  %v2639_v16 = vld [vmem:[#allocation5 + $0x260] sm:$0xf] }
  0x54   : > { %v2567_v12 = vld [vmem:[#allocation5 + $0x1d0] sm:$0xf]  ;;  %v2845_v13 = vld [vmem:[#allocation5 + $0x1d4] sm:$0xf0]  ;;  %v2648_v14 = vor.u32 %v2865_v11, %v2647_v10  ;;  %v2863_v17 = vld [vmem:[#allocation5 + $0x264] sm:$0xf0] }
  0x55   : > { %1040 = vmatpush.bf16.msra.mxu0 %v2360_v28  ;;  %2903 = vmatpush.bf16.msra.mxu2 %v2360_v28  ;;  %v2568_v18 = vor.u32 %v2845_v13, %v2567_v12  ;;  %v2495_v19 = vld [vmem:[#allocation5 + $0x140] sm:$0xf]  ;;  %v2827_v20 = vld [vmem:[#allocation5 + $0x144] sm:$0xf0]  ;;  %v2640_v22 = vor.u32 %v2863_v17, %v2639_v16  ;;  %v2631_v24 = vld [vmem:[#allocation5 + $0x250] sm:$0xf] }
  0x56   : > { %2911 = vmatpush.bf16.msra.mxu3 %v2424_v29  ;;  %1089 = vmatpush.bf16.msra.mxu1 %v2424_v29  ;;  %v2559_v21 = vld [vmem:[#allocation5 + $0x1c0] sm:$0xf]  ;;  %v2843_v23 = vld [vmem:[#allocation5 + $0x1c4] sm:$0xf0]  ;;  %v2861_v25 = vld [vmem:[#allocation5 + $0x254] sm:$0xf0]  ;;  %v2496_v26 = vor.u32 %v2827_v20, %v2495_v19 }
  0x57   : > { %v2711_v27 = vld [vmem:[#allocation5 + $0x2f0] sm:$0xf]  ;;  %v2881_v28 = vld [vmem:[#allocation5 + $0x2f4] sm:$0xf0]  ;;  %v322_v29 = vld [vmem:[%s3431_s10 + $0x60] sm:$0xff]  ;;  %v2560_v30 = vor.u32 %v2843_v23, %v2559_v21  ;;  %s3210_s26 = sshra.s32 %s2206_s13, 4  ;;  %s3211_s26 = int_to_ptr.hbm [resolvable:$true] %s3210_s26 }
  0x58   : > { %v2487_v31 = vld [vmem:[#allocation5 + $0x130] sm:$0xf]  ;;  %v2825_v32 = vld [vmem:[#allocation5 + $0x134] sm:$0xf0]  ;;  %v2623_v37 = vld [vmem:[#allocation5 + $0x240] sm:$0xf]  ;;  %p3217_p7 = scmp.lt.s32.totalorder %s3211_s26, %s4048_s5 }
  0x59   : > { %1041 = vmatpush.bf16.msra.mxu0 %v2352_v34  ;;  %2904 = vmatpush.bf16.msra.mxu2 %v2352_v34  ;;  %v2551_v33 = vld [vmem:[#allocation5 + $0x1b0] sm:$0xf]  ;;  %v2632_v34 = vor.u32 %v2861_v25, %v2631_v24  ;;  %v2841_v36 = vld [vmem:[#allocation5 + $0x1b4] sm:$0xf0]  ;;  %v2859_v38 = vld [vmem:[#allocation5 + $0x244] sm:$0xf0]  ;;  %v2488_v45 = vor.u32 %v2825_v32, %v2487_v31 }
  0x5a   : > { %2912 = vmatpush.bf16.msra.mxu3 %v2416_v35  ;;  %1090 = vmatpush.bf16.msra.mxu1 %v2416_v35  ;;  %v2712_v35 = vor.u32 %v2881_v28, %v2711_v27  ;;  %v328_v39 = vld [vmem:[%s3431_s10 + $0x90] sm:$0xff]  ;;  %v371_v42 = vld [vmem:[%s3431_s10 + $0x1e8] sm:$0xff]  ;;  %v377_v43 = vld [vmem:[%s3431_s10 + $0x218] sm:$0xff]  ;;  %v2552_v47 = vor.u32 %v2841_v36, %v2551_v33  ;;  %v2624_v50 = vor.u32 %v2859_v38, %v2623_v37  ;;  %s3212_s27 = scalar_lea.hbm %s3211_s26, 128 }
  0x5b   : > { %v323_v44 = vld [vmem:[%s3431_s10 + $0x68] sm:$0xff]  ;;  %v329_v46 = vld [vmem:[%s3431_s10 + $0x98] sm:$0xff]  ;;  %v2479_v48 = vld [vmem:[#allocation5 + $0x120] sm:$0xf]  ;;  %p3213_p1 = scmp.ne.s32.totalorder %s3211_s26, %s3212_s27  ;;  %p3218_p2 = scmp.lt.s32.totalorder %s3216_s7, %s3212_s27 }
  0x5c   : > { %v2823_v49 = vld [vmem:[#allocation5 + $0x124] sm:$0xf0]  ;;  %v2543_v53 = vld [vmem:[#allocation5 + $0x1a0] sm:$0xf]  ;;  %v3479_v56 = vpack.c.bf16 %v329_v46, %v323_v44  ;;  %v2615_v59 = vld [vmem:[#allocation5 + $0x230] sm:$0xf] }
  0x5d   : > { %1042 = vmatpush.bf16.msra.mxu0 %v2344_v40  ;;  %2905 = vmatpush.bf16.msra.mxu2 %v2344_v40  ;;  %v370_v40 = vld [vmem:[%s3431_s10 + $0x1e0] sm:$0xff]  ;;  %v2839_v54 = vld [vmem:[#allocation5 + $0x1a4] sm:$0xf0]  ;;  %v2480_v57 = vor.u32 %v2823_v49, %v2479_v48  ;;  %v2471_v2 = vld [vmem:[#allocation5 + $0x110] sm:$0xf]  ;;  %p3214_p4 = pnand %p3213_p1, %p3397_p0  ;;  %p3219_p9 = por %p3218_p2, %p3217_p7 }
  0x5e   : > { %2913 = vmatpush.bf16.msra.mxu3 %v2408_v41  ;;  %1091 = vmatpush.bf16.msra.mxu1 %v2408_v41  ;;  %v376_v41 = vld [vmem:[%s3431_s10 + $0x210] sm:$0xff]  ;;  %v2703_v62 = vld [vmem:[#allocation5 + $0x2e0] sm:$0xf]  ;;  %v2879_v63 = vld [vmem:[#allocation5 + $0x2e4] sm:$0xf0] }
  0x5f   : > { %v3475_v52 = vpack.c.bf16 %v376_v41, %v370_v40  ;;  %v2821_v3 = vld [vmem:[#allocation5 + $0x114] sm:$0xf0]  ;;  %v2535_v7 = vld [vmem:[#allocation5 + $0x190] sm:$0xf]  ;;  %v2607_v10 = vld [vmem:[#allocation5 + $0x220] sm:$0xf]  ;;  %p3215_p8 = pneg %p3214_p4 }
  0x60   : > { %v2837_v9 = vld [vmem:[#allocation5 + $0x194] sm:$0xf0]  ;;  %v2855_v11 = vld [vmem:[#allocation5 + $0x224] sm:$0xf0]  ;;  %v2463_v16 = vld [vmem:[#allocation5 + $0x100] sm:$0xf] }
  0x61   : > { %1043 = vmatpush.bf16.msra.mxu0 %v2336_v51  ;;  %2906 = vmatpush.bf16.msra.mxu2 %v2336_v51  ;;  %v3473_v51 = vpack.c.bf16 %v328_v39, %v322_v29  ;;  %v2536_v12 = vor.u32 %v2837_v9, %v2535_v7  ;;  %v2608_v13 = vor.u32 %v2855_v11, %v2607_v10  ;;  %v2599_v19 = vld [vmem:[#allocation5 + $0x210] sm:$0xf]  ;;  %v2853_v20 = vld [vmem:[#allocation5 + $0x214] sm:$0xf0]  ;;  %v2687_v21 = vld [vmem:[#allocation5 + $0x2c0] sm:$0xf]  ;;  %p3220_p10 = pnand %p3219_p9, %p3215_p8 }
  0x62   : > { %2914 = vmatpush.bf16.msra.mxu3 %v2400_v55  ;;  %1092 = vmatpush.bf16.msra.mxu1 %v2400_v55  ;;  %v3477_v55 = vpack.c.bf16 %v377_v43, %v371_v42  ;;  %v2527_v23 = vld [vmem:[#allocation5 + $0x180] sm:$0xf]  ;;  %v2835_v25 = vld [vmem:[#allocation5 + $0x184] sm:$0xf0]  ;;  %v2600_v27 = vor.u32 %v2853_v20, %v2599_v19  ;;  %v340_v29 = vld [vmem:[%s3431_s10 + $0xf0] sm:$0xff] }
  0x63   : > { %v2528_v28 = vor.u32 %v2835_v25, %v2527_v23  ;;  %v2591_v31 = vld [vmem:[#allocation5 + $0x200] sm:$0xf]  ;;  %v2851_v32 = vld [vmem:[#allocation5 + $0x204] sm:$0xf0]  ;;  %v389_v36 = vld [vmem:[%s3431_s10 + $0x278] sm:$0xff] }
  0x64   : > { %1044 = vmatmul.bf16.vlgmr.msra.gmra.mxu0 %v3453_v0  ;;  %1064 = vmatmul.bf16.vlgmr.msra.gmra.mxu2 %v3455_v1  ;;  %v382_v33 = vld [vmem:[%s3431_s10 + $0x240] sm:$0xff]  ;;  %v2679_v37 = vld [vmem:[#allocation5 + $0x2b0] sm:$0xf]  ;;  %v2873_v38 = vld [vmem:[#allocation5 + $0x2b4] sm:$0xf0]  ;;  %v2592_v41 = vor.u32 %v2851_v32, %v2591_v31 }
  0x65   : > { %1134 = vmatpush.bf16.msrb.mxu2 %v2520_v58  ;;  %1113 = vmatmul.bf16.vlgmr.msra.gmra.mxu3 %v3457_v4  ;;  %v2544_v58 = vor.u32 %v2839_v54, %v2543_v53  ;;  %v335_v39 = vld [vmem:[%s3431_s10 + $0xc8] sm:$0xff]  ;;  %v341_v40 = vld [vmem:[%s3431_s10 + $0xf8] sm:$0xff]  ;;  %v2800_v49 = vld [vmem:[#allocation5 + $0x74] sm:$0xf] }
  0x66   : > { %1183 = vmatpush.bf16.msrb.mxu3 %v2584_v60  ;;  %1093 = vmatmul.bf16.vlgmr.msra.gmra.mxu1 %v3459_v6  ;;  %v2857_v60 = vld [vmem:[#allocation5 + $0x234] sm:$0xf0]  ;;  %v3499_v46 = vpack.c.bf16 %v341_v40, %v335_v39  ;;  %v2871_v48 = vld [vmem:[#allocation5 + $0x2a4] sm:$0xf0]  ;;  %v2816_v54 = vld [vmem:[#allocation5 + $0xf4] sm:$0xf] }
  0x67   : > { %1232 = vmatpush.bf16.msrb.mxu0 %v2648_v14  ;;  %1281 = vmatpush.bf16.msrb.mxu1 %v2712_v35  ;;  %v2616_v61 = vor.u32 %v2857_v60, %v2615_v59  ;;  %v2695_v14 = vld [vmem:[#allocation5 + $0x2d0] sm:$0xf]  ;;  %v383_v35 = vld [vmem:[%s3431_s10 + $0x248] sm:$0xff]  ;;  %v2869_v60 = vld [vmem:[#allocation5 + $0x294] sm:$0xf0] }
  0x68   : > { %v3497_v44 = vpack.c.bf16 %v389_v36, %v383_v35  ;;  %v2663_v59 = vld [vmem:[#allocation5 + $0x290] sm:$0xf]  ;;  %v394_v7 = vld [vmem:[%s3431_s10 + $0x2a0] sm:$0xff]  ;;  %v395_v10 = vld [vmem:[%s3431_s10 + $0x2a8] sm:$0xff] }
  0x69   : > { %1135 = vmatpush.bf16.msrb.mxu2 %v2512_v5  ;;  %v2704_v5 = vor.u32 %v2879_v63, %v2703_v62  ;;  %v2664_v62 = vor.u32 %v2869_v60, %v2663_v59  ;;  %v2655_v63 = vld [vmem:[#allocation5 + $0x280] sm:$0xf]  ;;  %v401_v11 = vld [vmem:[%s3431_s10 + $0x2d8] sm:$0xff]  ;;  %v2385_v19 = vld [vmem:[#allocation5 + $0x68] sm:$0xf0] }
  0x6a   : > { %1184 = vmatpush.bf16.msrb.mxu3 %v2576_v8  ;;  %v2472_v8 = vor.u32 %v2821_v3, %v2471_v2  ;;  %v2867_v2 = vld [vmem:[#allocation5 + $0x284] sm:$0xf0]  ;;  %v346_v3 = vld [vmem:[%s3431_s10 + $0x120] sm:$0xff]  ;;  %v321_v31 = vld [vmem:[%s3431_s10 + $0x58] sm:$0xff] }
  0x6b   : > { %1233 = vmatpush.bf16.msrb.mxu0 %v2640_v22  ;;  %1282 = vmatpush.bf16.msrb.mxu1 %v2704_v5  ;;  %v2875_v22 = vld [vmem:[#allocation5 + $0x2c4] sm:$0xf0]  ;;  %v352_v5 = vld [vmem:[%s3431_s10 + $0x150] sm:$0xff]  ;;  %v2656_v9 = vor.u32 %v2867_v2, %v2655_v63  ;;  %v2814_v20 = vld [vmem:[#allocation5 + $0xe4] sm:$0xf] }
  0x6c   : > { %v318_v25 = vld [vmem:[%s3431_s10 + $0x40] sm:$0xff]  ;;  %v2796_v36 = vld [vmem:[#allocation5 + $0x54] sm:$0xf]  ;;  %v2441_v40 = vld [vmem:[#allocation5 + $0xd8] sm:$0xf0] }
  0x6d   : > { %1136 = vmatpush.bf16.msrb.mxu2 %v2504_v15  ;;  %v2877_v15 = vld [vmem:[#allocation5 + $0x2d4] sm:$0xf0]  ;;  %v2369_v63 = vld [vmem:[#allocation5 + $0x48] sm:$0xf0]  ;;  %v2810_v2 = vld [vmem:[#allocation5 + $0xc4] sm:$0xf] }
  0x6e   : > { %1185 = vmatpush.bf16.msrb.mxu3 %v2568_v18  ;;  %v2696_v17 = vor.u32 %v2877_v15, %v2695_v14  ;;  %v2819_v18 = vld [vmem:[#allocation5 + $0x104] sm:$0xf0]  ;;  %v3513_v14 = vpack.c.bf16 %v352_v5, %v346_v3  ;;  %v2433_v5 = vld [vmem:[#allocation5 + $0xc8] sm:$0xf0] }
  0x6f   : > { %1234 = vmatpush.bf16.msrb.mxu0 %v2632_v34  ;;  %v2464_v24 = vor.u32 %v2819_v18, %v2463_v16  ;;  %v388_v34 = vld [vmem:[%s3431_s10 + $0x270] sm:$0xff]  ;;  %v3517_v16 = vpack.c.bf16 %v401_v11, %v395_v10  ;;  %v2798_v18 = vld [vmem:[#allocation5 + $0x64] sm:$0xf] }
  0x70   : > { %1283 = vmatpush.bf16.msrb.mxu1 %v2696_v17  ;;  %v3495_v43 = vpack.c.bf16 %v388_v34, %v382_v33  ;;  %v338_v10 = vld [vmem:[%s3431_s10 + $0xe0] sm:$0xff]  ;;  %v344_v11 = vld [vmem:[%s3431_s10 + $0x110] sm:$0xff] }
  0x71   : > { %1137 = vmatpush.bf16.msrb.mxu2 %v2496_v26  ;;  %v334_v26 = vld [vmem:[%s3431_s10 + $0xc0] sm:$0xff] }
  0x72   : > { %1186 = vmatpush.bf16.msrb.mxu3 %v2560_v30  ;;  %v2688_v30 = vor.u32 %v2875_v22, %v2687_v21  ;;  %v3493_v42 = vpack.c.bf16 %v340_v29, %v334_v26  ;;  %v2388_v21 = vor.u32 %v2798_v18, %v2385_v19  ;;  %v2449_v22 = vld [vmem:[#allocation5 + $0xe8] sm:$0xf0]  ;;  %v314_v26 = vld [vmem:[%s3431_s10 + $0x20] sm:$0xff]  ;;  %v345_v19 = vld [vmem:[%s3431_s10 + $0x118] sm:$0xff] }
  0x73   : > { %1235 = vmatpush.bf16.msrb.mxu0 %v2624_v50  ;;  %v2393_v50 = vld [vmem:[#allocation5 + $0x78] sm:$0xf0]  ;;  %v2452_v23 = vor.u32 %v2814_v20, %v2449_v22  ;;  %v319_v29 = vld [vmem:[%s3431_s10 + $0x48] sm:$0xff] }
  0x74   : > { %1049 = vmatmul.bf16.gmra.mxu0 %v3473_v51  ;;  %1069 = vmatmul.bf16.gmra.mxu2 %v3475_v52  ;;  %v339_v18 = vld [vmem:[%s3431_s10 + $0xe8] sm:$0xff] }
  0x75   : > { %1138 = vmatpush.bf16.msrb.mxu2 %v2488_v45  ;;  %1118 = vmatmul.bf16.gmra.mxu3 %v3477_v55  ;;  %v2680_v45 = vor.u32 %v2873_v38, %v2679_v37  ;;  %v2377_v37 = vld [vmem:[#allocation5 + $0x58] sm:$0xf0]  ;;  %v2812_v38 = vld [vmem:[#allocation5 + $0xd4] sm:$0xf] }
  0x76   : > { %1187 = vmatpush.bf16.msrb.mxu3 %v2552_v47  ;;  %1098 = vmatmul.bf16.gmra.mxu1 %v3479_v56  ;;  %v2671_v47 = vld [vmem:[#allocation5 + $0x2a0] sm:$0xf]  ;;  %v2380_v39 = vor.u32 %v2796_v36, %v2377_v37  ;;  %v356_v37 = vld [vmem:[%s3431_s10 + $0x170] sm:$0xff] }
  0x77   : > { %1236 = vmatpush.bf16.msrb.mxu0 %v2616_v61  ;;  %1284 = vmatpush.bf16.msrb.mxu1 %v2688_v30  ;;  %v2672_v53 = vor.u32 %v2871_v48, %v2671_v47  ;;  %v315_v30 = vld [vmem:[%s3431_s10 + $0x28] sm:$0xff]  ;;  %v330_v47 = vld [vmem:[%s3431_s10 + $0xa0] sm:$0xff] }
  0x78   : > { %v3539_v35 = vpack.c.bf16 %v321_v31, %v315_v30  ;;  %v326_v48 = vld [vmem:[%s3431_s10 + $0x80] sm:$0xff]  ;;  %v348_v30 = vld [vmem:[%s3431_s10 + $0x130] sm:$0xff] }
  0x79   : > { %1139 = vmatpush.bf16.msrb.mxu2 %v2480_v57  ;;  %v2396_v57 = vor.u32 %v2800_v49, %v2393_v50  ;;  %v332_v49 = vld [vmem:[%s3431_s10 + $0xb0] sm:$0xff]  ;;  %v325_v50 = vld [vmem:[%s3431_s10 + $0x78] sm:$0xff]  ;;  %v354_v31 = vld [vmem:[%s3431_s10 + $0x160] sm:$0xff] }
  0x7a   : > { %1188 = vmatpush.bf16.msrb.mxu3 %v2544_v58  ;;  %v2457_v58 = vld [vmem:[#allocation5 + $0xf8] sm:$0xf0]  ;;  %4075 = vst [vmem:[#allocation17_spill] sm:$0xff] %v3539_v35  ;;  %v3555_v59 = vpack.c.bf16 %v332_v49, %v326_v48  ;;  %v350_v36 = vld [vmem:[%s3431_s10 + $0x140] sm:$0xff] }
  0x7b   : > { %1237 = vmatpush.bf16.msrb.mxu0 %v2608_v13  ;;  %1285 = vmatpush.bf16.msrb.mxu1 %v2680_v45  ;;  %v2460_v61 = vor.u32 %v2816_v54, %v2457_v58  ;;  %v353_v13 = vld [vmem:[%s3431_s10 + $0x158] sm:$0xff]  ;;  %v324_v45 = vld [vmem:[%s3431_s10 + $0x70] sm:$0xff]  ;;  %v327_v54 = vld [vmem:[%s3431_s10 + $0x88] sm:$0xff] }
  0x7c   : > { %v3553_v58 = vpack.c.bf16 %v330_v47, %v324_v45  ;;  %4076 = vst [vmem:[#allocation18_spill] sm:$0xff] %v3555_v59  ;;  %v3593_v45 = vpack.c.bf16 %v354_v31, %v348_v30  ;;  %v3595_v47 = vpack.c.bf16 %v356_v37, %v350_v36  ;;  %v2832_v30 = vld [vmem:[#allocation5 + $0x174] sm:$0xf]  ;;  %v2521_v31 = vld [vmem:[#allocation5 + $0x178] sm:$0xf0] }
  0x7d   : > { %1140 = vmatpush.bf16.msrb.mxu2 %v2472_v8  ;;  %v400_v8 = vld [vmem:[%s3431_s10 + $0x2d0] sm:$0xff]  ;;  %v2345_v37 = vld [vmem:[#allocation5 + $0x18] sm:$0xf0] }
  0x7e   : > { %1189 = vmatpush.bf16.msrb.mxu3 %v2536_v12  ;;  %v347_v12 = vld [vmem:[%s3431_s10 + $0x128] sm:$0xff]  ;;  %v3515_v15 = vpack.c.bf16 %v400_v8, %v394_v7  ;;  %v2436_v7 = vor.u32 %v2810_v2, %v2433_v5  ;;  %v336_v8 = vld [vmem:[%s3431_s10 + $0xd0] sm:$0xff]  ;;  %4080 = vst [vmem:[#allocation22_spill] sm:$0xff] %v3595_v47  ;;  %v3605_v2 = vld [vmem:[#allocation7] sm:$0x3] }
  0x7f   : > { %1238 = vmatpush.bf16.msrb.mxu0 %v2600_v27  ;;  %1286 = vmatpush.bf16.msrb.mxu1 %v2672_v53  ;;  %v3519_v17 = vpack.c.bf16 %v353_v13, %v347_v12  ;;  %v320_v27 = vld [vmem:[%s3431_s10 + $0x50] sm:$0xff]  ;;  %v331_v53 = vld [vmem:[%s3431_s10 + $0xa8] sm:$0xff]  ;;  %v337_v12 = vld [vmem:[%s3431_s10 + $0xd8] sm:$0xff]  ;;  %4082 = vst [vmem:[#allocation24_spill] sm:$0xff] %v3605_v2 }
  0x80   : > { %v3535_v33 = vpack.c.bf16 %v320_v27, %v314_v26  ;;  %v3557_v60 = vpack.c.bf16 %v331_v53, %v325_v50  ;;  %v343_v13 = vld [vmem:[%s3431_s10 + $0x108] sm:$0xff]  ;;  %v2808_v26 = vld [vmem:[#allocation5 + $0xb4] sm:$0xf]  ;;  %v2790_v50 = vld [vmem:[#allocation5 + $0x24] sm:$0xf] }
  0x81   : > { %1141 = vmatpush.bf16.msrb.mxu2 %v2464_v24  ;;  %v312_v24 = vld [vmem:[%s3431_s10 + $0x10] sm:$0xff]  ;;  %v3577_v22 = vpack.c.bf16 %v343_v13, %v337_v12  ;;  %v2353_v53 = vld [vmem:[#allocation5 + $0x28] sm:$0xf0]  ;;  %v366_v5 = vld [vmem:[%s3431_s10 + $0x1c0] sm:$0xff]  ;;  %v3616_v13 = vperm.slane %v3605_v2, 0 }
  0x82   : > { %1190 = vmatpush.bf16.msrb.mxu3 %v2528_v28  ;;  %v313_v28 = vld [vmem:[%s3431_s10 + $0x18] sm:$0xff]  ;;  %v3533_v32 = vpack.c.bf16 %v318_v25, %v312_v24  ;;  %4074 = vst [vmem:[#allocation16_spill] sm:$0xff] %v3535_v33  ;;  %v2792_v24 = vld [vmem:[#allocation5 + $0x34] sm:$0xf] }
  0x83   : > { %1239 = vmatpush.bf16.msrb.mxu0 %v2592_v41  ;;  %1287 = vmatpush.bf16.msrb.mxu1 %v2664_v62  ;;  %v3537_v34 = vpack.c.bf16 %v319_v29, %v313_v28  ;;  %v2444_v41 = vor.u32 %v2812_v38, %v2441_v40  ;;  %v2794_v62 = vld [vmem:[#allocation5 + $0x44] sm:$0xf]  ;;  %v2361_v25 = vld [vmem:[#allocation5 + $0x38] sm:$0xf0]  ;;  %v351_v40 = vld [vmem:[%s3431_s10 + $0x148] sm:$0xff] }
  0x84   : > { %1054 = vmatmul.bf16.gmra.mxu0 %v3493_v42  ;;  %1074 = vmatmul.bf16.gmra.mxu2 %v3495_v43  ;;  %v2372_v3 = vor.u32 %v2794_v62, %v2369_v63  ;;  %v2364_v27 = vor.u32 %v2792_v24, %v2361_v25  ;;  %v2425_v28 = vld [vmem:[#allocation5 + $0xb8] sm:$0xf0]  ;;  %v2417_v62 = vld [vmem:[#allocation5 + $0xa8] sm:$0xf0]  ;;  %v2788_v36 = vld [vmem:[#allocation5 + $0x14] sm:$0xf] }
  0x85   : > { %1123 = vmatmul.bf16.gmra.mxu3 %v3497_v44  ;;  %1330 = vmatpush.bf16.msra.mxu2 %v2396_v57  ;;  %v333_v57 = vld [vmem:[%s3431_s10 + $0xb8] sm:$0xff]  ;;  %v2428_v29 = vor.u32 %v2808_v26, %v2425_v28 }
  0x86   : > { %1103 = vmatmul.bf16.gmra.mxu1 %v3499_v46  ;;  %1379 = vmatpush.bf16.msra.mxu3 %v2460_v61  ;;  %v3559_v61 = vpack.c.bf16 %v333_v57, %v327_v54  ;;  %v349_v38 = vld [vmem:[%s3431_s10 + $0x138] sm:$0xff]  ;;  %v2806_v54 = vld [vmem:[#allocation5 + $0xa4] sm:$0xf]  ;;  %v2356_v57 = vor.u32 %v2790_v50, %v2353_v53 }
  0x87   : > { %1288 = vmatpush.bf16.msrb.mxu1 %v2656_v9  ;;  %v342_v9 = vld [vmem:[%s3431_s10 + $0x100] sm:$0xff]  ;;  %v2420_v63 = vor.u32 %v2806_v54, %v2417_v62  ;;  %v369_v12 = vld [vmem:[%s3431_s10 + $0x1d8] sm:$0xff] }
  0x88   : > { %4077 = vst [vmem:[#allocation19_spill] sm:$0xff] %v3559_v61  ;;  %v3573_v20 = vpack.c.bf16 %v342_v9, %v336_v8  ;;  %v368_v8 = vld [vmem:[%s3431_s10 + $0x1d0] sm:$0xff]  ;;  %v361_v9 = vld [vmem:[%s3431_s10 + $0x198] sm:$0xff]  ;;  %v2830_v54 = vld [vmem:[#allocation5 + $0x164] sm:$0xf] }
  0x89   : > { %1331 = vmatpush.bf16.msra.mxu2 %v2388_v21  ;;  %v3575_v21 = vpack.c.bf16 %v344_v11, %v338_v10  ;;  %v367_v10 = vld [vmem:[%s3431_s10 + $0x1c8] sm:$0xff] }
  0x8a   : > { %1380 = vmatpush.bf16.msra.mxu3 %v2452_v23  ;;  %v3579_v23 = vpack.c.bf16 %v345_v19, %v339_v18  ;;  %v363_v11 = vld [vmem:[%s3431_s10 + $0x1a8] sm:$0xff]  ;;  %v3622_v25 = vpack.c.bf16 %v367_v10, %v361_v9  ;;  %v2828_v9 = vld [vmem:[#allocation5 + $0x154] sm:$0xf]  ;;  %v2505_v10 = vld [vmem:[#allocation5 + $0x158] sm:$0xf0] }
  0x8b   : > { %4078 = vst [vmem:[#allocation20_spill] sm:$0xff] %v3575_v21 }
  0x8c   : > { %4079 = vst [vmem:[#allocation21_spill] sm:$0xff] %v3579_v23 }
  0x8d   : > { %1332 = vmatpush.bf16.msra.mxu2 %v2380_v39  ;;  %v355_v39 = vld [vmem:[%s3431_s10 + $0x168] sm:$0xff] }
  0x8e   : > { %1381 = vmatpush.bf16.msra.mxu3 %v2444_v41  ;;  %v357_v41 = vld [vmem:[%s3431_s10 + $0x178] sm:$0xff]  ;;  %v3597_v48 = vpack.c.bf16 %v355_v39, %v349_v38  ;;  %v2524_v38 = vor.u32 %v2832_v30, %v2521_v31  ;;  %v2804_v39 = vld [vmem:[#allocation5 + $0x94] sm:$0xf]  ;;  %v374_v31 = vld [vmem:[%s3431_s10 + $0x200] sm:$0xff] }
  0x8f   : > { %v3599_v49 = vpack.c.bf16 %v357_v41, %v351_v40  ;;  %v2348_v40 = vor.u32 %v2788_v36, %v2345_v37  ;;  %v2409_v41 = vld [vmem:[#allocation5 + $0x98] sm:$0xf0]  ;;  %v380_v36 = vld [vmem:[%s3431_s10 + $0x230] sm:$0xff]  ;;  %v379_v37 = vld [vmem:[%s3431_s10 + $0x228] sm:$0xff] }
  0x90   : > { %1428 = vmatpush.bf16.msra.mxu0 %v2524_v38  ;;  %v2412_v53 = vor.u32 %v2804_v39, %v2409_v41  ;;  %v373_v30 = vld [vmem:[%s3431_s10 + $0x1f8] sm:$0xff]  ;;  %v375_v38 = vld [vmem:[%s3431_s10 + $0x208] sm:$0xff]  ;;  %v2826_v41 = vld [vmem:[#allocation5 + $0x144] sm:$0xf] }
  0x91   : > { %1333 = vmatpush.bf16.msra.mxu2 %v2372_v3  ;;  %4081 = vst [vmem:[#allocation23_spill] sm:$0xff] %v3599_v49  ;;  %v360_v3 = vld [vmem:[%s3431_s10 + $0x190] sm:$0xff]  ;;  %v381_v39 = vld [vmem:[%s3431_s10 + $0x238] sm:$0xff] }
  0x92   : > { %1382 = vmatpush.bf16.msra.mxu3 %v2436_v7  ;;  %v362_v7 = vld [vmem:[%s3431_s10 + $0x1a0] sm:$0xff]  ;;  %v3618_v18 = vpack.c.bf16 %v366_v5, %v360_v3 }
  0x93   : > { %v3620_v19 = vpack.c.bf16 %v368_v8, %v362_v7 }
  0x94   : > { %1059 = vmatmul.bf16.gmra.mxu0 %v3513_v14  ;;  %1079 = vmatmul.bf16.gmra.mxu2 %v3515_v15 }
  0x95   : > { %1128 = vmatmul.bf16.gmra.mxu3 %v3517_v16  ;;  %1334 = vmatpush.bf16.msra.mxu2 %v2364_v27  ;;  %4083 = vst [vmem:[#allocation25_spill] sm:$0xff] %v3620_v19  ;;  %v3625_v27 = vpack.c.bf16 %v369_v12, %v363_v11  ;;  %v2508_v12 = vor.u32 %v2828_v9, %v2505_v10 }
  0x96   : > { %1108 = vmatmul.bf16.gmra.mxu1 %v3519_v17  ;;  %1383 = vmatpush.bf16.msra.mxu3 %v2428_v29  ;;  %v3652_v9 = vpack.c.bf16 %v379_v37, %v373_v30  ;;  %v2846_v30 = vld [vmem:[#allocation5 + $0x1e4] sm:$0xf]  ;;  %v2337_v37 = vld [vmem:[#allocation5 + $0x8] sm:$0xf0] }
  0x97   : > { %4084 = vst [vmem:[#allocation26_spill] sm:$0xff] %v3625_v27 }
  0x99   : > { %1335 = vmatpush.bf16.msra.mxu2 %v2356_v57  ;;  %v2513_v57 = vld [vmem:[#allocation5 + $0x168] sm:$0xf0] }
  0x9a   : > { %1384 = vmatpush.bf16.msra.mxu3 %v2420_v63  ;;  %v2516_v3 = vor.u32 %v2830_v54, %v2513_v57 }
  0x9c   : > { %1429 = vmatpush.bf16.msra.mxu0 %v2516_v3 }
  0x9d   : > { %1336 = vmatpush.bf16.msra.mxu2 %v2348_v40 }
  0x9e   : > { %1385 = vmatpush.bf16.msra.mxu3 %v2412_v53  ;;  %v2848_v53 = vld [vmem:[#allocation5 + $0x1f4] sm:$0xf] }
  0xa0   : > { %1430 = vmatpush.bf16.msra.mxu0 %v2508_v12 }
  0xa4   : > { %1142 = vmatmul.bf16.vlgmr.msrb.gmra.mxu2 %v3533_v32  ;;  %1240 = vmatmul.bf16.vlgmr.msrb.gmra.mxu0 %v3535_v33 }
  0xa5   : > { %1191 = vmatmul.bf16.vlgmr.msrb.gmra.mxu3 %v3537_v34 }
  0xa6   : > { %1289 = vmatmul.bf16.vlgmr.msrb.gmra.mxu1 %v3539_v35 }
  0xb4   : > { %1147 = vmatmul.bf16.gmra.mxu2 %v3553_v58  ;;  %1245 = vmatmul.bf16.gmra.mxu0 %v3555_v59 }
  0xb5   : > { %1196 = vmatmul.bf16.gmra.mxu3 %v3557_v60 }
  0xb6   : > { %1294 = vmatmul.bf16.gmra.mxu1 %v3559_v61 }
  0xc4   : > { %1152 = vmatmul.bf16.gmra.mxu2 %v3573_v20  ;;  %1250 = vmatmul.bf16.gmra.mxu0 %v3575_v21 }
  0xc5   : > { %1201 = vmatmul.bf16.gmra.mxu3 %v3577_v22 }
  0xc6   : > { %1299 = vmatmul.bf16.gmra.mxu1 %v3579_v23  ;;  %v2840_v23 = vld [vmem:[#allocation5 + $0x1b4] sm:$0xf] }
  0xd4   : > { %1157 = vmatmul.bf16.gmra.mxu2 %v3593_v45  ;;  %1255 = vmatmul.bf16.gmra.mxu0 %v3595_v47  ;;  %v2465_v47 = vld [vmem:[#allocation5 + $0x108] sm:$0xf0] }
  0xd5   : > { %1206 = vmatmul.bf16.gmra.mxu3 %v3597_v48 }
  0xd6   : > { %1304 = vmatmul.bf16.gmra.mxu1 %v3599_v49  ;;  %v2818_v49 = vld [vmem:[#allocation5 + $0x104] sm:$0xf] }
  0xe1   : > { %v1045_v24 = vpop.f32.mrf.mxu0 }
  0xe2   : > { %v1046_v26 = vadd.f32 %v1045_v24, %v3616_v13  ;;  %v372_v24 = vld [vmem:[%s3431_s10 + $0x1f0] sm:$0xff] }
  0xe3   : > { %v1094_v28 = vpop.f32.mrf.mxu1 }
  0xe4   : > { %1162 = vmatmul.bf16.gmra.mxu2 %v3618_v18  ;;  %1260 = vmatmul.bf16.gmra.mxu0 %v3620_v19  ;;  %v3629_v29 = vadd.f32 %v1094_v28, %v1046_v26  ;;  %v378_v26 = vld [vmem:[%s3431_s10 + $0x220] sm:$0xff] }
  0xe5   : > { %1211 = vmatmul.bf16.gmra.mxu3 %v3622_v25 }
  0xe6   : > { %1309 = vmatmul.bf16.gmra.mxu1 %v3625_v27  ;;  %v3657_v27 = vpack.c.bf16 %v381_v39, %v375_v38 }
  0xe7   : > { %v1065_v50 = vpop.f32.mrf.mxu2 }
  0xe8   : > { %v1066_v62 = vadd.f32 %v1065_v50, %v3616_v13  ;;  %v1114_v63 = vpop.f32.mrf.mxu3  ;;  %v2497_v50 = vld [vmem:[#allocation5 + $0x148] sm:$0xf0]  ;;  %4086 = vst [vmem:[#allocation28_spill] sm:$0xff] %v3657_v27 }
  0xe9   : > { %v1047_v5 = vpop.f32.mrf.mxu0  ;;  %v2500_v3 = vor.u32 %v2826_v41, %v2497_v50  ;;  %v2577_v41 = vld [vmem:[#allocation5 + $0x1e8] sm:$0xf0]  ;;  %v2802_v50 = vld [vmem:[#allocation5 + $0x84] sm:$0xf] }
  0xea   : > { %v3634_v7 = vadd.f32 %v1114_v63, %v1066_v62  ;;  %v1048_v8 = vadd.f32 %v1047_v5, %v3616_v13  ;;  %v3648_v62 = vpack.c.bf16 %v378_v26, %v372_v24  ;;  %v3650_v63 = vpack.c.bf16 %v380_v36, %v374_v31  ;;  %v2585_v5 = vld [vmem:[#allocation5 + $0x1f8] sm:$0xf0]  ;;  %v2824_v26 = vld [vmem:[#allocation5 + $0x134] sm:$0xf]  ;;  %v2786_v36 = vld [vmem:[#allocation5 + $0x4] sm:$0xf] }
  0xeb   : > { %v1096_v11 = vpop.f32.mrf.mxu1  ;;  %v2588_v10 = vor.u32 %v2848_v53, %v2585_v5  ;;  %1431 = vmatpush.bf16.msra.mxu0 %v2500_v3  ;;  %v2489_v31 = vld [vmem:[#allocation5 + $0x138] sm:$0xf0]  ;;  %v2340_v38 = vor.u32 %v2786_v36, %v2337_v37  ;;  %v2580_v39 = vor.u32 %v2846_v30, %v2577_v41  ;;  %v2401_v53 = vld [vmem:[#allocation5 + $0x88] sm:$0xf0]  ;;  %v2844_v5 = vld [vmem:[#allocation5 + $0x1d4] sm:$0xf] }
  0xec   : > { %v3639_v28 = vadd.f32 %v1096_v11, %v1048_v8  ;;  %4085 = vst [vmem:[#allocation27_spill] sm:$0xff] %v3650_v63  ;;  %v2481_v3 = vld [vmem:[#allocation5 + $0x128] sm:$0xf0]  ;;  %v2473_v41 = vld [vmem:[#allocation5 + $0x118] sm:$0xf0] }
  0xed   : > { %1477 = vmatpush.bf16.msra.mxu1 %v2588_v10  ;;  %1337 = vmatpush.bf16.msra.mxu2 %v2340_v38  ;;  %v2842_v38 = vld [vmem:[#allocation5 + $0x1c4] sm:$0xf] }
  0xef   : > { %v1067_v40 = vpop.f32.mrf.mxu2 }
  0xf0   : > { %v1068_v54 = vadd.f32 %v1067_v40, %v3616_v13  ;;  %v1116_v57 = vpop.f32.mrf.mxu3  ;;  %v2492_v40 = vor.u32 %v2824_v26, %v2489_v31  ;;  %v2569_v26 = vld [vmem:[#allocation5 + $0x1d8] sm:$0xf0] }
  0xf1   : > { %v1050_v8 = vpop.f32.mrf.mxu0  ;;  %1478 = vmatpush.bf16.msra.mxu1 %v2580_v39  ;;  %v2572_v30 = vor.u32 %v2844_v5, %v2569_v26  ;;  %v385_v5 = vld [vmem:[%s3431_s10 + $0x258] sm:$0xff]  ;;  %v391_v26 = vld [vmem:[%s3431_s10 + $0x288] sm:$0xff] }
  0xf2   : > { %v3654_v11 = vadd.f32 %v1116_v57, %v1068_v54  ;;  %v1051_v12 = vadd.f32 %v1050_v8, %v3616_v13  ;;  %1432 = vmatpush.bf16.msra.mxu0 %v2492_v40  ;;  %v2404_v57 = vor.u32 %v2802_v50, %v2401_v53  ;;  %v2820_v40 = vld [vmem:[#allocation5 + $0x114] sm:$0xf]  ;;  %v2561_v53 = vld [vmem:[#allocation5 + $0x1c8] sm:$0xf0] }
  0xf3   : > { %v1099_v19 = vpop.f32.mrf.mxu1  ;;  %v2476_v50 = vor.u32 %v2820_v40, %v2473_v41 }
  0xf4   : > { %1167 = vmatmul.bf16.gmra.mxu2 %v3648_v62  ;;  %1265 = vmatmul.bf16.gmra.mxu0 %v3650_v63  ;;  %v3661_v24 = vadd.f32 %v1099_v19, %v1051_v12  ;;  %v2822_v19 = vld [vmem:[#allocation5 + $0x124] sm:$0xf] }
  0xf5   : > { %1216 = vmatmul.bf16.gmra.mxu3 %v3652_v9  ;;  %v2484_v12 = vor.u32 %v2822_v19, %v2481_v3  ;;  %1479 = vmatpush.bf16.msra.mxu1 %v2572_v30  ;;  %v2564_v3 = vor.u32 %v2842_v38, %v2561_v53  ;;  %v2468_v30 = vor.u32 %v2818_v49, %v2465_v47  ;;  %v2553_v38 = vld [vmem:[#allocation5 + $0x1b8] sm:$0xf0] }
  0xf6   : > { %1314 = vmatmul.bf16.gmra.mxu1 %v3657_v27  ;;  %1386 = vmatpush.bf16.msra.mxu3 %v2404_v57  ;;  %v390_v57 = vld [vmem:[%s3431_s10 + $0x280] sm:$0xff]  ;;  %v393_v27 = vld [vmem:[%s3431_s10 + $0x298] sm:$0xff]  ;;  %v3684_v53 = vpack.c.bf16 %v391_v26, %v385_v5  ;;  %v2556_v21 = vor.u32 %v2840_v23, %v2553_v38  ;;  %v2864_v23 = vld [vmem:[#allocation5 + $0x274] sm:$0xf] }
  0xf7   : > { %v1070_v54 = vpop.f32.mrf.mxu2  ;;  %1433 = vmatpush.bf16.msra.mxu0 %v2484_v12  ;;  %v2649_v49 = vld [vmem:[#allocation5 + $0x278] sm:$0xf0]  ;;  %v2836_v26 = vld [vmem:[#allocation5 + $0x194] sm:$0xf] }
  0xf8   : > { %v1071_v8 = vadd.f32 %v1070_v54, %v3616_v13  ;;  %v1119_v10 = vpop.f32.mrf.mxu3  ;;  %v384_v54 = vld [vmem:[%s3431_s10 + $0x250] sm:$0xff]  ;;  %v2713_v5 = vld [vmem:[#allocation5 + $0x2f8] sm:$0xf0] }
  0xf9   : > { %v1052_v31 = vpop.f32.mrf.mxu0  ;;  %v3680_v41 = vpack.c.bf16 %v390_v57, %v384_v54  ;;  %1480 = vmatpush.bf16.msra.mxu1 %v2564_v3  ;;  %v2545_v54 = vld [vmem:[#allocation5 + $0x1a8] sm:$0xf0]  ;;  %v2880_v3 = vld [vmem:[#allocation5 + $0x2f4] sm:$0xf] }
  0xfa   : > { %v3666_v36 = vadd.f32 %v1119_v10, %v1071_v8  ;;  %v1053_v37 = vadd.f32 %v1052_v31, %v3616_v13  ;;  %v386_v8 = vld [vmem:[%s3431_s10 + $0x260] sm:$0xff]  ;;  %v392_v10 = vld [vmem:[%s3431_s10 + $0x290] sm:$0xff]  ;;  %v387_v31 = vld [vmem:[%s3431_s10 + $0x268] sm:$0xff] }
  0xfb   : > { %v1101_v39 = vpop.f32.mrf.mxu1  ;;  %1434 = vmatpush.bf16.msra.mxu0 %v2476_v50  ;;  %v3689_v59 = vpack.c.bf16 %v393_v27, %v387_v31  ;;  %v2652_v27 = vor.u32 %v2864_v23, %v2649_v49  ;;  %v2537_v31 = vld [vmem:[#allocation5 + $0x198] sm:$0xf0]  ;;  %v402_v49 = vld [vmem:[%s3431_s10 + $0x2e0] sm:$0xff] }
  0xfc   : > { %v3671_v19 = vadd.f32 %v1101_v39, %v1053_v37  ;;  %v3682_v37 = vpack.c.bf16 %v392_v10, %v386_v8  ;;  %v2716_v10 = vor.u32 %v2880_v3, %v2713_v5  ;;  %v398_v3 = vld [vmem:[%s3431_s10 + $0x2c0] sm:$0xff]  ;;  %v397_v5 = vld [vmem:[%s3431_s10 + $0x2b8] sm:$0xff] }
  0xfd   : > { %4088 = vst [vmem:[#allocation30_spill] sm:$0xff] %v3689_v59  ;;  %1481 = vmatpush.bf16.msra.mxu1 %v2556_v21  ;;  %1526 = vmatpush.bf16.msrb.mxu2 %v2652_v27  ;;  %v404_v27 = vld [vmem:[%s3431_s10 + $0x2f0] sm:$0xff] }
  0xfe   : > { %4087 = vst [vmem:[#allocation29_spill] sm:$0xff] %v3682_v37  ;;  %1575 = vmatpush.bf16.msrb.mxu3 %v2716_v10 }
  0xff   : > { %v1072_v63 = vpop.f32.mrf.mxu2  ;;  %1435 = vmatpush.bf16.msra.mxu0 %v2468_v30 }
 0x100   : > { %v1073_v12 = vadd.f32 %v1072_v63, %v3616_v13  ;;  %v1121_v40 = vpop.f32.mrf.mxu3  ;;  %v2838_v63 = vld [vmem:[#allocation5 + $0x1a4] sm:$0xf] }
 0x101   : > { %v1055_v39 = vpop.f32.mrf.mxu0  ;;  %v2548_v57 = vor.u32 %v2838_v63, %v2545_v54  ;;  %v2529_v63 = vld [vmem:[#allocation5 + $0x188] sm:$0xf0]  ;;  %v396_v54 = vld [vmem:[%s3431_s10 + $0x2b0] sm:$0xff] }
 0x102   : > { %v3686_v61 = vadd.f32 %v1121_v40, %v1073_v12  ;;  %v1056_v50 = vadd.f32 %v1055_v39, %v3616_v13  ;;  %v2540_v40 = vor.u32 %v2836_v26, %v2537_v31  ;;  %v399_v26 = vld [vmem:[%s3431_s10 + $0x2c8] sm:$0xff]  ;;  %v405_v31 = vld [vmem:[%s3431_s10 + $0x2f8] sm:$0xff] }
 0x103   : > { %v1104_v35 = vpop.f32.mrf.mxu1  ;;  %1482 = vmatpush.bf16.msra.mxu1 %v2548_v57 }
 0x104   : > { %1172 = vmatmul.bf16.gmra.mxu2 %v3680_v41  ;;  %1270 = vmatmul.bf16.gmra.mxu0 %v3682_v37  ;;  %v3693_v47 = vadd.f32 %v1104_v35, %v1056_v50  ;;  %v2834_v50 = vld [vmem:[#allocation5 + $0x184] sm:$0xf] }
 0x105   : > { %1221 = vmatmul.bf16.gmra.mxu3 %v3684_v53  ;;  %v2532_v57 = vor.u32 %v2834_v50, %v2529_v63  ;;  %v3721_v50 = vpack.c.bf16 %v405_v31, %v399_v26  ;;  %v2878_v31 = vld [vmem:[#allocation5 + $0x2e4] sm:$0xf] }
 0x106   : > { %1319 = vmatmul.bf16.gmra.mxu1 %v3689_v59  ;;  %v3714_v59 = vpack.c.bf16 %v404_v27, %v398_v3 }
 0x107   : > { %v1075_v8 = vpop.f32.mrf.mxu2  ;;  %1483 = vmatpush.bf16.msra.mxu1 %v2540_v40  ;;  %4090 = vst [vmem:[#allocation32_spill] sm:$0xff] %v3721_v50 }
 0x108   : > { %v1076_v35 = vadd.f32 %v1075_v8, %v3616_v13  ;;  %v1124_v12 = vpop.f32.mrf.mxu3  ;;  %v403_v8 = vld [vmem:[%s3431_s10 + $0x2e8] sm:$0xff]  ;;  %4089 = vst [vmem:[#allocation31_spill] sm:$0xff] %v3714_v59 }
 0x109   : > { %v1057_v21 = vpop.f32.mrf.mxu0 }
 0x10a   : > { %v3698_v30 = vadd.f32 %v1124_v12, %v1076_v35  ;;  %v1058_v38 = vadd.f32 %v1057_v21, %v3616_v13  ;;  %v3712_v21 = vpack.c.bf16 %v402_v49, %v396_v54  ;;  %v2862_v54 = vld [vmem:[#allocation5 + $0x264] sm:$0xf]  ;;  %v2641_v49 = vld [vmem:[#allocation5 + $0x268] sm:$0xf0] }
 0x10b   : > { %v1106_v39 = vpop.f32.mrf.mxu1  ;;  %1484 = vmatpush.bf16.msra.mxu1 %v2532_v57  ;;  %v2644_v3 = vor.u32 %v2862_v54, %v2641_v49 }
 0x10c   : > { %v3702_v23 = vadd.f32 %v1106_v39, %v1058_v38  ;;  %v3716_v38 = vpack.c.bf16 %v403_v8, %v397_v5 }
 0x10d   : > { %1527 = vmatpush.bf16.msrb.mxu2 %v2644_v3 }
 0x10f   : > { %v1077_v10 = vpop.f32.mrf.mxu2 }
 0x110   : > { %v1078_v35 = vadd.f32 %v1077_v10, %v3616_v13  ;;  %v1126_v12 = vpop.f32.mrf.mxu3 }
 0x111   : > { %v1060_v37 = vpop.f32.mrf.mxu0 }
 0x112   : > { %v3718_v39 = vadd.f32 %v1126_v12, %v1078_v35  ;;  %v1061_v40 = vadd.f32 %v1060_v37, %v3616_v13  ;;  %v2705_v35 = vld [vmem:[#allocation5 + $0x2e8] sm:$0xf0] }
 0x113   : > { %v1109_v63 = vpop.f32.mrf.mxu1 }
 0x114   : > { %1177 = vmatmul.bf16.gmra.mxu2 %v3712_v21  ;;  %1275 = vmatmul.bf16.gmra.mxu0 %v3714_v59  ;;  %v3725_v10 = vadd.f32 %v1109_v63, %v1061_v40  ;;  %v2708_v40 = vor.u32 %v2878_v31, %v2705_v35  ;;  %v2697_v35 = vld [vmem:[#allocation5 + $0x2d8] sm:$0xf0] }
 0x115   : > { %1226 = vmatmul.bf16.gmra.mxu3 %v3716_v38 }
 0x116   : > { %1324 = vmatmul.bf16.gmra.mxu1 %v3721_v50  ;;  %1576 = vmatpush.bf16.msrb.mxu3 %v2708_v40 }
 0x117   : > { %v1080_v27 = vpop.f32.mrf.mxu2 }
 0x118   : > { %v1081_v57 = vadd.f32 %v1080_v27, %v3616_v13  ;;  %v1129_v37 = vpop.f32.mrf.mxu3 }
 0x119   : > { %v1062_v5 = vpop.f32.mrf.mxu0 }
 0x11a   : > { %v3730_v8 = vadd.f32 %v1129_v37, %v1081_v57  ;;  %v1063_v26 = vadd.f32 %v1062_v5, %v3616_v13  ;;  %v2860_v57 = vld [vmem:[#allocation5 + $0x254] sm:$0xf]  ;;  %v2633_v37 = vld [vmem:[#allocation5 + $0x258] sm:$0xf0] }
 0x11b   : > { %v1111_v12 = vpop.f32.mrf.mxu1  ;;  %v2636_v5 = vor.u32 %v2860_v57, %v2633_v37 }
 0x11c   : > { %v3733_v63 = vadd.f32 %v1111_v12, %v1063_v26 }
 0x11d   : > { %1528 = vmatpush.bf16.msrb.mxu2 %v2636_v5  ;;  %v2858_v5 = vld [vmem:[#allocation5 + $0x244] sm:$0xf] }
 0x11f   : > { %v1082_v59 = vpop.f32.mrf.mxu2 }
 0x120   : > { %v1083_v54 = vadd.f32 %v1082_v59, %v3616_v13  ;;  %v1131_v49 = vpop.f32.mrf.mxu3  ;;  %v2876_v13 = vld [vmem:[#allocation5 + $0x2d4] sm:$0xf] }
 0x121   : > { %v1241_v50 = vpop.f32.mrf.mxu0  ;;  %v2700_v40 = vor.u32 %v2876_v13, %v2697_v35 }
 0x122   : > { %v3736_v27 = vadd.f32 %v1131_v49, %v1083_v54 }
 0x123   : > { %v1290_v3 = vpop.f32.mrf.mxu1  ;;  %1577 = vmatpush.bf16.msrb.mxu3 %v2700_v40 }
 0x124   : > { %1338 = vmatmul.bf16.vlgmr.msra.gmra.mxu2 %v3453_v0  ;;  %1436 = vmatmul.bf16.vlgmr.msra.gmra.mxu0 %v3533_v32 }
 0x125   : > { %1387 = vmatmul.bf16.vlgmr.msra.gmra.mxu3 %v3459_v6 }
 0x126   : > { %1485 = vmatmul.bf16.vlgmr.msra.gmra.mxu1 %v3537_v34 }
 0x127   : > { %v1143_v26 = vpop.f32.mrf.mxu2 }
 0x128   : > { %v1144_v31 = vadd.f32 %v1143_v26, %v3629_v29  ;;  %v1192_v59 = vpop.f32.mrf.mxu3  ;;  %v2625_v26 = vld [vmem:[#allocation5 + $0x248] sm:$0xf0] }
 0x129   : > { %v1243_v12 = vpop.f32.mrf.mxu0 }
 0x12a   : > { %v1193_v54 = vadd.f32 %v1192_v59, %v1144_v31 }
 0x12b   : > { %v1292_v0 = vpop.f32.mrf.mxu1 }
 0x12c   : > { %v1242_v49 = vadd.f32 %v1241_v50, %v1193_v54  ;;  %v2628_v50 = vor.u32 %v2858_v5, %v2625_v26  ;;  %v2856_v5 = vld [vmem:[#allocation5 + $0x234] sm:$0xf]  ;;  %v2617_v26 = vld [vmem:[#allocation5 + $0x238] sm:$0xf0] }
 0x12e   : > { %v1291_v37 = vadd.f32 %v1290_v3, %v1242_v49  ;;  %1529 = vmatpush.bf16.msrb.mxu2 %v2628_v50  ;;  %v2874_v3 = vld [vmem:[#allocation5 + $0x2c4] sm:$0xf] }
 0x12f   : > { %v1145_v32 = vpop.f32.mrf.mxu2 }
 0x130   : > { %v1146_v6 = vadd.f32 %v1145_v32, %v3639_v28  ;;  %v1194_v2 = vpop.f32.mrf.mxu3  ;;  %v1624_v28 = vmax.f32 %v1291_v37, 0.0 }
 0x131   : > { %v1246_v33 = vpop.f32.mrf.mxu0 }
 0x132   : > { %v1195_v34 = vadd.f32 %v1194_v2, %v1146_v6 }
 0x133   : > { %v1295_v57 = vpop.f32.mrf.mxu1 }
 0x134   : > { %1343 = vmatmul.bf16.gmra.mxu2 %v3473_v51  ;;  %1441 = vmatmul.bf16.gmra.mxu0 %v3553_v58  ;;  %v1244_v29 = vadd.f32 %v1243_v12, %v1195_v34  ;;  %v2689_v51 = vld [vmem:[#allocation5 + $0x2c8] sm:$0xf0] }
 0x135   : > { %1392 = vmatmul.bf16.gmra.mxu3 %v3479_v56  ;;  %v2692_v58 = vor.u32 %v2874_v3, %v2689_v51 }
 0x136   : > { %v1293_v31 = vadd.f32 %v1292_v0, %v1244_v29  ;;  %1490 = vmatmul.bf16.gmra.mxu1 %v3557_v60 }
 0x137   : > { %v1148_v59 = vpop.f32.mrf.mxu2  ;;  %1578 = vmatpush.bf16.msrb.mxu3 %v2692_v58 }
 0x138   : > { %v1626_v13 = vmax.f32 %v1293_v31, 0.0  ;;  %v1149_v2 = vadd.f32 %v1148_v59, %v3661_v24  ;;  %v1197_v35 = vpop.f32.mrf.mxu3 }
 0x139   : > { %v1248_v40 = vpop.f32.mrf.mxu0 }
 0x13a   : > { %v3749_v12 = vpack.c.bf16 %v1626_v13, %v1624_v28  ;;  %v1198_v56 = vadd.f32 %v1197_v35, %v1149_v2 }
 0x13b   : > { %v1297_v54 = vpop.f32.mrf.mxu1 }
 0x13c   : > { %v1247_v32 = vadd.f32 %v1246_v33, %v1198_v56  ;;  %v2620_v33 = vor.u32 %v2856_v5, %v2617_v26 }
 0x13e   : > { %v1296_v24 = vadd.f32 %v1295_v57, %v1247_v32  ;;  %1530 = vmatpush.bf16.msrb.mxu2 %v2620_v33  ;;  %v2872_v57 = vld [vmem:[#allocation5 + $0x2b4] sm:$0xf] }
 0x13f   : > { %v1150_v0 = vpop.f32.mrf.mxu2 }
 0x140   : > { %v1151_v60 = vadd.f32 %v1150_v0, %v3671_v19  ;;  %v1199_v49 = vpop.f32.mrf.mxu3  ;;  %v1628_v19 = vmax.f32 %v1296_v24, 0.0 }
 0x141   : > { %v1251_v6 = vpop.f32.mrf.mxu0 }
 0x142   : > { %v1200_v34 = vadd.f32 %v1199_v49, %v1151_v60  ;;  %v2854_v60 = vld [vmem:[#allocation5 + $0x224] sm:$0xf]  ;;  %v2609_v49 = vld [vmem:[#allocation5 + $0x228] sm:$0xf0] }
 0x143   : > { %v1300_v37 = vpop.f32.mrf.mxu1 }
 0x144   : > { %1348 = vmatmul.bf16.gmra.mxu2 %v3493_v42  ;;  %1446 = vmatmul.bf16.gmra.mxu0 %v3573_v20  ;;  %v1249_v29 = vadd.f32 %v1248_v40, %v1200_v34  ;;  %v2681_v42 = vld [vmem:[#allocation5 + $0x2b8] sm:$0xf0] }
 0x145   : > { %1397 = vmatmul.bf16.gmra.mxu3 %v3499_v46  ;;  %v2684_v20 = vor.u32 %v2872_v57, %v2681_v42 }
 0x146   : > { %v1298_v31 = vadd.f32 %v1297_v54, %v1249_v29  ;;  %1495 = vmatmul.bf16.gmra.mxu1 %v3577_v22 }
 0x147   : > { %v1153_v50 = vpop.f32.mrf.mxu2  ;;  %1579 = vmatpush.bf16.msrb.mxu3 %v2684_v20  ;;  %v2889_v20 = vld [vmem:[#allocation8 + $0x38] sm:$0xff] }
 0x148   : > { %v1630_v59 = vmax.f32 %v1298_v31, 0.0  ;;  %v1154_v28 = vadd.f32 %v1153_v50, %v3693_v47  ;;  %v1202_v13 = vpop.f32.mrf.mxu3  ;;  %1804 = vmatpush.bf16.msrb.mxu0 %v2889_v20 }
 0x149   : > { %v1253_v2 = vpop.f32.mrf.mxu0 }
 0x14a   : > { %v1203_v35 = vadd.f32 %v1202_v13, %v1154_v28  ;;  %v3757_v3 = vpack.c.bf16 %v1630_v59, %v1628_v19 }
 0x14b   : > { %v1302_v46 = vpop.f32.mrf.mxu1 }
 0x14c   : > { %v1252_v40 = vadd.f32 %v1251_v6, %v1203_v35  ;;  %v2612_v6 = vor.u32 %v2854_v60, %v2609_v49  ;;  %v2852_v35 = vld [vmem:[#allocation5 + $0x214] sm:$0xf] }
 0x14e   : > { %v1301_v47 = vadd.f32 %v1300_v37, %v1252_v40  ;;  %1531 = vmatpush.bf16.msrb.mxu2 %v2612_v6  ;;  %v2870_v37 = vld [vmem:[#allocation5 + $0x2a4] sm:$0xf] }
 0x14f   : > { %v1155_v51 = vpop.f32.mrf.mxu2 }
 0x150   : > { %v1156_v22 = vadd.f32 %v1155_v51, %v3702_v23  ;;  %v1204_v58 = vpop.f32.mrf.mxu3  ;;  %v1632_v23 = vmax.f32 %v1301_v47, 0.0 }
 0x151   : > { %v1256_v56 = vpop.f32.mrf.mxu0 }
 0x152   : > { %v1205_v54 = vadd.f32 %v1204_v58, %v1156_v22 }
 0x153   : > { %v1305_v0 = vpop.f32.mrf.mxu1 }
 0x154   : > { %1353 = vmatmul.bf16.gmra.mxu2 %v3513_v14  ;;  %1451 = vmatmul.bf16.gmra.mxu0 %v3593_v45  ;;  %v1254_v32 = vadd.f32 %v1253_v2, %v1205_v54  ;;  %v2673_v14 = vld [vmem:[#allocation5 + $0x2a8] sm:$0xf0] }
 0x155   : > { %1402 = vmatmul.bf16.gmra.mxu3 %v3519_v17  ;;  %v2676_v45 = vor.u32 %v2870_v37, %v2673_v14 }
 0x156   : > { %v1303_v34 = vadd.f32 %v1302_v46, %v1254_v32  ;;  %1500 = vmatmul.bf16.gmra.mxu1 %v3597_v48  ;;  %v2601_v46 = vld [vmem:[#allocation5 + $0x218] sm:$0xf0] }
 0x157   : > { %v1158_v24 = vpop.f32.mrf.mxu2  ;;  %1580 = vmatpush.bf16.msrb.mxu3 %v2676_v45  ;;  %v2604_v40 = vor.u32 %v2852_v35, %v2601_v46  ;;  %v2850_v45 = vld [vmem:[#allocation5 + $0x204] sm:$0xf] }
 0x158   : > { %v1634_v29 = vmax.f32 %v1303_v34, 0.0  ;;  %v1159_v5 = vadd.f32 %v1158_v24, %v3725_v10  ;;  %v1207_v26 = vpop.f32.mrf.mxu3 }
 0x159   : > { %v1258_v31 = vpop.f32.mrf.mxu0  ;;  %1532 = vmatpush.bf16.msrb.mxu2 %v2604_v40  ;;  %v2882_v40 = vld [vmem:[#allocation8] sm:$0xff] }
 0x15a   : > { %v1208_v33 = vadd.f32 %v1207_v26, %v1159_v5  ;;  %v3765_v50 = vpack.c.bf16 %v1634_v29, %v1632_v23  ;;  %v2886_v23 = vld [vmem:[#allocation8 + $0x20] sm:$0xff] }
 0x15b   : > { %v1307_v17 = vpop.f32.mrf.mxu1 }
 0x15c   : > { %v1257_v19 = vadd.f32 %v1256_v56, %v1208_v33  ;;  %v2593_v33 = vld [vmem:[#allocation5 + $0x208] sm:$0xf0] }
 0x15e   : > { %v1306_v42 = vadd.f32 %v1305_v0, %v1257_v19  ;;  %v2888_v0 = vld [vmem:[#allocation8 + $0x30] sm:$0xff] }
 0x15f   : > { %v1160_v59 = vpop.f32.mrf.mxu2  ;;  %1805 = vmatpush.bf16.msrb.mxu0 %v2888_v0 }
 0x160   : > { %v1161_v48 = vadd.f32 %v1160_v59, %v3733_v63  ;;  %v1209_v28 = vpop.f32.mrf.mxu3  ;;  %v1636_v63 = vmax.f32 %v1306_v42, 0.0 }
 0x161   : > { %v1261_v13 = vpop.f32.mrf.mxu0 }
 0x162   : > { %v1210_v57 = vadd.f32 %v1209_v28, %v1161_v48 }
 0x163   : > { %v1310_v10 = vpop.f32.mrf.mxu1 }
 0x164   : > { %1358 = vmatmul.bf16.gmra.mxu2 %v3455_v1  ;;  %1456 = vmatmul.bf16.gmra.mxu0 %v3618_v18  ;;  %v1259_v2 = vadd.f32 %v1258_v31, %v1210_v57  ;;  %v2868_v1 = vld [vmem:[#allocation5 + $0x294] sm:$0xf]  ;;  %v2665_v18 = vld [vmem:[#allocation5 + $0x298] sm:$0xf0] }
 0x165   : > { %1407 = vmatmul.bf16.gmra.mxu3 %v3457_v4  ;;  %v2668_v32 = vor.u32 %v2868_v1, %v2665_v18  ;;  %v2885_v31 = vld [vmem:[#allocation8 + $0x18] sm:$0xff]  ;;  %v2884_v57 = vld [vmem:[#allocation8 + $0x10] sm:$0xff] }
 0x166   : > { %v1308_v51 = vadd.f32 %v1307_v17, %v1259_v2  ;;  %1505 = vmatmul.bf16.gmra.mxu1 %v3622_v25  ;;  %v2887_v25 = vld [vmem:[#allocation8 + $0x28] sm:$0xff] }
 0x167   : > { %v1163_v22 = vpop.f32.mrf.mxu2  ;;  %1581 = vmatpush.bf16.msrb.mxu3 %v2668_v32  ;;  %1806 = vmatpush.bf16.msrb.mxu0 %v2887_v25 }
 0x168   : > { %v1638_v58 = vmax.f32 %v1308_v51, 0.0  ;;  %v1164_v56 = vadd.f32 %v1163_v22, %v3634_v7  ;;  %v1212_v54 = vpop.f32.mrf.mxu3 }
 0x169   : > { %v1263_v47 = vpop.f32.mrf.mxu0 }
 0x16a   : > { %v1213_v4 = vadd.f32 %v1212_v54, %v1164_v56  ;;  %v3773_v60 = vpack.c.bf16 %v1638_v58, %v1636_v63 }
 0x16b   : > { %v1312_v49 = vpop.f32.mrf.mxu1  ;;  %1807 = vmatpush.bf16.msrb.mxu0 %v2886_v23 }
 0x16c   : > { %v1262_v34 = vadd.f32 %v1261_v13, %v1213_v4 }
 0x16e   : > { %v1311_v26 = vadd.f32 %v1310_v10, %v1262_v34 }
 0x16f   : > { %v1165_v6 = vpop.f32.mrf.mxu2  ;;  %1808 = vmatpush.bf16.msrb.mxu0 %v2885_v31 }
 0x170   : > { %v1166_v24 = vadd.f32 %v1165_v6, %v3654_v11  ;;  %v1214_v7 = vpop.f32.mrf.mxu3  ;;  %v2596_v11 = vor.u32 %v2850_v45, %v2593_v33  ;;  %v1640_v19 = vmax.f32 %v1311_v26, 0.0  ;;  %v2897_v33 = vld [vmem:[#allocation8 + $0x78] sm:$0xff] }
 0x171   : > { %v1266_v29 = vpop.f32.mrf.mxu0  ;;  %1853 = vmatpush.bf16.msrb.mxu1 %v2897_v33 }
 0x172   : > { %v1215_v5 = vadd.f32 %v1214_v7, %v1166_v24  ;;  %1533 = vmatpush.bf16.msrb.mxu2 %v2596_v11 }
 0x173   : > { %v1315_v37 = vpop.f32.mrf.mxu1  ;;  %1809 = vmatpush.bf16.msrb.mxu0 %v2884_v57 }
 0x174   : > { %1363 = vmatmul.bf16.gmra.mxu2 %v3475_v52  ;;  %1461 = vmatmul.bf16.gmra.mxu0 %v3648_v62  ;;  %v1264_v14 = vadd.f32 %v1263_v47, %v1215_v5  ;;  %v2866_v52 = vld [vmem:[#allocation5 + $0x284] sm:$0xf]  ;;  %v2657_v62 = vld [vmem:[#allocation5 + $0x288] sm:$0xf0] }
 0x175   : > { %1412 = vmatmul.bf16.gmra.mxu3 %v3477_v55  ;;  %v2660_v10 = vor.u32 %v2866_v52, %v2657_v62  ;;  %v4093_v62 = vld [vmem:[#allocation17_spill] sm:$0xff] }
 0x176   : > { %v1313_v17 = vadd.f32 %v1312_v49, %v1264_v14  ;;  %1510 = vmatmul.bf16.gmra.mxu1 %v3652_v9  ;;  %v2883_v9 = vld [vmem:[#allocation8 + $0x8] sm:$0xff] }
 0x177   : > { %v1168_v59 = vpop.f32.mrf.mxu2  ;;  %1582 = vmatpush.bf16.msrb.mxu3 %v2660_v10  ;;  %1810 = vmatpush.bf16.msrb.mxu0 %v2883_v9 }
 0x178   : > { %v1642_v48 = vmax.f32 %v1313_v17, 0.0  ;;  %v1169_v28 = vadd.f32 %v1168_v59, %v3666_v36  ;;  %v1217_v13 = vpop.f32.mrf.mxu3 }
 0x179   : > { %v1268_v42 = vpop.f32.mrf.mxu0 }
 0x17a   : > { %v1218_v55 = vadd.f32 %v1217_v13, %v1169_v28  ;;  %v3781_v2 = vpack.c.bf16 %v1642_v48, %v1640_v19  ;;  %v4091_v28 = vld [vmem:[#allocation16_spill] sm:$0xff] }
 0x17b   : > { %v1317_v20 = vpop.f32.mrf.mxu1  ;;  %1811 = vmatpush.bf16.msrb.mxu0 %v2882_v40  ;;  %v4092_v13 = vld [vmem:[#allocation24_spill] sm:$0xff] }
 0x17c   : > { %v1267_v46 = vadd.f32 %v1266_v29, %v1218_v55  ;;  %v3803_v52 = vperm.slane %v4092_v13, 1 }
 0x17e   : > { %v1316_v58 = vadd.f32 %v1315_v37, %v1267_v46  ;;  %v2896_v46 = vld [vmem:[#allocation8 + $0x70] sm:$0xff] }
 0x17f   : > { %v1170_v35 = vpop.f32.mrf.mxu2  ;;  %1854 = vmatpush.bf16.msrb.mxu1 %v2896_v46 }
 0x180   : > { %v1171_v51 = vadd.f32 %v1170_v35, %v3686_v61  ;;  %v1219_v36 = vpop.f32.mrf.mxu3  ;;  %v1644_v0 = vmax.f32 %v1316_v58, 0.0 }
 0x181   : > { %v1271_v63 = vpop.f32.mrf.mxu0 }
 0x182   : > { %v1220_v22 = vadd.f32 %v1219_v36, %v1171_v51 }
 0x183   : > { %v1320_v54 = vpop.f32.mrf.mxu1 }
 0x184   : > { %1368 = vmatmul.bf16.gmra.mxu2 %v3495_v43  ;;  %1466 = vmatmul.bf16.gmra.mxu0 %v3680_v41  ;;  %v1269_v56 = vadd.f32 %v1268_v42, %v1220_v22 }
 0x185   : > { %1417 = vmatmul.bf16.gmra.mxu3 %v3497_v44 }
 0x186   : > { %v1318_v1 = vadd.f32 %v1317_v20, %v1269_v56  ;;  %1515 = vmatmul.bf16.gmra.mxu1 %v3684_v53  ;;  %v4094_v56 = vld [vmem:[#allocation18_spill] sm:$0xff] }
 0x187   : > { %v1173_v18 = vpop.f32.mrf.mxu2 }
 0x188   : > { %v1646_v61 = vmax.f32 %v1318_v1, 0.0  ;;  %v1174_v47 = vadd.f32 %v1173_v18, %v3698_v30  ;;  %v1222_v32 = vpop.f32.mrf.mxu3  ;;  %v4095_v1 = vld [vmem:[#allocation19_spill] sm:$0xff] }
 0x189   : > { %v1273_v4 = vpop.f32.mrf.mxu0 }
 0x18a   : > { %v1223_v49 = vadd.f32 %v1222_v32, %v1174_v47  ;;  %v3789_v25 = vpack.c.bf16 %v1646_v61, %v1644_v0  ;;  %v2895_v32 = vld [vmem:[#allocation8 + $0x68] sm:$0xff] }
 0x18b   : > { %v1322_v34 = vpop.f32.mrf.mxu1  ;;  %1855 = vmatpush.bf16.msrb.mxu1 %v2895_v32 }
 0x18c   : > { %v1272_v41 = vadd.f32 %v1271_v63, %v1223_v49 }
 0x18e   : > { %v1321_v23 = vadd.f32 %v1320_v54, %v1272_v41 }
 0x18f   : > { %v1175_v43 = vpop.f32.mrf.mxu2 }
 0x190   : > { %v1176_v6 = vadd.f32 %v1175_v43, %v3718_v39  ;;  %v1224_v44 = vpop.f32.mrf.mxu3  ;;  %v1648_v5 = vmax.f32 %v1321_v23, 0.0 }
 0x191   : > { %v1276_v24 = vpop.f32.mrf.mxu0 }
 0x192   : > { %v1225_v7 = vadd.f32 %v1224_v44, %v1176_v6 }
 0x193   : > { %v1325_v31 = vpop.f32.mrf.mxu1 }
 0x194   : > { %1373 = vmatmul.bf16.gmra.mxu2 %v3515_v15  ;;  %1471 = vmatmul.bf16.gmra.mxu0 %v3712_v21  ;;  %v1274_v53 = vadd.f32 %v1273_v4, %v1225_v7  ;;  %v4097_v7 = vld [vmem:[#allocation21_spill] sm:$0xff] }
 0x195   : > { %1422 = vmatmul.bf16.gmra.mxu3 %v3517_v16 }
 0x196   : > { %v1323_v30 = vadd.f32 %v1322_v34, %v1274_v53  ;;  %1520 = vmatmul.bf16.gmra.mxu1 %v3716_v38 }
 0x197   : > { %v1178_v29 = vpop.f32.mrf.mxu2 }
 0x198   : > { %v1650_v26 = vmax.f32 %v1323_v30, 0.0  ;;  %v1179_v37 = vadd.f32 %v1178_v29, %v3730_v8  ;;  %v1227_v39 = vpop.f32.mrf.mxu3 }
 0x199   : > { %v1278_v14 = vpop.f32.mrf.mxu0 }
 0x19a   : > { %v1228_v45 = vadd.f32 %v1227_v39, %v1179_v37  ;;  %v3797_v17 = vpack.c.bf16 %v1650_v26, %v1648_v5  ;;  %v2894_v5 = vld [vmem:[#allocation8 + $0x60] sm:$0xff] }
 0x19b   : > { %v1327_v59 = vpop.f32.mrf.mxu1  ;;  %1856 = vmatpush.bf16.msrb.mxu1 %v2894_v5 }
 0x19c   : > { %v1277_v21 = vadd.f32 %v1276_v24, %v1228_v45  ;;  %v4098_v45 = vld [vmem:[#allocation22_spill] sm:$0xff] }
 0x19e   : > { %v1326_v48 = vadd.f32 %v1325_v31, %v1277_v21 }
 0x19f   : > { %v1180_v15 = vpop.f32.mrf.mxu2 }
 0x1a0   : > { %v1181_v16 = vadd.f32 %v1180_v15, %v3736_v27  ;;  %v1229_v11 = vpop.f32.mrf.mxu3  ;;  %v1652_v10 = vmax.f32 %v1326_v48, 0.0  ;;  %v4099_v15 = vld [vmem:[#allocation23_spill] sm:$0xff] }
 0x1a1   : > { %v1437_v19 = vpop.f32.mrf.mxu0 }
 0x1a2   : > { %v1230_v38 = vadd.f32 %v1229_v11, %v1181_v16 }
 0x1a4   : > { %1534 = vmatmul.bf16.vlgmr.msrb.gmra.mxu2 %v4091_v28  ;;  %1812 = vmatmul.bf16.vlgmr.msrb.gmra.mxu0 %v3749_v12  ;;  %v1279_v8 = vadd.f32 %v1278_v14, %v1230_v38 }
 0x1a5   : > { %1583 = vmatmul.bf16.vlgmr.msrb.gmra.mxu3 %v4093_v62 }
 0x1a6   : > { %v1328_v57 = vadd.f32 %v1327_v59, %v1279_v8  ;;  %v2893_v59 = vld [vmem:[#allocation8 + $0x58] sm:$0xff] }
 0x1a7   : > { %v1339_v42 = vpop.f32.mrf.mxu2  ;;  %1857 = vmatpush.bf16.msrb.mxu1 %v2893_v59 }
 0x1a8   : > { %v1654_v55 = vmax.f32 %v1328_v57, 0.0  ;;  %v1340_v27 = vadd.f32 %v1339_v42, %v3803_v52  ;;  %v1388_v20 = vpop.f32.mrf.mxu3  ;;  %v4100_v57 = vld [vmem:[#allocation25_spill] sm:$0xff] }
 0x1a9   : > { %v1439_v9 = vpop.f32.mrf.mxu0 }
 0x1aa   : > { %v1389_v35 = vadd.f32 %v1388_v20, %v1340_v27  ;;  %v3807_v51 = vpack.c.bf16 %v1654_v55, %v1652_v10  ;;  %v4101_v10 = vld [vmem:[#allocation26_spill] sm:$0xff] }
 0x1ac   : > { %v3809_v36 = vadd.f32 %v1437_v19, %v1389_v35  ;;  %v2892_v35 = vld [vmem:[#allocation8 + $0x50] sm:$0xff] }
 0x1ad   : > { %1858 = vmatpush.bf16.msrb.mxu1 %v2892_v35 }
 0x1af   : > { %v1341_v12 = vpop.f32.mrf.mxu2 }
 0x1b0   : > { %v1342_v40 = vadd.f32 %v1341_v12, %v3803_v52  ;;  %v1390_v63 = vpop.f32.mrf.mxu3 }
 0x1b1   : > { %v1442_v22 = vpop.f32.mrf.mxu0 }
 0x1b2   : > { %v1391_v58 = vadd.f32 %v1390_v63, %v1342_v40 }
 0x1b4   : > { %1539 = vmatmul.bf16.gmra.mxu2 %v4094_v56  ;;  %1817 = vmatmul.bf16.gmra.mxu0 %v3757_v3  ;;  %v3814_v54 = vadd.f32 %v1439_v9, %v1391_v58  ;;  %v4096_v3 = vld [vmem:[#allocation20_spill] sm:$0xff] }
 0x1b5   : > { %1588 = vmatmul.bf16.gmra.mxu3 %v4095_v1 }
 0x1b7   : > { %v1344_v18 = vpop.f32.mrf.mxu2 }
 0x1b8   : > { %v1345_v0 = vadd.f32 %v1344_v18, %v3803_v52  ;;  %v1393_v61 = vpop.f32.mrf.mxu3 }
 0x1b9   : > { %v1444_v4 = vpop.f32.mrf.mxu0 }
 0x1ba   : > { %v1394_v47 = vadd.f32 %v1393_v61, %v1345_v0  ;;  %v2891_v0 = vld [vmem:[#allocation8 + $0x48] sm:$0xff] }
 0x1bb   : > { %1859 = vmatpush.bf16.msrb.mxu1 %v2891_v0 }
 0x1bc   : > { %v3818_v49 = vadd.f32 %v1442_v22, %v1394_v47  ;;  %v4102_v22 = vld [vmem:[#allocation27_spill] sm:$0xff] }
 0x1bf   : > { %v1346_v43 = vpop.f32.mrf.mxu2 }
 0x1c0   : > { %v1347_v34 = vadd.f32 %v1346_v43, %v3803_v52  ;;  %v1395_v41 = vpop.f32.mrf.mxu3  ;;  %v4104_v43 = vld [vmem:[#allocation29_spill] sm:$0xff] }
 0x1c1   : > { %v1447_v24 = vpop.f32.mrf.mxu0 }
 0x1c2   : > { %v1396_v6 = vadd.f32 %v1395_v41, %v1347_v34  ;;  %v4105_v34 = vld [vmem:[#allocation30_spill] sm:$0xff] }
 0x1c4   : > { %1544 = vmatmul.bf16.gmra.mxu2 %v4096_v3  ;;  %1822 = vmatmul.bf16.gmra.mxu0 %v3765_v50  ;;  %v3823_v44 = vadd.f32 %v1444_v4, %v1396_v6 }
 0x1c5   : > { %1593 = vmatmul.bf16.gmra.mxu3 %v4097_v7  ;;  %v2890_v7 = vld [vmem:[#allocation8 + $0x40] sm:$0xff] }
 0x1c6   : > { %1860 = vmatpush.bf16.msrb.mxu1 %v2890_v7 }
 0x1c7   : > { %v1349_v23 = vpop.f32.mrf.mxu2 }
 0x1c8   : > { %v1350_v53 = vadd.f32 %v1349_v23, %v3803_v52  ;;  %v1398_v30 = vpop.f32.mrf.mxu3 }
 0x1c9   : > { %v1449_v37 = vpop.f32.mrf.mxu0 }
 0x1ca   : > { %v1399_v29 = vadd.f32 %v1398_v30, %v1350_v53 }
 0x1cc   : > { %v3827_v26 = vadd.f32 %v1447_v24, %v1399_v29 }
 0x1cf   : > { %v1351_v39 = vpop.f32.mrf.mxu2 }
 0x1d0   : > { %v1352_v14 = vadd.f32 %v1351_v39, %v3803_v52  ;;  %v1400_v31 = vpop.f32.mrf.mxu3 }
 0x1d1   : > { %v1452_v19 = vpop.f32.mrf.mxu0 }
 0x1d2   : > { %v1401_v50 = vadd.f32 %v1400_v31, %v1352_v14 }
 0x1d4   : > { %1549 = vmatmul.bf16.gmra.mxu2 %v4098_v45  ;;  %1827 = vmatmul.bf16.gmra.mxu0 %v3773_v60  ;;  %v3832_v33 = vadd.f32 %v1449_v37, %v1401_v50  ;;  %v4106_v37 = vld [vmem:[#allocation31_spill] sm:$0xff] }
 0x1d5   : > { %1598 = vmatmul.bf16.gmra.mxu3 %v4099_v15 }
 0x1d7   : > { %v1354_v21 = vpop.f32.mrf.mxu2 }
 0x1d8   : > { %v1355_v16 = vadd.f32 %v1354_v21, %v3803_v52  ;;  %v1403_v11 = vpop.f32.mrf.mxu3 }
 0x1d9   : > { %v1454_v60 = vpop.f32.mrf.mxu0 }
 0x1da   : > { %v1404_v38 = vadd.f32 %v1403_v11, %v1355_v16 }
 0x1dc   : > { %v3836_v48 = vadd.f32 %v1452_v19, %v1404_v38 }
 0x1df   : > { %v1356_v28 = vpop.f32.mrf.mxu2 }
 0x1e0   : > { %v1357_v8 = vadd.f32 %v1356_v28, %v3803_v52  ;;  %v1405_v13 = vpop.f32.mrf.mxu3 }
 0x1e2   : > { %v1406_v62 = vadd.f32 %v1405_v13, %v1357_v8 }
 0x1e4   : > { %1554 = vmatmul.bf16.gmra.mxu2 %v4100_v57  ;;  %1832 = vmatmul.bf16.gmra.mxu0 %v3781_v2  ;;  %v3841_v42 = vadd.f32 %v1454_v60, %v1406_v62  ;;  %v4103_v2 = vld [vmem:[#allocation28_spill] sm:$0xff] }
 0x1e5   : > { %1603 = vmatmul.bf16.gmra.mxu3 %v4101_v10 }
 0x1e7   : > { %v1359_v55 = vpop.f32.mrf.mxu2 }
 0x1e8   : > { %v1360_v27 = vadd.f32 %v1359_v55, %v3803_v52  ;;  %v1408_v20 = vpop.f32.mrf.mxu3 }
 0x1ea   : > { %v3845_v9 = vadd.f32 %v1408_v20, %v1360_v27 }
 0x1ef   : > { %v1361_v46 = vpop.f32.mrf.mxu2 }
 0x1f0   : > { %v1362_v12 = vadd.f32 %v1361_v46, %v3803_v52  ;;  %v1410_v40 = vpop.f32.mrf.mxu3 }
 0x1f2   : > { %v3848_v63 = vadd.f32 %v1410_v40, %v1362_v12 }
 0x1f4   : > { %1559 = vmatmul.bf16.gmra.mxu2 %v4102_v22  ;;  %1837 = vmatmul.bf16.gmra.mxu0 %v3789_v25  ;;  %v1486_v25 = vpop.f32.mrf.mxu1 }
 0x1f5   : > { %1608 = vmatmul.bf16.gmra.mxu3 %v4103_v2 }
 0x1f7   : > { %v1364_v58 = vpop.f32.mrf.mxu2 }
 0x1f8   : > { %v1365_v56 = vadd.f32 %v1364_v58, %v3803_v52  ;;  %v1413_v1 = vpop.f32.mrf.mxu3 }
 0x1fa   : > { %v3854_v18 = vadd.f32 %v1413_v1, %v1365_v56 }
 0x1fc   : > { %v1488_v23 = vpop.f32.mrf.mxu1 }
 0x1fd   : > { %v1489_v13 = vadd.f32 %v1488_v23, %v3814_v54 }
 0x1ff   : > { %v1366_v61 = vpop.f32.mrf.mxu2 }
 0x200   : > { %v1367_v47 = vadd.f32 %v1366_v61, %v3803_v52  ;;  %v1415_v32 = vpop.f32.mrf.mxu3  ;;  %v1457_v61 = vpop.f32.mrf.mxu0 }
 0x202   : > { %v3857_v4 = vadd.f32 %v1415_v32, %v1367_v47 }
 0x204   : > { %1564 = vmatmul.bf16.gmra.mxu2 %v4104_v43  ;;  %1842 = vmatmul.bf16.gmra.mxu0 %v3797_v17  ;;  %v4107_v17 = vld [vmem:[#allocation32_spill] sm:$0xff]  ;;  %v1491_v50 = vpop.f32.mrf.mxu1 }
 0x205   : > { %1613 = vmatmul.bf16.gmra.mxu3 %v4105_v34  ;;  %v1492_v40 = vadd.f32 %v1491_v50, %v3818_v49 }
 0x207   : > { %v1369_v41 = vpop.f32.mrf.mxu2 }
 0x208   : > { %v1370_v6 = vadd.f32 %v1369_v41, %v3803_v52  ;;  %v1418_v3 = vpop.f32.mrf.mxu3 }
 0x20a   : > { %v3863_v24 = vadd.f32 %v1418_v3, %v1370_v6  ;;  %v1459_v3 = vpop.f32.mrf.mxu0 }
 0x20c   : > { %v1493_v19 = vpop.f32.mrf.mxu1 }
 0x20f   : > { %v1371_v53 = vpop.f32.mrf.mxu2 }
 0x210   : > { %v1372_v30 = vadd.f32 %v1371_v53, %v3803_v52  ;;  %v1420_v29 = vpop.f32.mrf.mxu3 }
 0x212   : > { %v3866_v5 = vadd.f32 %v1420_v29, %v1372_v30 }
 0x214   : > { %1569 = vmatmul.bf16.gmra.mxu2 %v4106_v37  ;;  %1847 = vmatmul.bf16.gmra.mxu0 %v3807_v51  ;;  %v1487_v51 = vadd.f32 %v1486_v25, %v3809_v36  ;;  %v1496_v8 = vpop.f32.mrf.mxu1  ;;  %v1494_v36 = vadd.f32 %v1493_v19, %v3823_v44 }
 0x215   : > { %1618 = vmatmul.bf16.gmra.mxu3 %v4107_v17  ;;  %v1497_v41 = vadd.f32 %v1496_v8, %v3827_v26 }
 0x217   : > { %v1374_v39 = vpop.f32.mrf.mxu2 }
 0x218   : > { %v1375_v14 = vadd.f32 %v1374_v39, %v3803_v52  ;;  %v1423_v31 = vpop.f32.mrf.mxu3 }
 0x21a   : > { %v3872_v45 = vadd.f32 %v1423_v31, %v1375_v14  ;;  %v1462_v31 = vpop.f32.mrf.mxu0 }
 0x21c   : > { %v1498_v35 = vpop.f32.mrf.mxu1 }
 0x21d   : > { %v1499_v44 = vadd.f32 %v1498_v35, %v3832_v33 }
 0x21f   : > { %v1376_v15 = vpop.f32.mrf.mxu2 }
 0x220   : > { %v1377_v21 = vadd.f32 %v1376_v15, %v3803_v52  ;;  %v1425_v16 = vpop.f32.mrf.mxu3 }
 0x222   : > { %v3875_v11 = vadd.f32 %v1425_v16, %v1377_v21 }
 0x224   : > { %v1501_v1 = vpop.f32.mrf.mxu1 }
 0x225   : > { %v1502_v26 = vadd.f32 %v1501_v1, %v3836_v48 }
 0x227   : > { %v1535_v38 = vpop.f32.mrf.mxu2 }
 0x228   : > { %v1584_v59 = vpop.f32.mrf.mxu3  ;;  %v1536_v28 = vadd.f32 %v1535_v38, %v1487_v51 }
 0x22a   : > { %v1585_v60 = vadd.f32 %v1584_v59, %v1536_v28  ;;  %v1464_v28 = vpop.f32.mrf.mxu0 }
 0x22c   : > { %v1625_v27 = vmax.f32 %v1585_v60, 0.0  ;;  %v1503_v6 = vpop.f32.mrf.mxu1  ;;  %v1458_v60 = vadd.f32 %v1457_v61, %v3845_v9 }
 0x22d   : > { %v1504_v16 = vadd.f32 %v1503_v6, %v3841_v42 }
 0x22f   : > { %v1537_v62 = vpop.f32.mrf.mxu2 }
 0x230   : > { %v1538_v57 = vadd.f32 %v1537_v62, %v1489_v13  ;;  %v1586_v10 = vpop.f32.mrf.mxu3 }
 0x232   : > { %v1587_v55 = vadd.f32 %v1586_v10, %v1538_v57  ;;  %v1467_v42 = vpop.f32.mrf.mxu0 }
 0x234   : > { %v1627_v20 = vmax.f32 %v1587_v55, 0.0  ;;  %v1506_v39 = vpop.f32.mrf.mxu1 }
 0x235   : > { %v1507_v48 = vadd.f32 %v1506_v39, %v1458_v60 }
 0x236   : > { %v1657_v52 = vpack.c.bf16 %v1627_v20, %v1625_v27  ;;  %v1460_v20 = vadd.f32 %v1459_v3, %v3848_v63  ;;  %v1465_v63 = vadd.f32 %v1464_v28, %v3857_v4 }
 0x237   : > { %v1540_v46 = vpop.f32.mrf.mxu2 }
 0x238   : > { %v1589_v12 = vpop.f32.mrf.mxu3  ;;  %1861 = vmatmul.bf16.vlgmr.msrb.gmra.mxu1 %v1657_v52  ;;  %v1541_v22 = vadd.f32 %v1540_v46, %v1492_v40 }
 0x23a   : > { %v1590_v58 = vadd.f32 %v1589_v12, %v1541_v22  ;;  %v1469_v9 = vpop.f32.mrf.mxu0 }
 0x23b   : > { %v1470_v39 = vadd.f32 %v1469_v9, %v3866_v5 }
 0x23c   : > { %v1629_v47 = vmax.f32 %v1590_v58, 0.0  ;;  %v1508_v19 = vpop.f32.mrf.mxu1 }
 0x23d   : > { %v1509_v35 = vadd.f32 %v1508_v19, %v1460_v20 }
 0x23f   : > { %v1542_v2 = vpop.f32.mrf.mxu2 }
 0x240   : > { %v1543_v54 = vadd.f32 %v1542_v2, %v1494_v36  ;;  %v1591_v56 = vpop.f32.mrf.mxu3 }
 0x242   : > { %v1592_v0 = vadd.f32 %v1591_v56, %v1543_v54  ;;  %v1463_v56 = vadd.f32 %v1462_v31, %v3854_v18  ;;  %v1468_v18 = vadd.f32 %v1467_v42, %v3863_v24 }
 0x244   : > { %v1631_v32 = vmax.f32 %v1592_v0, 0.0  ;;  %v1511_v27 = vpop.f32.mrf.mxu1 }
 0x246   : > { %v1659_v43 = vpack.c.bf16 %v1631_v32, %v1629_v47  ;;  %v1512_v47 = vadd.f32 %v1511_v27, %v1463_v56 }
 0x247   : > { %v1545_v25 = vpop.f32.mrf.mxu2 }
 0x248   : > { %v1594_v34 = vpop.f32.mrf.mxu3  ;;  %1866 = vmatmul.bf16.gmra.mxu1 %v1659_v43  ;;  %v1546_v49 = vadd.f32 %v1545_v25, %v1497_v41 }
 0x24a   : > { %v1595_v23 = vadd.f32 %v1594_v34, %v1546_v49  ;;  %v1472_v34 = vpop.f32.mrf.mxu0 }
 0x24c   : > { %v1633_v37 = vmax.f32 %v1595_v23, 0.0  ;;  %v1513_v2 = vpop.f32.mrf.mxu1 }
 0x24d   : > { %v1514_v25 = vadd.f32 %v1513_v2, %v1465_v63 }
 0x24f   : > { %v1547_v7 = vpop.f32.mrf.mxu2 }
 0x250   : > { %v1548_v53 = vadd.f32 %v1547_v7, %v1499_v44  ;;  %v1596_v30 = vpop.f32.mrf.mxu3 }
 0x252   : > { %v1597_v29 = vadd.f32 %v1596_v30, %v1548_v53 }
 0x254   : > { %v1635_v17 = vmax.f32 %v1597_v29, 0.0  ;;  %v1516_v43 = vpop.f32.mrf.mxu1 }
 0x255   : > { %v1517_v4 = vadd.f32 %v1516_v43, %v1468_v18 }
 0x256   : > { %v1661_v14 = vpack.c.bf16 %v1635_v17, %v1633_v37  ;;  %v1474_v17 = vpop.f32.mrf.mxu0 }
 0x257   : > { %v1550_v50 = vpop.f32.mrf.mxu2  ;;  %v1475_v5 = vadd.f32 %v1474_v17, %v3875_v11 }
 0x258   : > { %v1599_v15 = vpop.f32.mrf.mxu3  ;;  %1871 = vmatmul.bf16.gmra.mxu1 %v1661_v14  ;;  %v1551_v21 = vadd.f32 %v1550_v50, %v1502_v26 }
 0x25a   : > { %v1600_v38 = vadd.f32 %v1599_v15, %v1551_v21 }
 0x25c   : > { %v1637_v13 = vmax.f32 %v1600_v38, 0.0  ;;  %v1518_v30 = vpop.f32.mrf.mxu1 }
 0x25d   : > { %v1519_v31 = vadd.f32 %v1518_v30, %v1470_v39 }
 0x25f   : > { %v1552_v33 = vpop.f32.mrf.mxu2 }
 0x260   : > { %v1553_v59 = vadd.f32 %v1552_v33, %v1504_v16  ;;  %v1601_v51 = vpop.f32.mrf.mxu3  ;;  %v1813_v33 = vpop.f32.mrf.mxu0 }
 0x262   : > { %v1602_v8 = vadd.f32 %v1601_v51, %v1553_v59  ;;  %v1473_v59 = vadd.f32 %v1472_v34, %v3872_v45 }
 0x264   : > { %v1639_v62 = vmax.f32 %v1602_v8, 0.0  ;;  %v1521_v16 = vpop.f32.mrf.mxu1 }
 0x266   : > { %v1663_v57 = vpack.c.bf16 %v1639_v62, %v1637_v13  ;;  %v1522_v13 = vadd.f32 %v1521_v16, %v1473_v59 }
 0x267   : > { %v1555_v10 = vpop.f32.mrf.mxu2 }
 0x268   : > { %v1604_v55 = vpop.f32.mrf.mxu3  ;;  %1876 = vmatmul.bf16.gmra.mxu1 %v1663_v57  ;;  %v1556_v52 = vadd.f32 %v1555_v10, %v1507_v48  ;;  %v1815_v57 = vpop.f32.mrf.mxu0 }
 0x26a   : > { %v1605_v12 = vadd.f32 %v1604_v55, %v1556_v52 }
 0x26c   : > { %v1641_v58 = vmax.f32 %v1605_v12, 0.0  ;;  %v1523_v62 = vpop.f32.mrf.mxu1  ;;  %v3893_v12 = vld [vmem:[#allocation10] ss:$0 sm:$0xff] }
 0x26d   : > { %v1524_v10 = vadd.f32 %v1523_v62, %v1475_v5 }
 0x26f   : > { %v1557_v46 = vpop.f32.mrf.mxu2 }
 0x270   : > { %v1558_v40 = vadd.f32 %v1557_v46, %v1509_v35  ;;  %v1606_v22 = vpop.f32.mrf.mxu3  ;;  %v1818_v45 = vpop.f32.mrf.mxu0 }
 0x272   : > { %v1607_v36 = vadd.f32 %v1606_v22, %v1558_v40  ;;  %v1814_v22 = vadd.f32 %v3893_v12, %v1813_v33 }
 0x274   : > { %v1643_v54 = vmax.f32 %v1607_v36, 0.0 }
 0x276   : > { %v1665_v1 = vpack.c.bf16 %v1643_v54, %v1641_v58  ;;  %v1816_v54 = vadd.f32 %v3893_v12, %v1815_v57 }
 0x277   : > { %v1560_v0 = vpop.f32.mrf.mxu2 }
 0x278   : > { %v1609_v61 = vpop.f32.mrf.mxu3  ;;  %1881 = vmatmul.bf16.gmra.mxu1 %v1665_v1  ;;  %v1561_v32 = vadd.f32 %v1560_v0, %v1512_v47  ;;  %v1820_v40 = vpop.f32.mrf.mxu0  ;;  %v1819_v0 = vadd.f32 %v3893_v12, %v1818_v45 }
 0x279   : > { %v1821_v43 = vadd.f32 %v3893_v12, %v1820_v40 }
 0x27a   : > { %v1610_v6 = vadd.f32 %v1609_v61, %v1561_v32 }
 0x27c   : > { %v1645_v7 = vmax.f32 %v1610_v6, 0.0 }
 0x27f   : > { %v1562_v41 = vpop.f32.mrf.mxu2 }
 0x280   : > { %v1563_v49 = vadd.f32 %v1562_v41, %v1514_v25  ;;  %v1611_v3 = vpop.f32.mrf.mxu3  ;;  %v1823_v58 = vpop.f32.mrf.mxu0 }
 0x282   : > { %v1612_v44 = vadd.f32 %v1611_v3, %v1563_v49  ;;  %v1824_v49 = vadd.f32 %v3893_v12, %v1823_v58 }
 0x284   : > { %v1647_v23 = vmax.f32 %v1612_v44, 0.0 }
 0x286   : > { %v1667_v53 = vpack.c.bf16 %v1647_v23, %v1645_v7 }
 0x287   : > { %v1565_v29 = vpop.f32.mrf.mxu2 }
 0x288   : > { %v1614_v37 = vpop.f32.mrf.mxu3  ;;  %1886 = vmatmul.bf16.gmra.mxu1 %v1667_v53  ;;  %v1566_v14 = vadd.f32 %v1565_v29, %v1517_v4  ;;  %v1825_v61 = vpop.f32.mrf.mxu0 }
 0x289   : > { %v1826_v18 = vadd.f32 %v3893_v12, %v1825_v61 }
 0x28a   : > { %v1615_v15 = vadd.f32 %v1614_v37, %v1566_v14 }
 0x28c   : > { %v1649_v38 = vmax.f32 %v1615_v15, 0.0 }
 0x28f   : > { %v1567_v50 = vpop.f32.mrf.mxu2 }
 0x290   : > { %v1568_v26 = vadd.f32 %v1567_v50, %v1519_v31  ;;  %v1616_v21 = vpop.f32.mrf.mxu3  ;;  %v1828_v41 = vpop.f32.mrf.mxu0 }
 0x291   : > { %v1829_v17 = vadd.f32 %v3893_v12, %v1828_v41 }
 0x292   : > { %v1617_v19 = vadd.f32 %v1616_v21, %v1568_v26 }
 0x294   : > { %v1651_v24 = vmax.f32 %v1617_v19, 0.0 }
 0x296   : > { %v1669_v51 = vpack.c.bf16 %v1651_v24, %v1649_v38 }
 0x297   : > { %v1570_v28 = vpop.f32.mrf.mxu2 }
 0x298   : > { %v1619_v8 = vpop.f32.mrf.mxu3  ;;  %1891 = vmatmul.bf16.gmra.mxu1 %v1669_v51  ;;  %v1571_v60 = vadd.f32 %v1570_v28, %v1522_v13  ;;  %v1830_v23 = vpop.f32.mrf.mxu0 }
 0x299   : > { %v1831_v31 = vadd.f32 %v3893_v12, %v1830_v23 }
 0x29a   : > { %v1620_v27 = vadd.f32 %v1619_v8, %v1571_v60 }
 0x29c   : > { %v1653_v52 = vmax.f32 %v1620_v27, 0.0 }
 0x29f   : > { %v1572_v55 = vpop.f32.mrf.mxu2 }
 0x2a0   : > { %v1573_v48 = vadd.f32 %v1572_v55, %v1524_v10  ;;  %v1621_v20 = vpop.f32.mrf.mxu3  ;;  %v1833_v37 = vpop.f32.mrf.mxu0 }
 0x2a1   : > { %v1834_v16 = vadd.f32 %v3893_v12, %v1833_v37 }
 0x2a2   : > { %v1622_v42 = vadd.f32 %v1621_v20, %v1573_v48 }
 0x2a4   : > { %v1655_v35 = vmax.f32 %v1622_v42, 0.0 }
 0x2a6   : > { %v1671_v46 = vpack.c.bf16 %v1655_v35, %v1653_v52 }
 0x2a8   : > { %1896 = vmatmul.bf16.gmra.mxu1 %v1671_v46  ;;  %v1835_v50 = vpop.f32.mrf.mxu0 }
 0x2a9   : > { %v1836_v59 = vadd.f32 %v3893_v12, %v1835_v50 }
 0x2b0   : > { %v1838_v38 = vpop.f32.mrf.mxu0 }
 0x2b1   : > { %v1839_v5 = vadd.f32 %v3893_v12, %v1838_v38 }
 0x2b5   : > { %v1862_v11 = vpop.f32.mrf.mxu1 }
 0x2b6   : > { %v3896_v36 = vadd.f32 %v1862_v11, %v1814_v22 }
 0x2b8   : > { %v1902_v2 = vmul.f32 %v3896_v36, %v3896_v36  ;;  %v1840_v13 = vpop.f32.mrf.mxu0 }
 0x2b9   : > { %v1841_v55 = vadd.f32 %v3893_v12, %v1840_v13 }
 0x2ba   : > { %1918 = vadd.xlane.f32.xlu0 %v1902_v2 }
 0x2bd   : > { %v1864_v9 = vpop.f32.mrf.mxu1 }
 0x2be   : > { %v3901_v56 = vadd.f32 %v1864_v9, %v1816_v54 }
 0x2c0   : > { %v1903_v1 = vmul.f32 %v3901_v56, %v3901_v56  ;;  %v1843_v10 = vpop.f32.mrf.mxu0 }
 0x2c1   : > { %v1844_v42 = vadd.f32 %v3893_v12, %v1843_v10 }
 0x2c2   : > { %1920 = vadd.xlane.f32.xlu0 %v1903_v1 }
 0x2c5   : > { %v1867_v47 = vpop.f32.mrf.mxu1 }
 0x2c6   : > { %v3906_v63 = vadd.f32 %v1867_v47, %v1819_v0 }
 0x2c8   : > { %v1904_v32 = vmul.f32 %v3906_v63, %v3906_v63  ;;  %v1845_v52 = vpop.f32.mrf.mxu0 }
 0x2c9   : > { %v1846_v40 = vadd.f32 %v3893_v12, %v1845_v52 }
 0x2ca   : > { %1922 = vadd.xlane.f32.xlu1 %v1904_v32 }
 0x2cd   : > { %v1869_v25 = vpop.f32.mrf.mxu1 }
 0x2ce   : > { %v3911_v34 = vadd.f32 %v1869_v25, %v1821_v43 }
 0x2d0   : > { %v1905_v6 = vmul.f32 %v3911_v34, %v3911_v34  ;;  %v1848_v2 = vpop.f32.mrf.mxu0 }
 0x2d1   : > { %v1849_v54 = vadd.f32 %v3893_v12, %v1848_v2 }
 0x2d2   : > { %1924 = vadd.xlane.f32.xlu1 %v1905_v6 }
 0x2d5   : > { %v1872_v3 = vpop.f32.mrf.mxu1 }
 0x2d6   : > { %v3916_v44 = vadd.f32 %v1872_v3, %v1824_v49 }
 0x2d8   : > { %v1906_v7 = vmul.f32 %v3916_v44, %v3916_v44  ;;  %v1850_v61 = vpop.f32.mrf.mxu0 }
 0x2d9   : > { %v1851_v47 = vadd.f32 %v3893_v12, %v1850_v61 }
 0x2da   : > { %1926 = vadd.xlane.f32.xlu2 %v1906_v7 }
 0x2dd   : > { %v1874_v53 = vpop.f32.mrf.mxu1 }
 0x2de   : > { %v3921_v30 = vadd.f32 %v1874_v53, %v1826_v18 }
 0x2e0   : > { %v1907_v29 = vmul.f32 %v3921_v30, %v3921_v30 }
 0x2e2   : > { %1928 = vadd.xlane.f32.xlu2 %v1907_v29 }
 0x2e5   : > { %v1877_v4 = vpop.f32.mrf.mxu1 }
 0x2e6   : > { %v3926_v39 = vadd.f32 %v1877_v4, %v1829_v17 }
 0x2e8   : > { %v1908_v14 = vmul.f32 %v3926_v39, %v3926_v39 }
 0x2ea   : > { %1930 = vadd.xlane.f32.xlu0 %v1908_v14 }
 0x2ed   : > { %v1879_v15 = vpop.f32.mrf.mxu1 }
 0x2ee   : > { %v3931_v26 = vadd.f32 %v1879_v15, %v1831_v31 }
 0x2f0   : > { %v1909_v21 = vmul.f32 %v3931_v26, %v3931_v26 }
 0x2f2   : > { %1932 = vadd.xlane.f32.xlu1 %v1909_v21 }
 0x2f5   : > { %v1882_v19 = vpop.f32.mrf.mxu1 }
 0x2f6   : > { %v3936_v33 = vadd.f32 %v1882_v19, %v1834_v16 }
 0x2f8   : > { %v1910_v24 = vmul.f32 %v3936_v33, %v3936_v33 }
 0x2fa   : > { %1934 = vadd.xlane.f32.xlu2 %v1910_v24 }
 0x2fd   : > { %v1884_v51 = vpop.f32.mrf.mxu1 }
 0x2fe   : > { %v3941_v28 = vadd.f32 %v1884_v51, %v1836_v59 }
 0x300   : > { %v1911_v8 = vmul.f32 %v3941_v28, %v3941_v28 }
 0x302   : > { %1936 = vadd.xlane.f32.xlu0 %v1911_v8 }
 0x305   : > { %v1887_v62 = vpop.f32.mrf.mxu1 }
 0x306   : > { %v3946_v60 = vadd.f32 %v1887_v62, %v1839_v5 }
 0x308   : > { %v1912_v57 = vmul.f32 %v3946_v60, %v3946_v60 }
 0x30a   : > { %1938 = vadd.xlane.f32.xlu1 %v1912_v57 }
 0x30d   : > { %v1889_v27 = vpop.f32.mrf.mxu1 }
 0x30e   : > { %v3951_v48 = vadd.f32 %v1889_v27, %v1841_v55 }
 0x310   : > { %v1913_v20 = vmul.f32 %v3951_v48, %v3951_v48 }
 0x312   : > { %1940 = vadd.xlane.f32.xlu2 %v1913_v20 }
 0x315   : > { %v1892_v35 = vpop.f32.mrf.mxu1 }
 0x316   : > { %v3956_v46 = vadd.f32 %v1892_v35, %v1844_v42 }
 0x318   : > { %v1914_v45 = vmul.f32 %v3956_v46, %v3956_v46 }
 0x31a   : > { %1942 = vadd.xlane.f32.xlu0 %v1914_v45 }
 0x31d   : > { %v1894_v22 = vpop.f32.mrf.mxu1 }
 0x31e   : > { %v3961_v11 = vadd.f32 %v1894_v22, %v1846_v40 }
 0x320   : > { %v1915_v58 = vmul.f32 %v3961_v11, %v3961_v11 }
 0x322   : > { %1944 = vadd.xlane.f32.xlu1 %v1915_v58 }
 0x325   : > { %v1897_v9 = vpop.f32.mrf.mxu1 }
 0x326   : > { %v3966_v1 = vadd.f32 %v1897_v9, %v1849_v54 }
 0x328   : > { %v1916_v0 = vmul.f32 %v3966_v1, %v3966_v1 }
 0x32a   : > { %1946 = vadd.xlane.f32.xlu2 %v1916_v0 }
 0x32d   : > { %v1899_v32 = vpop.f32.mrf.mxu1  ;;  %v1919_v43 = vpop.xlane.xlu0 %1918 }
 0x32e   : > { %v3971_v25 = vadd.f32 %v1899_v32, %v1851_v47  ;;  %v1950_v41 = vmax.f32 %v1919_v43, 1e-24 }
 0x330   : > { %3014 = vrsqrt.f32 %v1950_v41  ;;  %v1917_v6 = vmul.f32 %v3971_v25, %v3971_v25  ;;  %vm1972_vm1 = vweird.f32 %v1950_v41 }
 0x332   : > { %1948 = vadd.xlane.f32.xlu0 %v1917_v6 }
 0x335   : > { %v1921_v49 = vpop.xlane.xlu0 %1920 }
 0x336   : > { %v3015_v3 = vpop.eup %3014  ;;  %v1951_v7 = vmax.f32 %v1921_v49, 1e-24 }
 0x337   : > { %v1967_v23 = vmul.f32 %v3015_v3, %v1950_v41  ;;  %vm1973_vm0 = vweird.f32 %v3015_v3 }
 0x338   : > { %3016 = vrsqrt.f32 %v1951_v7  ;;  %vm1974_vm2 = vmor %vm1972_vm1, %vm1973_vm0  ;;  %vm1982_vm5 = vweird.f32 %v1951_v7 }
 0x339   : > { %v1968_v18 = vmul.f32 %v3015_v3, %v1967_v23 }
 0x33b   : > { %v1969_v53 = vmul.f32 0.5, %v1968_v18 }
 0x33d   : > { %v1970_v29 = vsub.f32 1.5, %v1969_v53  ;;  %v1923_v12 = vpop.xlane.xlu1 %1922 }
 0x33e   : > { %v3017_v37 = vpop.eup %3016  ;;  %v1952_v17 = vmax.f32 %v1923_v12, 1e-24 }
 0x33f   : > { %v1971_v4 = vmul.f32 %v3015_v3, %v1970_v29  ;;  %v1977_v14 = vmul.f32 %v3017_v37, %v1951_v7  ;;  %vm1983_vm4 = vweird.f32 %v3017_v37 }
 0x340   : > { %3018 = vrsqrt.f32 %v1952_v17  ;;  %vm1984_vm6 = vmor %vm1982_vm5, %vm1983_vm4  ;;  %vm1992_vm9 = vweird.f32 %v1952_v17 }
 0x341   : > { %v1975_v31 = vsel %vm1974_vm2, %v3015_v3, %v1971_v4  ;;  %v1978_v50 = vmul.f32 %v3017_v37, %v1977_v14 }
 0x342   : > { %v2126_v15 = vmul.f32 %v1975_v31, %v3896_v36 }
 0x343   : > { %v1979_v21 = vmul.f32 0.5, %v1978_v50 }
 0x344   : > { %vm2142_vm3 = vcmp.ne.f32.partialorder %v2126_v15, %v2126_v15 }
 0x345   : > { %v2158_v16 = vsel %vm2142_vm3, 0.0, %v2126_v15  ;;  %v1980_v19 = vsub.f32 1.5, %v1979_v21  ;;  %v1925_v38 = vpop.xlane.xlu1 %1924 }
 0x346   : > { %v3019_v24 = vpop.eup %3018  ;;  %2174 = vst [vmem:[%s3977_s29] sm:$0xff] %v2158_v16  ;;  %v1953_v59 = vmax.f32 %v1925_v38, 1e-24 }
 0x347   : > { %v1981_v51 = vmul.f32 %v3017_v37, %v1980_v19  ;;  %v1987_v8 = vmul.f32 %v3019_v24, %v1952_v17  ;;  %vm1993_vm8 = vweird.f32 %v3019_v24 }
 0x348   : > { %3020 = vrsqrt.f32 %v1953_v59  ;;  %vm1994_vm10 = vmor %vm1992_vm9, %vm1993_vm8  ;;  %vm2002_vm13 = vweird.f32 %v1953_v59 }
 0x349   : > { %v1985_v13 = vsel %vm1984_vm6, %v3017_v37, %v1981_v51  ;;  %v1988_v36 = vmul.f32 %v3019_v24, %v1987_v8 }
 0x34a   : > { %v2127_v5 = vmul.f32 %v1985_v13, %v3901_v56 }
 0x34b   : > { %v1989_v62 = vmul.f32 0.5, %v1988_v36 }
 0x34c   : > { %vm2143_vm7 = vcmp.ne.f32.partialorder %v2127_v5, %v2127_v5 }
 0x34d   : > { %v2159_v57 = vsel %vm2143_vm7, 0.0, %v2127_v5  ;;  %v1990_v10 = vsub.f32 1.5, %v1989_v62  ;;  %v1927_v55 = vpop.xlane.xlu2 %1926 }
 0x34e   : > { %v3021_v27 = vpop.eup %3020  ;;  %2175 = vst [vmem:[%s3977_s29 + $0x8] sm:$0xff] %v2159_v57  ;;  %v1954_v20 = vmax.f32 %v1927_v55, 1e-24 }
 0x34f   : > { %v1991_v42 = vmul.f32 %v3019_v24, %v1990_v10  ;;  %v1997_v52 = vmul.f32 %v3021_v27, %v1953_v59  ;;  %vm2003_vm12 = vweird.f32 %v3021_v27 }
 0x350   : > { %3022 = vrsqrt.f32 %v1954_v20  ;;  %vm2004_vm14 = vmor %vm2002_vm13, %vm2003_vm12  ;;  %vm2012_vm1 = vweird.f32 %v1954_v20 }
 0x351   : > { %v1995_v35 = vsel %vm1994_vm10, %v3019_v24, %v1991_v42  ;;  %v1998_v45 = vmul.f32 %v3021_v27, %v1997_v52 }
 0x352   : > { %v2128_v40 = vmul.f32 %v1995_v35, %v3906_v63 }
 0x353   : > { %v1999_v56 = vmul.f32 0.5, %v1998_v45 }
 0x354   : > { %vm2144_vm11 = vcmp.ne.f32.partialorder %v2128_v40, %v2128_v40 }
 0x355   : > { %v2160_v22 = vsel %vm2144_vm11, 0.0, %v2128_v40  ;;  %v2000_v2 = vsub.f32 1.5, %v1999_v56  ;;  %v1929_v58 = vpop.xlane.xlu2 %1928 }
 0x356   : > { %v3023_v54 = vpop.eup %3022  ;;  %2176 = vst [vmem:[%s3977_s29 + $0x10] sm:$0xff] %v2160_v22  ;;  %v1955_v9 = vmax.f32 %v1929_v58, 1e-24 }
 0x357   : > { %v2001_v0 = vmul.f32 %v3021_v27, %v2000_v2  ;;  %v2007_v61 = vmul.f32 %v3023_v54, %v1954_v20  ;;  %vm2013_vm0 = vweird.f32 %v3023_v54 }
 0x358   : > { %3024 = vrsqrt.f32 %v1955_v9  ;;  %vm2014_vm2 = vmor %vm2012_vm1, %vm2013_vm0  ;;  %vm2022_vm5 = vweird.f32 %v1955_v9 }
 0x359   : > { %v2005_v47 = vsel %vm2004_vm14, %v3021_v27, %v2001_v0  ;;  %v2008_v32 = vmul.f32 %v3023_v54, %v2007_v61 }
 0x35a   : > { %v2129_v43 = vmul.f32 %v2005_v47, %v3911_v34 }
 0x35b   : > { %v2009_v63 = vmul.f32 0.5, %v2008_v32 }
 0x35c   : > { %vm2145_vm15 = vcmp.ne.f32.partialorder %v2129_v43, %v2129_v43 }
 0x35d   : > { %v2161_v41 = vsel %vm2145_vm15, 0.0, %v2129_v43  ;;  %v2010_v6 = vsub.f32 1.5, %v2009_v63  ;;  %v1931_v49 = vpop.xlane.xlu0 %1930 }
 0x35e   : > { %v3025_v3 = vpop.eup %3024  ;;  %2177 = vst [vmem:[%s3977_s29 + $0x18] sm:$0xff] %v2161_v41  ;;  %v1956_v7 = vmax.f32 %v1931_v49, 1e-24 }
 0x35f   : > { %v2011_v23 = vmul.f32 %v3023_v54, %v2010_v6  ;;  %v2017_v18 = vmul.f32 %v3025_v3, %v1955_v9  ;;  %vm2023_vm4 = vweird.f32 %v3025_v3 }
 0x360   : > { %3026 = vrsqrt.f32 %v1956_v7  ;;  %vm2024_vm6 = vmor %vm2022_vm5, %vm2023_vm4  ;;  %vm2032_vm9 = vweird.f32 %v1956_v7 }
 0x361   : > { %v2015_v53 = vsel %vm2014_vm2, %v3023_v54, %v2011_v23  ;;  %v2018_v29 = vmul.f32 %v3025_v3, %v2017_v18 }
 0x362   : > { %v2130_v12 = vmul.f32 %v2015_v53, %v3916_v44 }
 0x363   : > { %v2019_v34 = vmul.f32 0.5, %v2018_v29 }
 0x364   : > { %vm2146_vm3 = vcmp.ne.f32.partialorder %v2130_v12, %v2130_v12 }
 0x365   : > { %v2162_v37 = vsel %vm2146_vm3, 0.0, %v2130_v12  ;;  %v2020_v17 = vsub.f32 1.5, %v2019_v34  ;;  %v1933_v4 = vpop.xlane.xlu1 %1932 }
 0x366   : > { %v3027_v14 = vpop.eup %3026  ;;  %2178 = vst [vmem:[%s3977_s29 + $0x20] sm:$0xff] %v2162_v37  ;;  %v1957_v31 = vmax.f32 %v1933_v4, 1e-24 }
 0x367   : > { %v2021_v50 = vmul.f32 %v3025_v3, %v2020_v17  ;;  %v2027_v15 = vmul.f32 %v3027_v14, %v1956_v7  ;;  %vm2033_vm8 = vweird.f32 %v3027_v14 }
 0x368   : > { %3028 = vrsqrt.f32 %v1957_v31  ;;  %vm2034_vm10 = vmor %vm2032_vm9, %vm2033_vm8  ;;  %vm2042_vm13 = vweird.f32 %v1957_v31 }
 0x369   : > { %v2025_v21 = vsel %vm2024_vm6, %v3025_v3, %v2021_v50  ;;  %v2028_v16 = vmul.f32 %v3027_v14, %v2027_v15 }
 0x36a   : > { %v2131_v19 = vmul.f32 %v2025_v21, %v3921_v30 }
 0x36b   : > { %v2029_v44 = vmul.f32 0.5, %v2028_v16 }
 0x36c   : > { %vm2147_vm7 = vcmp.ne.f32.partialorder %v2131_v19, %v2131_v19 }
 0x36d   : > { %v2163_v38 = vsel %vm2147_vm7, 0.0, %v2131_v19  ;;  %v2030_v24 = vsub.f32 1.5, %v2029_v44  ;;  %v1935_v59 = vpop.xlane.xlu2 %1934 }
 0x36e   : > { %v3029_v51 = vpop.eup %3028  ;;  %2179 = vst [vmem:[%s3977_s29 + $0x28] sm:$0xff] %v2163_v38  ;;  %v1958_v8 = vmax.f32 %v1935_v59, 1e-24 }
 0x36f   : > { %v2031_v13 = vmul.f32 %v3027_v14, %v2030_v24  ;;  %v2037_v36 = vmul.f32 %v3029_v51, %v1957_v31  ;;  %vm2043_vm12 = vweird.f32 %v3029_v51 }
 0x370   : > { %3030 = vrsqrt.f32 %v1958_v8  ;;  %vm2044_vm14 = vmor %vm2042_vm13, %vm2043_vm12  ;;  %vm2052_vm1 = vweird.f32 %v1958_v8 }
 0x371   : > { %v2035_v5 = vsel %vm2034_vm10, %v3027_v14, %v2031_v13  ;;  %v2038_v62 = vmul.f32 %v3029_v51, %v2037_v36 }
 0x372   : > { %v2132_v57 = vmul.f32 %v2035_v5, %v3926_v39 }
 0x373   : > { %v2039_v30 = vmul.f32 0.5, %v2038_v62 }
 0x374   : > { %vm2148_vm11 = vcmp.ne.f32.partialorder %v2132_v57, %v2132_v57 }
 0x375   : > { %v2164_v10 = vsel %vm2148_vm11, 0.0, %v2132_v57  ;;  %v2040_v55 = vsub.f32 1.5, %v2039_v30  ;;  %v1937_v27 = vpop.xlane.xlu0 %1936 }
 0x376   : > { %v3031_v20 = vpop.eup %3030  ;;  %2180 = vst [vmem:[%s3977_s29 + $0x30] sm:$0xff] %v2164_v10  ;;  %v1959_v42 = vmax.f32 %v1937_v27, 1e-24 }
 0x377   : > { %v2041_v52 = vmul.f32 %v3029_v51, %v2040_v55  ;;  %v2047_v35 = vmul.f32 %v3031_v20, %v1958_v8  ;;  %vm2053_vm0 = vweird.f32 %v3031_v20 }
 0x378   : > { %3032 = vrsqrt.f32 %v1959_v42  ;;  %vm2054_vm2 = vmor %vm2052_vm1, %vm2053_vm0  ;;  %vm2062_vm5 = vweird.f32 %v1959_v42 }
 0x379   : > { %v2045_v45 = vsel %vm2044_vm14, %v3029_v51, %v2041_v52  ;;  %v2048_v40 = vmul.f32 %v3031_v20, %v2047_v35 }
 0x37a   : > { %v2133_v56 = vmul.f32 %v2045_v45, %v3931_v26 }
 0x37b   : > { %v2049_v39 = vmul.f32 0.5, %v2048_v40 }
 0x37c   : > { %vm2149_vm15 = vcmp.ne.f32.partialorder %v2133_v56, %v2133_v56 }
 0x37d   : > { %v2165_v22 = vsel %vm2149_vm15, 0.0, %v2133_v56  ;;  %v2050_v2 = vsub.f32 1.5, %v2049_v39  ;;  %v1939_v58 = vpop.xlane.xlu1 %1938 }
 0x37e   : > { %v3033_v54 = vpop.eup %3032  ;;  %2181 = vst [vmem:[%s3977_s29 + $0x38] sm:$0xff] %v2165_v22  ;;  %v1960_v9 = vmax.f32 %v1939_v58, 1e-24 }
 0x37f   : > { %v2051_v0 = vmul.f32 %v3031_v20, %v2050_v2  ;;  %v2057_v61 = vmul.f32 %v3033_v54, %v1959_v42  ;;  %vm2063_vm4 = vweird.f32 %v3033_v54 }
 0x380   : > { %3034 = vrsqrt.f32 %v1960_v9  ;;  %vm2064_vm6 = vmor %vm2062_vm5, %vm2063_vm4  ;;  %vm2072_vm9 = vweird.f32 %v1960_v9 }
 0x381   : > { %v2055_v47 = vsel %vm2054_vm2, %v3031_v20, %v2051_v0  ;;  %v2058_v32 = vmul.f32 %v3033_v54, %v2057_v61 }
 0x382   : > { %v2134_v43 = vmul.f32 %v2055_v47, %v3936_v33 }
 0x383   : > { %v2059_v26 = vmul.f32 0.5, %v2058_v32 }
 0x384   : > { %vm2150_vm3 = vcmp.ne.f32.partialorder %v2134_v43, %v2134_v43 }
 0x385   : > { %v2166_v63 = vsel %vm2150_vm3, 0.0, %v2134_v43  ;;  %v2060_v41 = vsub.f32 1.5, %v2059_v26  ;;  %v1941_v6 = vpop.xlane.xlu2 %1940 }
 0x386   : > { %v3035_v49 = vpop.eup %3034  ;;  %2182 = vst [vmem:[%s3977_s29 + $0x40] sm:$0xff] %v2166_v63  ;;  %v1961_v3 = vmax.f32 %v1941_v6, 1e-24 }
 0x387   : > { %v2061_v7 = vmul.f32 %v3033_v54, %v2060_v41  ;;  %v2067_v23 = vmul.f32 %v3035_v49, %v1960_v9  ;;  %vm2073_vm8 = vweird.f32 %v3035_v49 }
 0x388   : > { %3036 = vrsqrt.f32 %v1961_v3  ;;  %vm2074_vm10 = vmor %vm2072_vm9, %vm2073_vm8  ;;  %vm2082_vm13 = vweird.f32 %v1961_v3 }
 0x389   : > { %v2065_v18 = vsel %vm2064_vm6, %v3033_v54, %v2061_v7  ;;  %v2068_v53 = vmul.f32 %v3035_v49, %v2067_v23 }
 0x38a   : > { %v2135_v29 = vmul.f32 %v2065_v18, %v3941_v28 }
 0x38b   : > { %v2069_v33 = vmul.f32 0.5, %v2068_v53 }
 0x38c   : > { %vm2151_vm7 = vcmp.ne.f32.partialorder %v2135_v29, %v2135_v29 }
 0x38d   : > { %v2167_v12 = vsel %vm2151_vm7, 0.0, %v2135_v29  ;;  %v2070_v34 = vsub.f32 1.5, %v2069_v33  ;;  %v1943_v37 = vpop.xlane.xlu0 %1942 }
 0x38e   : > { %v3037_v17 = vpop.eup %3036  ;;  %2183 = vst [vmem:[%s3977_s29 + $0x48] sm:$0xff] %v2167_v12  ;;  %v1962_v4 = vmax.f32 %v1943_v37, 1e-24 }
 0x38f   : > { %v2071_v14 = vmul.f32 %v3035_v49, %v2070_v34  ;;  %v2077_v31 = vmul.f32 %v3037_v17, %v1961_v3  ;;  %vm2083_vm12 = vweird.f32 %v3037_v17 }
 0x390   : > { %3038 = vrsqrt.f32 %v1962_v4  ;;  %vm2084_vm14 = vmor %vm2082_vm13, %vm2083_vm12  ;;  %vm2092_vm1 = vweird.f32 %v1962_v4 }
 0x391   : > { %v2075_v50 = vsel %vm2074_vm10, %v3035_v49, %v2071_v14  ;;  %v2078_v15 = vmul.f32 %v3037_v17, %v2077_v31 }
 0x392   : > { %v2136_v21 = vmul.f32 %v2075_v50, %v3946_v60 }
 0x393   : > { %v2079_v28 = vmul.f32 0.5, %v2078_v15 }
 0x394   : > { %vm2152_vm11 = vcmp.ne.f32.partialorder %v2136_v21, %v2136_v21 }
 0x395   : > { %v2168_v16 = vsel %vm2152_vm11, 0.0, %v2136_v21  ;;  %v2080_v19 = vsub.f32 1.5, %v2079_v28  ;;  %v1945_v44 = vpop.xlane.xlu1 %1944 }
 0x396   : > { %v3039_v38 = vpop.eup %3038  ;;  %2184 = vst [vmem:[%s3977_s29 + $0x50] sm:$0xff] %v2168_v16  ;;  %v1963_v24 = vmax.f32 %v1945_v44, 1e-24 }
 0x397   : > { %v2081_v59 = vmul.f32 %v3037_v17, %v2080_v19  ;;  %v2087_v51 = vmul.f32 %v3039_v38, %v1962_v4  ;;  %vm2093_vm0 = vweird.f32 %v3039_v38 }
 0x398   : > { %3040 = vrsqrt.f32 %v1963_v24  ;;  %vm2094_vm2 = vmor %vm2092_vm1, %vm2093_vm0  ;;  %vm2102_vm5 = vweird.f32 %v1963_v24 }
 0x399   : > { %v2085_v8 = vsel %vm2084_vm14, %v3037_v17, %v2081_v59  ;;  %v2088_v13 = vmul.f32 %v3039_v38, %v2087_v51 }
 0x39a   : > { %v2137_v36 = vmul.f32 %v2085_v8, %v3951_v48 }
 0x39b   : > { %v2089_v60 = vmul.f32 0.5, %v2088_v13 }
 0x39c   : > { %vm2153_vm15 = vcmp.ne.f32.partialorder %v2137_v36, %v2137_v36 }
 0x39d   : > { %v2169_v5 = vsel %vm2153_vm15, 0.0, %v2137_v36  ;;  %v2090_v62 = vsub.f32 1.5, %v2089_v60  ;;  %v1947_v57 = vpop.xlane.xlu2 %1946 }
 0x39e   : > { %v3041_v30 = vpop.eup %3040  ;;  %2185 = vst [vmem:[%s3977_s29 + $0x58] sm:$0xff] %v2169_v5  ;;  %v1964_v10 = vmax.f32 %v1947_v57, 1e-24 }
 0x39f   : > { %v2091_v55 = vmul.f32 %v3039_v38, %v2090_v62  ;;  %v2097_v27 = vmul.f32 %v3041_v30, %v1963_v24  ;;  %vm2103_vm4 = vweird.f32 %v3041_v30 }
 0x3a0   : > { %3042 = vrsqrt.f32 %v1964_v10  ;;  %vm2104_vm6 = vmor %vm2102_vm5, %vm2103_vm4  ;;  %vm2112_vm9 = vweird.f32 %v1964_v10 }
 0x3a1   : > { %v2095_v20 = vsel %vm2094_vm2, %v3039_v38, %v2091_v55  ;;  %v2098_v42 = vmul.f32 %v3041_v30, %v2097_v27 }
 0x3a2   : > { %v2138_v52 = vmul.f32 %v2095_v20, %v3956_v46 }
 0x3a3   : > { %v2099_v48 = vmul.f32 0.5, %v2098_v42 }
 0x3a4   : > { %vm2154_vm3 = vcmp.ne.f32.partialorder %v2138_v52, %v2138_v52 }
 0x3a5   : > { %v2170_v35 = vsel %vm2154_vm3, 0.0, %v2138_v52  ;;  %v2100_v45 = vsub.f32 1.5, %v2099_v48  ;;  %v1949_v40 = vpop.xlane.xlu0 %1948 }
 0x3a6   : > { %v3043_v56 = vpop.eup %3042  ;;  %2186 = vst [vmem:[%s3977_s29 + $0x60] sm:$0xff] %v2170_v35  ;;  %v1965_v39 = vmax.f32 %v1949_v40, 1e-24 }
 0x3a7   : > { %v2101_v22 = vmul.f32 %v3041_v30, %v2100_v45  ;;  %v2107_v2 = vmul.f32 %v3043_v56, %v1964_v10  ;;  %vm2113_vm8 = vweird.f32 %v3043_v56 }
 0x3a8   : > { %3044 = vrsqrt.f32 %v1965_v39  ;;  %vm2114_vm10 = vmor %vm2112_vm9, %vm2113_vm8  ;;  %vm2122_vm13 = vweird.f32 %v1965_v39 }
 0x3a9   : > { %v2105_v58 = vsel %vm2104_vm6, %v3041_v30, %v2101_v22  ;;  %v2108_v54 = vmul.f32 %v3043_v56, %v2107_v2 }
 0x3aa   : > { %v2139_v46 = vmul.f32 %v2105_v58, %v3961_v11 }
 0x3ab   : > { %v2109_v9 = vmul.f32 0.5, %v2108_v54 }
 0x3ac   : > { %vm2155_vm7 = vcmp.ne.f32.partialorder %v2139_v46, %v2139_v46 }
 0x3ad   : > { %v2171_v0 = vsel %vm2155_vm7, 0.0, %v2139_v46  ;;  %v2110_v61 = vsub.f32 1.5, %v2109_v9 }
 0x3ae   : > { %v3045_v47 = vpop.eup %3044  ;;  %2187 = vst [vmem:[%s3977_s29 + $0x68] sm:$0xff] %v2171_v0 }
 0x3af   : > { %v2111_v32 = vmul.f32 %v3043_v56, %v2110_v61  ;;  %v2117_v43 = vmul.f32 %v3045_v47, %v1965_v39  ;;  %vm2123_vm12 = vweird.f32 %v3045_v47 }
 0x3b0   : > { %vm2124_vm14 = vmor %vm2122_vm13, %vm2123_vm12 }
 0x3b1   : > { %v2115_v26 = vsel %vm2114_vm10, %v3043_v56, %v2111_v32  ;;  %v2118_v63 = vmul.f32 %v3045_v47, %v2117_v43 }
 0x3b2   : > { %v2140_v41 = vmul.f32 %v2115_v26, %v3966_v1 }
 0x3b3   : > { %v2119_v6 = vmul.f32 0.5, %v2118_v63 }
 0x3b4   : > { %vm2156_vm11 = vcmp.ne.f32.partialorder %v2140_v41, %v2140_v41 }
 0x3b5   : > { %v2172_v11 = vsel %vm2156_vm11, 0.0, %v2140_v41  ;;  %v2120_v49 = vsub.f32 1.5, %v2119_v6 }
 0x3b6   : > { %2188 = vst [vmem:[%s3977_s29 + $0x70] sm:$0xff] %v2172_v11 }
 0x3b7   : > { %v2121_v3 = vmul.f32 %v3045_v47, %v2120_v49 }
 0x3b9   : > { %v2125_v1 = vsel %vm2124_vm14, %v3045_v47, %v2121_v3 }
 0x3ba   : > { %v2141_v7 = vmul.f32 %v2125_v1, %v3971_v25 }
 0x3bc   : > { %vm2157_vm15 = vcmp.ne.f32.partialorder %v2141_v7, %v2141_v7 }
 0x3bd   : > { %v2173_v23 = vsel %vm2157_vm15, 0.0, %v2141_v7 }
 0x3be   : > { %2189 = vst [vmem:[%s3977_s29 + $0x78] sm:$0xff] %v2173_v23 }
 0x3bf   : > { %3223 = shalt.err (!%p3220_p10)
}
 0x3c0   : > { %s3282_s1 = smov 128   ;;  %s3283_s10 = smov 8  }
 0x3c1   : > { %2936 = dma.vmem_to_hbm [thread:$0]  (%p3397_p0), %s2204_s12, 2048, %s2206_s13, %s2191_s22, %s3282_s1, %s3282_s1, %s3283_s10  }
 0x3c2 PF: > { %p2968_p11 = scmp.ge.s32.totalorder %s3270_s21, 2  ;;  %s2220_s24 = sand.u32 1, %s3258_s18  }
 0x3c3   : > { %s2221_s29 = scalar_lea.sflag [#allocation4], %s2220_s24 }
 0x3c4   : > { %p2956_p12 = pnand %p2968_p11, %p3349_p6 }
 0x3c6   : > { %p2957_p13 = pneg %p2956_p12 }
 0x3c8   : > { %3253 = dma.done.wait (%p2957_p13), %s2221_s29, 2048  }
 0x3c9   : > { %3255 = vsyncadd (%p2957_p13), %s2221_s29, 4294965248  ;;  %p20_p3 = scmp.ge.s32.totalorder %s3387_s11, 6   ;;  %s4108_s18 = smov %s3262_s19 }
 0x3ca   : > { %s4109_s19 = smov %s3266_s20  ;;  %s4110_s20 = smov %s3403_s15 }
 0x3cb   : > { %s4111_s21 = smov %s3387_s11  ;;  %22 = sbr.rel (!%p20_p3) target bundleno = 9 (0x9), region = 101 }
 0x3d0   :  { %2227 = vsyncpa [#allocation3], 1 }
 0x3d1   :  { %2229 = vsyncpa [#allocation3 + $0x1], 1 }
 0x3d2   :  { %2230 = vsyncpa [#allocation6], 1 }
 0x3d3   :  { %2231 = vsyncpa [#allocation9], 1 }
 0x3d4   :  { %2232 = vsyncpa [#allocation4], 1 }
 0x3d5   :  { %2234 = vsyncpa [#allocation4 + $0x1], 1 }

// kernel: tpu_custom_call.1
= control target key start
LH: loop header
LB: loop body
LE: loop exit
PB: predicated region body
PF: predicated region fallthrough
CT: control target
= control target key end

     0   :  { %s4043_s0 = inlined_call_operand.hbm [shape: f32[512,768], index: 0, kind: input, shape index: {}]   ;;  %s4044_s1 = inlined_call_operand.hbm [shape: bf16[768,256], index: 1, kind: input, shape index: {}]   ;;  %s4045_s2 = inlined_call_operand.hbm [shape: f32[1,256], index: 2, kind: input, shape index: {}]   ;;  %s4046_s3 = inlined_call_operand.hbm [shape: bf16[256,128], index: 3, kind: input, shape index: {}]   ;;  %s4047_s4 = inlined_call_operand.hbm [shape: f32[1,128], index: 4, kind: input, shape index: {}]   ;;  %s4048_s5 = inlined_call_operand.hbm [shape: f32[512,128], index: 5, kind: output, shape index: {}]  }
   0x1   :  { %4066 = sst [smem:[#allocation33_spill]] %s4044_s1 }
   0x2   :  { %10 = vsyncpa [#allocation3], 0 }
   0x3   :  { %12 = vsyncpa [#allocation3 + $0x1], 0 }
   0x4   :  { %13 = vsyncpa [#allocation6], 0 }
   0x5   :  { %14 = vsyncpa [#allocation9], 0 }
   0x6   :  { %15 = vsyncpa [#allocation4], 0 }
   0x7   :  { %17 = vsyncpa [#allocation4 + $0x1], 0  ;;  %s3314_s18 = smov 0   ;;  %s3316_s19 = smov 0  }
   0x8   :  { %s3318_s20 = smov 0   ;;  %s3320_s21 = smov 0  }
   0x9 LB: > { %s3335_s22 = sadd.s32 4294967295, %s3270_s21   ;;  %s2317_s23 = sadd.s32 4294967294, %s3270_s21   ;;  %s3270_s21 = sphi %s3320_s21, %s4111_s21   ;;  %s3266_s20 = sphi %s3318_s20, %s4110_s20   ;;  %s3262_s19 = sphi %s3316_s19, %s4109_s19   ;;  %s3258_s18 = sphi %s3314_s18, %s4108_s18  }
   0xa   : > { %p43_p0 = scmp.ne.s32.totalorder %s3262_s19, %s3258_s18  ;;  %p44_p1 = scmp.eq.s32.totalorder %s3335_s22, 0 }
   0xb   : > { %p151_p2 = scmp.eq.s32.totalorder %s3335_s22, 3  ;;  %p157_p3 = scmp.eq.s32.totalorder %s2317_s23, 3 }
   0xc   : > { %p3344_p4 = por %p44_p1, %p43_p0  ;;  %p2318_p5 = scmp.ge.s32.totalorder %s3270_s21, 1 }
   0xd   : > { %p3349_p6 = por %p157_p3, %p43_p0  ;;  %p164_p7 = scmp.lt.s32.totalorder %s3270_s21, 5 }
   0xe   : > { %s4069_s1 = sld [smem:[#allocation33_spill]]  ;;  %s3272_s30 = smov [#allocation5]  }
   0xf   : > { %p3357_p8 = pnand %p2318_p5, %p164_p7  ;;  %s177_s6 = sshll.u32 %s3272_s30, 4  ;;  %s178_s6 = int_to_ptr.vmem [resolvable:$true] %s177_s6 }
  0x10   : > { %s201_s10 = sshll.u32 %s4046_s3, 4  ;;  %s3273_s11 = smov 128   ;;  %s202_s10 = int_to_ptr.hbm [resolvable:$true] %s201_s10 }
  0x11   : > { %p2938_p9 = pneg %p3357_p8  ;;  %s3274_s12 = smov 8  }
  0x12   : > { %s3275_s13 = smov [#allocation8]   ;;  %s3276_s15 = smov 64  }
  0x13   : > { %p3365_p10 = pnand %p2938_p9, %p44_p1  ;;  %s203_s14 = sshll.u32 %s3275_s13, 4  ;;  %s204_s14 = int_to_ptr.vmem [resolvable:$true] %s203_s14 }
  0x14   : > { %s175_s28 = sshll.u32 %s4069_s1, 4  ;;  %s3277_s16 = smov 4   ;;  %s176_s28 = int_to_ptr.hbm [resolvable:$true] %s175_s28 }
  0x15   : > { %2941 = dma.hbm_to_vmem [thread:$0]  (!%p3365_p10), %s176_s28, 12288, %s178_s6, [#allocation6], %s3273_s11, %s3273_s11, %s3274_s12  }
  0x16   : > { %2947 = dma.hbm_to_vmem [thread:$0]  (!%p3365_p10), %s202_s10, 2048, %s204_s14, [#allocation9], %s3276_s15, %s3276_s15, %s3277_s16  }
  0x17   : > { %s190_s26 = sshll.u32 %s4045_s2, 4  ;;  %s3278_s27 = smov [#allocation7]   ;;  %s191_s26 = int_to_ptr.hbm [resolvable:$true] %s190_s26 }
  0x18   : > { %s192_s28 = sshll.u32 %s3278_s27, 4  ;;  %s216_s8 = sshll.u32 %s4047_s4, 4  ;;  %s193_s28 = int_to_ptr.vmem [resolvable:$true] %s192_s28  ;;  %s217_s8 = int_to_ptr.hbm [resolvable:$true] %s216_s8 }
  0x19   : > { %2944 = dma.hbm_to_vmem [thread:$0]  (!%p3365_p10), %s191_s26, 32, %s193_s28, [#allocation6]  }
  0x1a   : > { %s3279_s9 = smov [#allocation10]   ;;  %s3387_s11 = sadd.s32 1, %s3270_s21  }
  0x1b   : > { %s218_s10 = sshll.u32 %s3279_s9, 4  ;;  %s30_s12 = sadd.s32 1, %s3266_s20  ;;  %s219_s10 = int_to_ptr.vmem [resolvable:$true] %s218_s10 }
  0x1c   : > { %2950 = dma.hbm_to_vmem [thread:$0]  (!%p3365_p10), %s217_s8, 16, %s219_s10, [#allocation9]  }
  0x1d   : > { %s27_s13 = ssub.s32 %s3270_s21, %s3387_s11  ;;  %p37_p11 = scmp.ne.s32.totalorder %s3266_s20, %s3262_s19 }
  0x1e   : > { %p28_p12 = scmp.eq.s32.totalorder %s27_s13, 0  ;;  %p38_p13 = scmp.eq.s32.totalorder %s3270_s21, 0 }
  0x1f   : > { %p3397_p0 = por %p151_p2, %p37_p11  ;;  %p2963_p3 = scmp.lt.s32.totalorder %s3270_s21, 4 }
  0x20   : > { %s3403_s15 = scalar_select %p28_p12, %s3266_s20, %s30_s12  }
  0x21   : > { %p39_p5 = por %p38_p13, %p37_p11  ;;  %s229_s16 = sand.u32 1, %s3266_s20  }
  0x22   : > { %s2915_s7 = smul.u32 768, %s229_s16  ;;  %s230_s9 = scalar_lea.sflag [#allocation3], %s229_s16 }
  0x23   : > { %s2916_s17 = smul.u32 768, %s3270_s21  ;;  %p3407_p7 = pnand %p2963_p3, %p39_p5 }
  0x24   : > { %s233_s30 = scalar_lea.vmem [#allocation2], %s2915_s7  ;;  %s3173_s26 = scalar_lea.hbm %s4043_s0, 3072 }
  0x25   : > { %s239_s28 = scalar_lea.hbm %s4043_s0, %s2916_s17  ;;  %s242_s6 = sshll.u32 %s233_s30, 4  ;;  %s243_s6 = int_to_ptr.vmem [resolvable:$true] %s242_s6 }
  0x26   : > { %s240_s8 = sshll.u32 %s239_s28, 4  ;;  %p3170_p9 = pneg %p3407_p7  ;;  %s241_s8 = int_to_ptr.hbm [resolvable:$true] %s240_s8 }
  0x27   : > { %s3166_s10 = sshra.s32 %s241_s8, 4  ;;  %s3167_s10 = int_to_ptr.hbm [resolvable:$true] %s3166_s10 }
  0x28   : > { %s3168_s12 = scalar_lea.hbm %s3167_s10, 768  ;;  %p3174_p12 = scmp.lt.s32.totalorder %s3167_s10, %s4043_s0 }
  0x29   : > { %p3169_p2 = scmp.ne.s32.totalorder %s3167_s10, %s3168_s12  ;;  %p3175_p13 = scmp.lt.s32.totalorder %s3173_s26, %s3168_s12 }
  0x2b   : > { %p3171_p10 = pnand %p3170_p9, %p3169_p2  ;;  %p3176_p3 = por %p3175_p13, %p3174_p12 }
  0x2d   : > { %p3172_p11 = pneg %p3171_p10 }
  0x2f   : > { %p3177_p5 = pnand %p3176_p3, %p3172_p11 }
  0x31   : > { %3180 = shalt.err (!%p3177_p5)
}
  0x32   : > { %s3280_s16 = smov 768   ;;  %s3281_s7 = smov 48  }
  0x33   : > { %2954 = dma.hbm_to_vmem [thread:$0]  (!%p3407_p7), %s241_s8, 12288, %s243_s6, %s230_s9, %s3280_s16, %s3280_s16, %s3281_s7  }
  0x34   : > { %254 = sbr.rel (%p3357_p8) target bundleno = 962 (0x3c2), region = 40 }
  0x39   : > { %s3427_s1 = sand.u32 1, %s3262_s19  }
  0x3a   : > { %s2917_s28 = smul.u32 768, %s3427_s1  ;;  %s257_s30 = scalar_lea.sflag [#allocation3], %s3427_s1 }
  0x3c   : > { %s3431_s10 = scalar_lea.vmem [#allocation2], %s2917_s28 }
  0x3d   : > { %3241 = dma.done.wait (%p3344_p4), %s257_s30, 12288  }
  0x3e   : > { %3243 = vsyncadd (%p3344_p4), %s257_s30, 4294955008 }
  0x3f   : > { %3245 = dma.done.wait (%p44_p1), [#allocation6], 12320  }
  0x40   : > { %3247 = vsyncadd (%p44_p1), [#allocation6], 4294954976 }
  0x41   : > { %3249 = dma.done.wait (%p44_p1), [#allocation9], 2064  }
  0x42   : > { %3251 = vsyncadd (%p44_p1), [#allocation9], 4294965232  ;;  %v2391_v0 = vld [vmem:[#allocation5 + $0x70] sm:$0xf]  ;;  %v2801_v1 = vld [vmem:[#allocation5 + $0x74] sm:$0xf0] }
  0x43   : > { %v2455_v2 = vld [vmem:[#allocation5 + $0xf0] sm:$0xf]  ;;  %v2392_v3 = vor.u32 %v2801_v1, %v2391_v0  ;;  %v2817_v4 = vld [vmem:[#allocation5 + $0xf4] sm:$0xf0]  ;;  %v2383_v5 = vld [vmem:[#allocation5 + $0x60] sm:$0xf] }
  0x44   : > { %v2799_v6 = vld [vmem:[#allocation5 + $0x64] sm:$0xf0]  ;;  %v2456_v7 = vor.u32 %v2817_v4, %v2455_v2  ;;  %v2447_v8 = vld [vmem:[#allocation5 + $0xe0] sm:$0xf]  ;;  %v2375_v12 = vld [vmem:[#allocation5 + $0x50] sm:$0xf] }
  0x45   : > { %v2815_v9 = vld [vmem:[#allocation5 + $0xe4] sm:$0xf0]  ;;  %1036 = vmatpush.bf16.msra.mxu0 %v2392_v3  ;;  %2899 = vmatpush.bf16.msra.mxu2 %v2392_v3  ;;  %v2384_v10 = vor.u32 %v2799_v6, %v2383_v5  ;;  %v2797_v13 = vld [vmem:[#allocation5 + $0x54] sm:$0xf0]  ;;  %v2439_v14 = vld [vmem:[#allocation5 + $0xd0] sm:$0xf] }
  0x46   : > { %2907 = vmatpush.bf16.msra.mxu3 %v2456_v7  ;;  %v2448_v11 = vor.u32 %v2815_v9, %v2447_v8  ;;  %1085 = vmatpush.bf16.msra.mxu1 %v2456_v7  ;;  %v2813_v15 = vld [vmem:[#allocation5 + $0xd4] sm:$0xf0]  ;;  %v2376_v16 = vor.u32 %v2797_v13, %v2375_v12  ;;  %v2367_v18 = vld [vmem:[#allocation5 + $0x40] sm:$0xf]  ;;  %v2795_v19 = vld [vmem:[#allocation5 + $0x44] sm:$0xf0] }
  0x47   : > { %v2440_v17 = vor.u32 %v2813_v15, %v2439_v14  ;;  %v2431_v20 = vld [vmem:[#allocation5 + $0xc0] sm:$0xf]  ;;  %v2811_v21 = vld [vmem:[#allocation5 + $0xc4] sm:$0xf0]  ;;  %v2368_v22 = vor.u32 %v2795_v19, %v2367_v18  ;;  %v2359_v24 = vld [vmem:[#allocation5 + $0x30] sm:$0xf] }
  0x48   : > { %v2432_v23 = vor.u32 %v2811_v21, %v2431_v20  ;;  %v2793_v25 = vld [vmem:[#allocation5 + $0x34] sm:$0xf0]  ;;  %v2423_v26 = vld [vmem:[#allocation5 + $0xb0] sm:$0xf]  ;;  %v2351_v30 = vld [vmem:[#allocation5 + $0x20] sm:$0xf] }
  0x49   : > { %1037 = vmatpush.bf16.msra.mxu0 %v2384_v10  ;;  %2900 = vmatpush.bf16.msra.mxu2 %v2384_v10  ;;  %v2809_v27 = vld [vmem:[#allocation5 + $0xb4] sm:$0xf0]  ;;  %v2360_v28 = vor.u32 %v2793_v25, %v2359_v24  ;;  %v2791_v31 = vld [vmem:[#allocation5 + $0x24] sm:$0xf0]  ;;  %v2415_v32 = vld [vmem:[#allocation5 + $0xa0] sm:$0xf] }
  0x4a   : > { %2908 = vmatpush.bf16.msra.mxu3 %v2448_v11  ;;  %1086 = vmatpush.bf16.msra.mxu1 %v2448_v11  ;;  %v2424_v29 = vor.u32 %v2809_v27, %v2423_v26  ;;  %v2807_v33 = vld [vmem:[#allocation5 + $0xa4] sm:$0xf0]  ;;  %v2352_v34 = vor.u32 %v2791_v31, %v2351_v30  ;;  %v2343_v36 = vld [vmem:[#allocation5 + $0x10] sm:$0xf]  ;;  %v2789_v37 = vld [vmem:[#allocation5 + $0x14] sm:$0xf0] }
  0x4b   : > { %v2416_v35 = vor.u32 %v2807_v33, %v2415_v32  ;;  %v2407_v38 = vld [vmem:[#allocation5 + $0x90] sm:$0xf]  ;;  %v2805_v39 = vld [vmem:[#allocation5 + $0x94] sm:$0xf0]  ;;  %v2344_v40 = vor.u32 %v2789_v37, %v2343_v36  ;;  %v2335_v42 = vld [vmem:[#allocation5] sm:$0xf] }
  0x4c   : > { %v2408_v41 = vor.u32 %v2805_v39, %v2407_v38  ;;  %v2787_v43 = vld [vmem:[#allocation5 + $0x4] sm:$0xf0]  ;;  %v2399_v44 = vld [vmem:[#allocation5 + $0x80] sm:$0xf]  ;;  %v2519_v46 = vld [vmem:[#allocation5 + $0x170] sm:$0xf] }
  0x4d   : > { %1038 = vmatpush.bf16.msra.mxu0 %v2376_v16  ;;  %2901 = vmatpush.bf16.msra.mxu2 %v2376_v16  ;;  %v2803_v45 = vld [vmem:[#allocation5 + $0x84] sm:$0xf0]  ;;  %v2833_v47 = vld [vmem:[#allocation5 + $0x174] sm:$0xf0]  ;;  %v310_v48 = vld [vmem:[%s3431_s10] sm:$0xff]  ;;  %v2336_v51 = vor.u32 %v2787_v43, %v2335_v42  ;;  %s2332_s24 = sshll.u32 %s3427_s1, 7 }
  0x4e   : > { %2909 = vmatpush.bf16.msra.mxu3 %v2440_v17  ;;  %1087 = vmatpush.bf16.msra.mxu1 %v2440_v17  ;;  %v2583_v49 = vld [vmem:[#allocation5 + $0x1f0] sm:$0xf]  ;;  %v2849_v50 = vld [vmem:[#allocation5 + $0x1f4] sm:$0xf0]  ;;  %v358_v53 = vld [vmem:[%s3431_s10 + $0x180] sm:$0xff]  ;;  %v2400_v55 = vor.u32 %v2803_v45, %v2399_v44  ;;  %v2520_v58 = vor.u32 %v2833_v47, %v2519_v46  ;;  %s3977_s29 = scalar_lea.vmem [#allocation11], %s2332_s24 }
  0x4f   : > { %v316_v52 = vld [vmem:[%s3431_s10 + $0x30] sm:$0xff]  ;;  %v359_v56 = vld [vmem:[%s3431_s10 + $0x188] sm:$0xff]  ;;  %v365_v57 = vld [vmem:[%s3431_s10 + $0x1b8] sm:$0xff]  ;;  %v2584_v60 = vor.u32 %v2849_v50, %v2583_v49  ;;  %s2898_s23 = sshll.u32 %s3335_s22, 7  ;;  %s2203_s12 = sshll.u32 %s3977_s29, 4  ;;  %s2204_s12 = int_to_ptr.vmem [resolvable:$true] %s2203_s12 }
  0x50   : > { %v364_v54 = vld [vmem:[%s3431_s10 + $0x1b0] sm:$0xff]  ;;  %v2511_v59 = vld [vmem:[#allocation5 + $0x160] sm:$0xf]  ;;  %v2831_v61 = vld [vmem:[#allocation5 + $0x164] sm:$0xf0]  ;;  %v3453_v0 = vpack.c.bf16 %v316_v52, %v310_v48  ;;  %v3457_v4 = vpack.c.bf16 %v365_v57, %v359_v56  ;;  %s2202_s9 = scalar_lea.hbm %s4048_s5, %s2898_s23  ;;  %s2191_s22 = scalar_lea.sflag [#allocation4], %s3427_s1 }
  0x51   : > { %1039 = vmatpush.bf16.msra.mxu0 %v2368_v22  ;;  %2902 = vmatpush.bf16.msra.mxu2 %v2368_v22  ;;  %v311_v62 = vld [vmem:[%s3431_s10 + $0x8] sm:$0xff]  ;;  %v317_v63 = vld [vmem:[%s3431_s10 + $0x38] sm:$0xff]  ;;  %v3455_v1 = vpack.c.bf16 %v364_v54, %v358_v53  ;;  %v2575_v2 = vld [vmem:[#allocation5 + $0x1e0] sm:$0xf]  ;;  %v2512_v5 = vor.u32 %v2831_v61, %v2511_v59  ;;  %s2205_s13 = sshll.u32 %s2202_s9, 4  ;;  %s3216_s7 = scalar_lea.hbm %s4048_s5, 512  ;;  %s2206_s13 = int_to_ptr.hbm [resolvable:$true] %s2205_s13 }
  0x52   : > { %2910 = vmatpush.bf16.msra.mxu3 %v2432_v23  ;;  %1088 = vmatpush.bf16.msra.mxu1 %v2432_v23  ;;  %v2847_v3 = vld [vmem:[#allocation5 + $0x1e4] sm:$0xf0]  ;;  %v3459_v6 = vpack.c.bf16 %v317_v63, %v311_v62  ;;  %v2503_v7 = vld [vmem:[#allocation5 + $0x150] sm:$0xf]  ;;  %v2829_v9 = vld [vmem:[#allocation5 + $0x154] sm:$0xf0] }
  0x53   : > { %v2576_v8 = vor.u32 %v2847_v3, %v2575_v2  ;;  %v2647_v10 = vld [vmem:[#allocation5 + $0x270] sm:$0xf]  ;;  %v2865_v11 = vld [vmem:[#allocation5 + $0x274] sm:$0xf0]  ;;  %v2504_v15 = vor.u32 %v2829_v9, %v2503_v7  ;;  %v2639_v16 = vld [vmem:[#allocation5 + $0x260] sm:$0xf] }
  0x54   : > { %v2567_v12 = vld [vmem:[#allocation5 + $0x1d0] sm:$0xf]  ;;  %v2845_v13 = vld [vmem:[#allocation5 + $0x1d4] sm:$0xf0]  ;;  %v2648_v14 = vor.u32 %v2865_v11, %v2647_v10  ;;  %v2863_v17 = vld [vmem:[#allocation5 + $0x264] sm:$0xf0] }
  0x55   : > { %1040 = vmatpush.bf16.msra.mxu0 %v2360_v28  ;;  %2903 = vmatpush.bf16.msra.mxu2 %v2360_v28  ;;  %v2568_v18 = vor.u32 %v2845_v13, %v2567_v12  ;;  %v2495_v19 = vld [vmem:[#allocation5 + $0x140] sm:$0xf]  ;;  %v2827_v20 = vld [vmem:[#allocation5 + $0x144] sm:$0xf0]  ;;  %v2640_v22 = vor.u32 %v2863_v17, %v2639_v16  ;;  %v2631_v24 = vld [vmem:[#allocation5 + $0x250] sm:$0xf] }
  0x56   : > { %2911 = vmatpush.bf16.msra.mxu3 %v2424_v29  ;;  %1089 = vmatpush.bf16.msra.mxu1 %v2424_v29  ;;  %v2559_v21 = vld [vmem:[#allocation5 + $0x1c0] sm:$0xf]  ;;  %v2843_v23 = vld [vmem:[#allocation5 + $0x1c4] sm:$0xf0]  ;;  %v2861_v25 = vld [vmem:[#allocation5 + $0x254] sm:$0xf0]  ;;  %v2496_v26 = vor.u32 %v2827_v20, %v2495_v19 }
  0x57   : > { %v2711_v27 = vld [vmem:[#allocation5 + $0x2f0] sm:$0xf]  ;;  %v2881_v28 = vld [vmem:[#allocation5 + $0x2f4] sm:$0xf0]  ;;  %v322_v29 = vld [vmem:[%s3431_s10 + $0x60] sm:$0xff]  ;;  %v2560_v30 = vor.u32 %v2843_v23, %v2559_v21  ;;  %s3210_s26 = sshra.s32 %s2206_s13, 4  ;;  %s3211_s26 = int_to_ptr.hbm [resolvable:$true] %s3210_s26 }
  0x58   : > { %v2487_v31 = vld [vmem:[#allocation5 + $0x130] sm:$0xf]  ;;  %v2825_v32 = vld [vmem:[#allocation5 + $0x134] sm:$0xf0]  ;;  %v2623_v37 = vld [vmem:[#allocation5 + $0x240] sm:$0xf]  ;;  %p3217_p7 = scmp.lt.s32.totalorder %s3211_s26, %s4048_s5 }
  0x59   : > { %1041 = vmatpush.bf16.msra.mxu0 %v2352_v34  ;;  %2904 = vmatpush.bf16.msra.mxu2 %v2352_v34  ;;  %v2551_v33 = vld [vmem:[#allocation5 + $0x1b0] sm:$0xf]  ;;  %v2632_v34 = vor.u32 %v2861_v25, %v2631_v24  ;;  %v2841_v36 = vld [vmem:[#allocation5 + $0x1b4] sm:$0xf0]  ;;  %v2859_v38 = vld [vmem:[#allocation5 + $0x244] sm:$0xf0]  ;;  %v2488_v45 = vor.u32 %v2825_v32, %v2487_v31 }
  0x5a   : > { %2912 = vmatpush.bf16.msra.mxu3 %v2416_v35  ;;  %1090 = vmatpush.bf16.msra.mxu1 %v2416_v35  ;;  %v2712_v35 = vor.u32 %v2881_v28, %v2711_v27  ;;  %v328_v39 = vld [vmem:[%s3431_s10 + $0x90] sm:$0xff]  ;;  %v371_v42 = vld [vmem:[%s3431_s10 + $0x1e8] sm:$0xff]  ;;  %v377_v43 = vld [vmem:[%s3431_s10 + $0x218] sm:$0xff]  ;;  %v2552_v47 = vor.u32 %v2841_v36, %v2551_v33  ;;  %v2624_v50 = vor.u32 %v2859_v38, %v2623_v37  ;;  %s3212_s27 = scalar_lea.hbm %s3211_s26, 128 }
  0x5b   : > { %v323_v44 = vld [vmem:[%s3431_s10 + $0x68] sm:$0xff]  ;;  %v329_v46 = vld [vmem:[%s3431_s10 + $0x98] sm:$0xff]  ;;  %v2479_v48 = vld [vmem:[#allocation5 + $0x120] sm:$0xf]  ;;  %p3213_p1 = scmp.ne.s32.totalorder %s3211_s26, %s3212_s27  ;;  %p3218_p2 = scmp.lt.s32.totalorder %s3216_s7, %s3212_s27 }
  0x5c   : > { %v2823_v49 = vld [vmem:[#allocation5 + $0x124] sm:$0xf0]  ;;  %v2543_v53 = vld [vmem:[#allocation5 + $0x1a0] sm:$0xf]  ;;  %v3479_v56 = vpack.c.bf16 %v329_v46, %v323_v44  ;;  %v2615_v59 = vld [vmem:[#allocation5 + $0x230] sm:$0xf] }
  0x5d   : > { %1042 = vmatpush.bf16.msra.mxu0 %v2344_v40  ;;  %2905 = vmatpush.bf16.msra.mxu2 %v2344_v40  ;;  %v370_v40 = vld [vmem:[%s3431_s10 + $0x1e0] sm:$0xff]  ;;  %v2839_v54 = vld [vmem:[#allocation5 + $0x1a4] sm:$0xf0]  ;;  %v2480_v57 = vor.u32 %v2823_v49, %v2479_v48  ;;  %v2471_v2 = vld [vmem:[#allocation5 + $0x110] sm:$0xf]  ;;  %p3214_p4 = pnand %p3213_p1, %p3397_p0  ;;  %p3219_p9 = por %p3218_p2, %p3217_p7 }
  0x5e   : > { %2913 = vmatpush.bf16.msra.mxu3 %v2408_v41  ;;  %1091 = vmatpush.bf16.msra.mxu1 %v2408_v41  ;;  %v376_v41 = vld [vmem:[%s3431_s10 + $0x210] sm:$0xff]  ;;  %v2703_v62 = vld [vmem:[#allocation5 + $0x2e0] sm:$0xf]  ;;  %v2879_v63 = vld [vmem:[#allocation5 + $0x2e4] sm:$0xf0] }
  0x5f   : > { %v3475_v52 = vpack.c.bf16 %v376_v41, %v370_v40  ;;  %v2821_v3 = vld [vmem:[#allocation5 + $0x114] sm:$0xf0]  ;;  %v2535_v7 = vld [vmem:[#allocation5 + $0x190] sm:$0xf]  ;;  %v2607_v10 = vld [vmem:[#allocation5 + $0x220] sm:$0xf]  ;;  %p3215_p8 = pneg %p3214_p4 }
  0x60   : > { %v2837_v9 = vld [vmem:[#allocation5 + $0x194] sm:$0xf0]  ;;  %v2855_v11 = vld [vmem:[#allocation5 + $0x224] sm:$0xf0]  ;;  %v2463_v16 = vld [vmem:[#allocation5 + $0x100] sm:$0xf] }
  0x61   : > { %1043 = vmatpush.bf16.msra.mxu0 %v2336_v51  ;;  %2906 = vmatpush.bf16.msra.mxu2 %v2336_v51  ;;  %v3473_v51 = vpack.c.bf16 %v328_v39, %v322_v29  ;;  %v2536_v12 = vor.u32 %v2837_v9, %v2535_v7  ;;  %v2608_v13 = vor.u32 %v2855_v11, %v2607_v10  ;;  %v2599_v19 = vld [vmem:[#allocation5 + $0x210] sm:$0xf]  ;;  %v2853_v20 = vld [vmem:[#allocation5 + $0x214] sm:$0xf0]  ;;  %v2687_v21 = vld [vmem:[#allocation5 + $0x2c0] sm:$0xf]  ;;  %p3220_p10 = pnand %p3219_p9, %p3215_p8 }
  0x62   : > { %2914 = vmatpush.bf16.msra.mxu3 %v2400_v55  ;;  %1092 = vmatpush.bf16.msra.mxu1 %v2400_v55  ;;  %v3477_v55 = vpack.c.bf16 %v377_v43, %v371_v42  ;;  %v2527_v23 = vld [vmem:[#allocation5 + $0x180] sm:$0xf]  ;;  %v2835_v25 = vld [vmem:[#allocation5 + $0x184] sm:$0xf0]  ;;  %v2600_v27 = vor.u32 %v2853_v20, %v2599_v19  ;;  %v340_v29 = vld [vmem:[%s3431_s10 + $0xf0] sm:$0xff] }
  0x63   : > { %v2528_v28 = vor.u32 %v2835_v25, %v2527_v23  ;;  %v2591_v31 = vld [vmem:[#allocation5 + $0x200] sm:$0xf]  ;;  %v2851_v32 = vld [vmem:[#allocation5 + $0x204] sm:$0xf0]  ;;  %v389_v36 = vld [vmem:[%s3431_s10 + $0x278] sm:$0xff] }
  0x64   : > { %1044 = vmatmul.bf16.vlgmr.msra.gmra.mxu0 %v3453_v0  ;;  %1064 = vmatmul.bf16.vlgmr.msra.gmra.mxu2 %v3455_v1  ;;  %v382_v33 = vld [vmem:[%s3431_s10 + $0x240] sm:$0xff]  ;;  %v2679_v37 = vld [vmem:[#allocation5 + $0x2b0] sm:$0xf]  ;;  %v2873_v38 = vld [vmem:[#allocation5 + $0x2b4] sm:$0xf0]  ;;  %v2592_v41 = vor.u32 %v2851_v32, %v2591_v31 }
  0x65   : > { %1134 = vmatpush.bf16.msrb.mxu2 %v2520_v58  ;;  %1113 = vmatmul.bf16.vlgmr.msra.gmra.mxu3 %v3457_v4  ;;  %v2544_v58 = vor.u32 %v2839_v54, %v2543_v53  ;;  %v335_v39 = vld [vmem:[%s3431_s10 + $0xc8] sm:$0xff]  ;;  %v341_v40 = vld [vmem:[%s3431_s10 + $0xf8] sm:$0xff]  ;;  %v2800_v49 = vld [vmem:[#allocation5 + $0x74] sm:$0xf] }
  0x66   : > { %1183 = vmatpush.bf16.msrb.mxu3 %v2584_v60  ;;  %1093 = vmatmul.bf16.vlgmr.msra.gmra.mxu1 %v3459_v6  ;;  %v2857_v60 = vld [vmem:[#allocation5 + $0x234] sm:$0xf0]  ;;  %v3499_v46 = vpack.c.bf16 %v341_v40, %v335_v39  ;;  %v2871_v48 = vld [vmem:[#allocation5 + $0x2a4] sm:$0xf0]  ;;  %v2816_v54 = vld [vmem:[#allocation5 + $0xf4] sm:$0xf] }
  0x67   : > { %1232 = vmatpush.bf16.msrb.mxu0 %v2648_v14  ;;  %1281 = vmatpush.bf16.msrb.mxu1 %v2712_v35  ;;  %v2616_v61 = vor.u32 %v2857_v60, %v2615_v59  ;;  %v2695_v14 = vld [vmem:[#allocation5 + $0x2d0] sm:$0xf]  ;;  %v383_v35 = vld [vmem:[%s3431_s10 + $0x248] sm:$0xff]  ;;  %v2869_v60 = vld [vmem:[#allocation5 + $0x294] sm:$0xf0] }
  0x68   : > { %v3497_v44 = vpack.c.bf16 %v389_v36, %v383_v35  ;;  %v2663_v59 = vld [vmem:[#allocation5 + $0x290] sm:$0xf]  ;;  %v394_v7 = vld [vmem:[%s3431_s10 + $0x2a0] sm:$0xff]  ;;  %v395_v10 = vld [vmem:[%s3431_s10 + $0x2a8] sm:$0xff] }
  0x69   : > { %1135 = vmatpush.bf16.msrb.mxu2 %v2512_v5  ;;  %v2704_v5 = vor.u32 %v2879_v63, %v2703_v62  ;;  %v2664_v62 = vor.u32 %v2869_v60, %v2663_v59  ;;  %v2655_v63 = vld [vmem:[#allocation5 + $0x280] sm:$0xf]  ;;  %v401_v11 = vld [vmem:[%s3431_s10 + $0x2d8] sm:$0xff]  ;;  %v2385_v19 = vld [vmem:[#allocation5 + $0x68] sm:$0xf0] }
  0x6a   : > { %1184 = vmatpush.bf16.msrb.mxu3 %v2576_v8  ;;  %v2472_v8 = vor.u32 %v2821_v3, %v2471_v2  ;;  %v2867_v2 = vld [vmem:[#allocation5 + $0x284] sm:$0xf0]  ;;  %v346_v3 = vld [vmem:[%s3431_s10 + $0x120] sm:$0xff]  ;;  %v321_v31 = vld [vmem:[%s3431_s10 + $0x58] sm:$0xff] }
  0x6b   : > { %1233 = vmatpush.bf16.msrb.mxu0 %v2640_v22  ;;  %1282 = vmatpush.bf16.msrb.mxu1 %v2704_v5  ;;  %v2875_v22 = vld [vmem:[#allocation5 + $0x2c4] sm:$0xf0]  ;;  %v352_v5 = vld [vmem:[%s3431_s10 + $0x150] sm:$0xff]  ;;  %v2656_v9 = vor.u32 %v2867_v2, %v2655_v63  ;;  %v2814_v20 = vld [vmem:[#allocation5 + $0xe4] sm:$0xf] }
  0x6c   : > { %v318_v25 = vld [vmem:[%s3431_s10 + $0x40] sm:$0xff]  ;;  %v2796_v36 = vld [vmem:[#allocation5 + $0x54] sm:$0xf]  ;;  %v2441_v40 = vld [vmem:[#allocation5 + $0xd8] sm:$0xf0] }
  0x6d   : > { %1136 = vmatpush.bf16.msrb.mxu2 %v2504_v15  ;;  %v2877_v15 = vld [vmem:[#allocation5 + $0x2d4] sm:$0xf0]  ;;  %v2369_v63 = vld [vmem:[#allocation5 + $0x48] sm:$0xf0]  ;;  %v2810_v2 = vld [vmem:[#allocation5 + $0xc4] sm:$0xf] }
  0x6e   : > { %1185 = vmatpush.bf16.msrb.mxu3 %v2568_v18  ;;  %v2696_v17 = vor.u32 %v2877_v15, %v2695_v14  ;;  %v2819_v18 = vld [vmem:[#allocation5 + $0x104] sm:$0xf0]  ;;  %v3513_v14 = vpack.c.bf16 %v352_v5, %v346_v3  ;;  %v2433_v5 = vld [vmem:[#allocation5 + $0xc8] sm:$0xf0] }
  0x6f   : > { %1234 = vmatpush.bf16.msrb.mxu0 %v2632_v34  ;;  %v2464_v24 = vor.u32 %v2819_v18, %v2463_v16  ;;  %v388_v34 = vld [vmem:[%s3431_s10 + $0x270] sm:$0xff]  ;;  %v3517_v16 = vpack.c.bf16 %v401_v11, %v395_v10  ;;  %v2798_v18 = vld [vmem:[#allocation5 + $0x64] sm:$0xf] }
  0x70   : > { %1283 = vmatpush.bf16.msrb.mxu1 %v2696_v17  ;;  %v3495_v43 = vpack.c.bf16 %v388_v34, %v382_v33  ;;  %v338_v10 = vld [vmem:[%s3431_s10 + $0xe0] sm:$0xff]  ;;  %v344_v11 = vld [vmem:[%s3431_s10 + $0x110] sm:$0xff] }
  0x71   : > { %1137 = vmatpush.bf16.msrb.mxu2 %v2496_v26  ;;  %v334_v26 = vld [vmem:[%s3431_s10 + $0xc0] sm:$0xff] }
  0x72   : > { %1186 = vmatpush.bf16.msrb.mxu3 %v2560_v30  ;;  %v2688_v30 = vor.u32 %v2875_v22, %v2687_v21  ;;  %v3493_v42 = vpack.c.bf16 %v340_v29, %v334_v26  ;;  %v2388_v21 = vor.u32 %v2798_v18, %v2385_v19  ;;  %v2449_v22 = vld [vmem:[#allocation5 + $0xe8] sm:$0xf0]  ;;  %v314_v26 = vld [vmem:[%s3431_s10 + $0x20] sm:$0xff]  ;;  %v345_v19 = vld [vmem:[%s3431_s10 + $0x118] sm:$0xff] }
  0x73   : > { %1235 = vmatpush.bf16.msrb.mxu0 %v2624_v50  ;;  %v2393_v50 = vld [vmem:[#allocation5 + $0x78] sm:$0xf0]  ;;  %v2452_v23 = vor.u32 %v2814_v20, %v2449_v22  ;;  %v319_v29 = vld [vmem:[%s3431_s10 + $0x48] sm:$0xff] }
  0x74   : > { %1049 = vmatmul.bf16.gmra.mxu0 %v3473_v51  ;;  %1069 = vmatmul.bf16.gmra.mxu2 %v3475_v52  ;;  %v339_v18 = vld [vmem:[%s3431_s10 + $0xe8] sm:$0xff] }
  0x75   : > { %1138 = vmatpush.bf16.msrb.mxu2 %v2488_v45  ;;  %1118 = vmatmul.bf16.gmra.mxu3 %v3477_v55  ;;  %v2680_v45 = vor.u32 %v2873_v38, %v2679_v37  ;;  %v2377_v37 = vld [vmem:[#allocation5 + $0x58] sm:$0xf0]  ;;  %v2812_v38 = vld [vmem:[#allocation5 + $0xd4] sm:$0xf] }
  0x76   : > { %1187 = vmatpush.bf16.msrb.mxu3 %v2552_v47  ;;  %1098 = vmatmul.bf16.gmra.mxu1 %v3479_v56  ;;  %v2671_v47 = vld [vmem:[#allocation5 + $0x2a0] sm:$0xf]  ;;  %v2380_v39 = vor.u32 %v2796_v36, %v2377_v37  ;;  %v356_v37 = vld [vmem:[%s3431_s10 + $0x170] sm:$0xff] }
  0x77   : > { %1236 = vmatpush.bf16.msrb.mxu0 %v2616_v61  ;;  %1284 = vmatpush.bf16.msrb.mxu1 %v2688_v30  ;;  %v2672_v53 = vor.u32 %v2871_v48, %v2671_v47  ;;  %v315_v30 = vld [vmem:[%s3431_s10 + $0x28] sm:$0xff]  ;;  %v330_v47 = vld [vmem:[%s3431_s10 + $0xa0] sm:$0xff] }
  0x78   : > { %v3539_v35 = vpack.c.bf16 %v321_v31, %v315_v30  ;;  %v326_v48 = vld [vmem:[%s3431_s10 + $0x80] sm:$0xff]  ;;  %v348_v30 = vld [vmem:[%s3431_s10 + $0x130] sm:$0xff] }
  0x79   : > { %1139 = vmatpush.bf16.msrb.mxu2 %v2480_v57  ;;  %v2396_v57 = vor.u32 %v2800_v49, %v2393_v50  ;;  %v332_v49 = vld [vmem:[%s3431_s10 + $0xb0] sm:$0xff]  ;;  %v325_v50 = vld [vmem:[%s3431_s10 + $0x78] sm:$0xff]  ;;  %v354_v31 = vld [vmem:[%s3431_s10 + $0x160] sm:$0xff] }
  0x7a   : > { %1188 = vmatpush.bf16.msrb.mxu3 %v2544_v58  ;;  %v2457_v58 = vld [vmem:[#allocation5 + $0xf8] sm:$0xf0]  ;;  %4075 = vst [vmem:[#allocation17_spill] sm:$0xff] %v3539_v35  ;;  %v3555_v59 = vpack.c.bf16 %v332_v49, %v326_v48  ;;  %v350_v36 = vld [vmem:[%s3431_s10 + $0x140] sm:$0xff] }
  0x7b   : > { %1237 = vmatpush.bf16.msrb.mxu0 %v2608_v13  ;;  %1285 = vmatpush.bf16.msrb.mxu1 %v2680_v45  ;;  %v2460_v61 = vor.u32 %v2816_v54, %v2457_v58  ;;  %v353_v13 = vld [vmem:[%s3431_s10 + $0x158] sm:$0xff]  ;;  %v324_v45 = vld [vmem:[%s3431_s10 + $0x70] sm:$0xff]  ;;  %v327_v54 = vld [vmem:[%s3431_s10 + $0x88] sm:$0xff] }
  0x7c   : > { %v3553_v58 = vpack.c.bf16 %v330_v47, %v324_v45  ;;  %4076 = vst [vmem:[#allocation18_spill] sm:$0xff] %v3555_v59  ;;  %v3593_v45 = vpack.c.bf16 %v354_v31, %v348_v30  ;;  %v3595_v47 = vpack.c.bf16 %v356_v37, %v350_v36  ;;  %v2832_v30 = vld [vmem:[#allocation5 + $0x174] sm:$0xf]  ;;  %v2521_v31 = vld [vmem:[#allocation5 + $0x178] sm:$0xf0] }
  0x7d   : > { %1140 = vmatpush.bf16.msrb.mxu2 %v2472_v8  ;;  %v400_v8 = vld [vmem:[%s3431_s10 + $0x2d0] sm:$0xff]  ;;  %v2345_v37 = vld [vmem:[#allocation5 + $0x18] sm:$0xf0] }
  0x7e   : > { %1189 = vmatpush.bf16.msrb.mxu3 %v2536_v12  ;;  %v347_v12 = vld [vmem:[%s3431_s10 + $0x128] sm:$0xff]  ;;  %v3515_v15 = vpack.c.bf16 %v400_v8, %v394_v7  ;;  %v2436_v7 = vor.u32 %v2810_v2, %v2433_v5  ;;  %v336_v8 = vld [vmem:[%s3431_s10 + $0xd0] sm:$0xff]  ;;  %4080 = vst [vmem:[#allocation22_spill] sm:$0xff] %v3595_v47  ;;  %v3605_v2 = vld [vmem:[#allocation7] sm:$0x3] }
  0x7f   : > { %1238 = vmatpush.bf16.msrb.mxu0 %v2600_v27  ;;  %1286 = vmatpush.bf16.msrb.mxu1 %v2672_v53  ;;  %v3519_v17 = vpack.c.bf16 %v353_v13, %v347_v12  ;;  %v320_v27 = vld [vmem:[%s3431_s10 + $0x50] sm:$0xff]  ;;  %v331_v53 = vld [vmem:[%s3431_s10 + $0xa8] sm:$0xff]  ;;  %v337_v12 = vld [vmem:[%s3431_s10 + $0xd8] sm:$0xff]  ;;  %4082 = vst [vmem:[#allocation24_spill] sm:$0xff] %v3605_v2 }
  0x80   : > { %v3535_v33 = vpack.c.bf16 %v320_v27, %v314_v26  ;;  %v3557_v60 = vpack.c.bf16 %v331_v53, %v325_v50  ;;  %v343_v13 = vld [vmem:[%s3431_s10 + $0x108] sm:$0xff]  ;;  %v2808_v26 = vld [vmem:[#allocation5 + $0xb4] sm:$0xf]  ;;  %v2790_v50 = vld [vmem:[#allocation5 + $0x24] sm:$0xf] }
  0x81   : > { %1141 = vmatpush.bf16.msrb.mxu2 %v2464_v24  ;;  %v312_v24 = vld [vmem:[%s3431_s10 + $0x10] sm:$0xff]  ;;  %v3577_v22 = vpack.c.bf16 %v343_v13, %v337_v12  ;;  %v2353_v53 = vld [vmem:[#allocation5 + $0x28] sm:$0xf0]  ;;  %v366_v5 = vld [vmem:[%s3431_s10 + $0x1c0] sm:$0xff]  ;;  %v3616_v13 = vperm.slane %v3605_v2, 0 }
  0x82   : > { %1190 = vmatpush.bf16.msrb.mxu3 %v2528_v28  ;;  %v313_v28 = vld [vmem:[%s3431_s10 + $0x18] sm:$0xff]  ;;  %v3533_v32 = vpack.c.bf16 %v318_v25, %v312_v24  ;;  %4074 = vst [vmem:[#allocation16_spill] sm:$0xff] %v3535_v33  ;;  %v2792_v24 = vld [vmem:[#allocation5 + $0x34] sm:$0xf] }
  0x83   : > { %1239 = vmatpush.bf16.msrb.mxu0 %v2592_v41  ;;  %1287 = vmatpush.bf16.msrb.mxu1 %v2664_v62  ;;  %v3537_v34 = vpack.c.bf16 %v319_v29, %v313_v28  ;;  %v2444_v41 = vor.u32 %v2812_v38, %v2441_v40  ;;  %v2794_v62 = vld [vmem:[#allocation5 + $0x44] sm:$0xf]  ;;  %v2361_v25 = vld [vmem:[#allocation5 + $0x38] sm:$0xf0]  ;;  %v351_v40 = vld [vmem:[%s3431_s10 + $0x148] sm:$0xff] }
  0x84   : > { %1054 = vmatmul.bf16.gmra.mxu0 %v3493_v42  ;;  %1074 = vmatmul.bf16.gmra.mxu2 %v3495_v43  ;;  %v2372_v3 = vor.u32 %v2794_v62, %v2369_v63  ;;  %v2364_v27 = vor.u32 %v2792_v24, %v2361_v25  ;;  %v2425_v28 = vld [vmem:[#allocation5 + $0xb8] sm:$0xf0]  ;;  %v2417_v62 = vld [vmem:[#allocation5 + $0xa8] sm:$0xf0]  ;;  %v2788_v36 = vld [vmem:[#allocation5 + $0x14] sm:$0xf] }
  0x85   : > { %1123 = vmatmul.bf16.gmra.mxu3 %v3497_v44  ;;  %1330 = vmatpush.bf16.msra.mxu2 %v2396_v57  ;;  %v333_v57 = vld [vmem:[%s3431_s10 + $0xb8] sm:$0xff]  ;;  %v2428_v29 = vor.u32 %v2808_v26, %v2425_v28 }
  0x86   : > { %1103 = vmatmul.bf16.gmra.mxu1 %v3499_v46  ;;  %1379 = vmatpush.bf16.msra.mxu3 %v2460_v61  ;;  %v3559_v61 = vpack.c.bf16 %v333_v57, %v327_v54  ;;  %v349_v38 = vld [vmem:[%s3431_s10 + $0x138] sm:$0xff]  ;;  %v2806_v54 = vld [vmem:[#allocation5 + $0xa4] sm:$0xf]  ;;  %v2356_v57 = vor.u32 %v2790_v50, %v2353_v53 }
  0x87   : > { %1288 = vmatpush.bf16.msrb.mxu1 %v2656_v9  ;;  %v342_v9 = vld [vmem:[%s3431_s10 + $0x100] sm:$0xff]  ;;  %v2420_v63 = vor.u32 %v2806_v54, %v2417_v62  ;;  %v369_v12 = vld [vmem:[%s3431_s10 + $0x1d8] sm:$0xff] }
  0x88   : > { %4077 = vst [vmem:[#allocation19_spill] sm:$0xff] %v3559_v61  ;;  %v3573_v20 = vpack.c.bf16 %v342_v9, %v336_v8  ;;  %v368_v8 = vld [vmem:[%s3431_s10 + $0x1d0] sm:$0xff]  ;;  %v361_v9 = vld [vmem:[%s3431_s10 + $0x198] sm:$0xff]  ;;  %v2830_v54 = vld [vmem:[#allocation5 + $0x164] sm:$0xf] }
  0x89   : > { %1331 = vmatpush.bf16.msra.mxu2 %v2388_v21  ;;  %v3575_v21 = vpack.c.bf16 %v344_v11, %v338_v10  ;;  %v367_v10 = vld [vmem:[%s3431_s10 + $0x1c8] sm:$0xff] }
  0x8a   : > { %1380 = vmatpush.bf16.msra.mxu3 %v2452_v23  ;;  %v3579_v23 = vpack.c.bf16 %v345_v19, %v339_v18  ;;  %v363_v11 = vld [vmem:[%s3431_s10 + $0x1a8] sm:$0xff]  ;;  %v3622_v25 = vpack.c.bf16 %v367_v10, %v361_v9  ;;  %v2828_v9 = vld [vmem:[#allocation5 + $0x154] sm:$0xf]  ;;  %v2505_v10 = vld [vmem:[#allocation5 + $0x158] sm:$0xf0] }
  0x8b   : > { %4078 = vst [vmem:[#allocation20_spill] sm:$0xff] %v3575_v21 }
  0x8c   : > { %4079 = vst [vmem:[#allocation21_spill] sm:$0xff] %v3579_v23 }
  0x8d   : > { %1332 = vmatpush.bf16.msra.mxu2 %v2380_v39  ;;  %v355_v39 = vld [vmem:[%s3431_s10 + $0x168] sm:$0xff] }
  0x8e   : > { %1381 = vmatpush.bf16.msra.mxu3 %v2444_v41  ;;  %v357_v41 = vld [vmem:[%s3431_s10 + $0x178] sm:$0xff]  ;;  %v3597_v48 = vpack.c.bf16 %v355_v39, %v349_v38  ;;  %v2524_v38 = vor.u32 %v2832_v30, %v2521_v31  ;;  %v2804_v39 = vld [vmem:[#allocation5 + $0x94] sm:$0xf]  ;;  %v374_v31 = vld [vmem:[%s3431_s10 + $0x200] sm:$0xff] }
  0x8f   : > { %v3599_v49 = vpack.c.bf16 %v357_v41, %v351_v40  ;;  %v2348_v40 = vor.u32 %v2788_v36, %v2345_v37  ;;  %v2409_v41 = vld [vmem:[#allocation5 + $0x98] sm:$0xf0]  ;;  %v380_v36 = vld [vmem:[%s3431_s10 + $0x230] sm:$0xff]  ;;  %v379_v37 = vld [vmem:[%s3431_s10 + $0x228] sm:$0xff] }
  0x90   : > { %1428 = vmatpush.bf16.msra.mxu0 %v2524_v38  ;;  %v2412_v53 = vor.u32 %v2804_v39, %v2409_v41  ;;  %v373_v30 = vld [vmem:[%s3431_s10 + $0x1f8] sm:$0xff]  ;;  %v375_v38 = vld [vmem:[%s3431_s10 + $0x208] sm:$0xff]  ;;  %v2826_v41 = vld [vmem:[#allocation5 + $0x144] sm:$0xf] }
  0x91   : > { %1333 = vmatpush.bf16.msra.mxu2 %v2372_v3  ;;  %4081 = vst [vmem:[#allocation23_spill] sm:$0xff] %v3599_v49  ;;  %v360_v3 = vld [vmem:[%s3431_s10 + $0x190] sm:$0xff]  ;;  %v381_v39 = vld [vmem:[%s3431_s10 + $0x238] sm:$0xff] }
  0x92   : > { %1382 = vmatpush.bf16.msra.mxu3 %v2436_v7  ;;  %v362_v7 = vld [vmem:[%s3431_s10 + $0x1a0] sm:$0xff]  ;;  %v3618_v18 = vpack.c.bf16 %v366_v5, %v360_v3 }
  0x93   : > { %v3620_v19 = vpack.c.bf16 %v368_v8, %v362_v7 }
  0x94   : > { %1059 = vmatmul.bf16.gmra.mxu0 %v3513_v14  ;;  %1079 = vmatmul.bf16.gmra.mxu2 %v3515_v15 }
  0x95   : > { %1128 = vmatmul.bf16.gmra.mxu3 %v3517_v16  ;;  %1334 = vmatpush.bf16.msra.mxu2 %v2364_v27  ;;  %4083 = vst [vmem:[#allocation25_spill] sm:$0xff] %v3620_v19  ;;  %v3625_v27 = vpack.c.bf16 %v369_v12, %v363_v11  ;;  %v2508_v12 = vor.u32 %v2828_v9, %v2505_v10 }
  0x96   : > { %1108 = vmatmul.bf16.gmra.mxu1 %v3519_v17  ;;  %1383 = vmatpush.bf16.msra.mxu3 %v2428_v29  ;;  %v3652_v9 = vpack.c.bf16 %v379_v37, %v373_v30  ;;  %v2846_v30 = vld [vmem:[#allocation5 + $0x1e4] sm:$0xf]  ;;  %v2337_v37 = vld [vmem:[#allocation5 + $0x8] sm:$0xf0] }
  0x97   : > { %4084 = vst [vmem:[#allocation26_spill] sm:$0xff] %v3625_v27 }
  0x99   : > { %1335 = vmatpush.bf16.msra.mxu2 %v2356_v57  ;;  %v2513_v57 = vld [vmem:[#allocation5 + $0x168] sm:$0xf0] }
  0x9a   : > { %1384 = vmatpush.bf16.msra.mxu3 %v2420_v63  ;;  %v2516_v3 = vor.u32 %v2830_v54, %v2513_v57 }
  0x9c   : > { %1429 = vmatpush.bf16.msra.mxu0 %v2516_v3 }
  0x9d   : > { %1336 = vmatpush.bf16.msra.mxu2 %v2348_v40 }
  0x9e   : > { %1385 = vmatpush.bf16.msra.mxu3 %v2412_v53  ;;  %v2848_v53 = vld [vmem:[#allocation5 + $0x1f4] sm:$0xf] }
  0xa0   : > { %1430 = vmatpush.bf16.msra.mxu0 %v2508_v12 }
  0xa4   : > { %1142 = vmatmul.bf16.vlgmr.msrb.gmra.mxu2 %v3533_v32  ;;  %1240 = vmatmul.bf16.vlgmr.msrb.gmra.mxu0 %v3535_v33 }
  0xa5   : > { %1191 = vmatmul.bf16.vlgmr.msrb.gmra.mxu3 %v3537_v34 }
  0xa6   : > { %1289 = vmatmul.bf16.vlgmr.msrb.gmra.mxu1 %v3539_v35 }
  0xb4   : > { %1147 = vmatmul.bf16.gmra.mxu2 %v3553_v58  ;;  %1245 = vmatmul.bf16.gmra.mxu0 %v3555_v59 }
  0xb5   : > { %1196 = vmatmul.bf16.gmra.mxu3 %v3557_v60 }
  0xb6   : > { %1294 = vmatmul.bf16.gmra.mxu1 %v3559_v61 }
  0xc4   : > { %1152 = vmatmul.bf16.gmra.mxu2 %v3573_v20  ;;  %1250 = vmatmul.bf16.gmra.mxu0 %v3575_v21 }
  0xc5   : > { %1201 = vmatmul.bf16.gmra.mxu3 %v3577_v22 }
  0xc6   : > { %1299 = vmatmul.bf16.gmra.mxu1 %v3579_v23  ;;  %v2840_v23 = vld [vmem:[#allocation5 + $0x1b4] sm:$0xf] }
  0xd4   : > { %1157 = vmatmul.bf16.gmra.mxu2 %v3593_v45  ;;  %1255 = vmatmul.bf16.gmra.mxu0 %v3595_v47  ;;  %v2465_v47 = vld [vmem:[#allocation5 + $0x108] sm:$0xf0] }
  0xd5   : > { %1206 = vmatmul.bf16.gmra.mxu3 %v3597_v48 }
  0xd6   : > { %1304 = vmatmul.bf16.gmra.mxu1 %v3599_v49  ;;  %v2818_v49 = vld [vmem:[#allocation5 + $0x104] sm:$0xf] }
  0xe1   : > { %v1045_v24 = vpop.f32.mrf.mxu0 }
  0xe2   : > { %v1046_v26 = vadd.f32 %v1045_v24, %v3616_v13  ;;  %v372_v24 = vld [vmem:[%s3431_s10 + $0x1f0] sm:$0xff] }
  0xe3   : > { %v1094_v28 = vpop.f32.mrf.mxu1 }
  0xe4   : > { %1162 = vmatmul.bf16.gmra.mxu2 %v3618_v18  ;;  %1260 = vmatmul.bf16.gmra.mxu0 %v3620_v19  ;;  %v3629_v29 = vadd.f32 %v1094_v28, %v1046_v26  ;;  %v378_v26 = vld [vmem:[%s3431_s10 + $0x220] sm:$0xff] }
  0xe5   : > { %1211 = vmatmul.bf16.gmra.mxu3 %v3622_v25 }
  0xe6   : > { %1309 = vmatmul.bf16.gmra.mxu1 %v3625_v27  ;;  %v3657_v27 = vpack.c.bf16 %v381_v39, %v375_v38 }
  0xe7   : > { %v1065_v50 = vpop.f32.mrf.mxu2 }
  0xe8   : > { %v1066_v62 = vadd.f32 %v1065_v50, %v3616_v13  ;;  %v1114_v63 = vpop.f32.mrf.mxu3  ;;  %v2497_v50 = vld [vmem:[#allocation5 + $0x148] sm:$0xf0]  ;;  %4086 = vst [vmem:[#allocation28_spill] sm:$0xff] %v3657_v27 }
  0xe9   : > { %v1047_v5 = vpop.f32.mrf.mxu0  ;;  %v2500_v3 = vor.u32 %v2826_v41, %v2497_v50  ;;  %v2577_v41 = vld [vmem:[#allocation5 + $0x1e8] sm:$0xf0]  ;;  %v2802_v50 = vld [vmem:[#allocation5 + $0x84] sm:$0xf] }
  0xea   : > { %v3634_v7 = vadd.f32 %v1114_v63, %v1066_v62  ;;  %v1048_v8 = vadd.f32 %v1047_v5, %v3616_v13  ;;  %v3648_v62 = vpack.c.bf16 %v378_v26, %v372_v24  ;;  %v3650_v63 = vpack.c.bf16 %v380_v36, %v374_v31  ;;  %v2585_v5 = vld [vmem:[#allocation5 + $0x1f8] sm:$0xf0]  ;;  %v2824_v26 = vld [vmem:[#allocation5 + $0x134] sm:$0xf]  ;;  %v2786_v36 = vld [vmem:[#allocation5 + $0x4] sm:$0xf] }
  0xeb   : > { %v1096_v11 = vpop.f32.mrf.mxu1  ;;  %v2588_v10 = vor.u32 %v2848_v53, %v2585_v5  ;;  %1431 = vmatpush.bf16.msra.mxu0 %v2500_v3  ;;  %v2489_v31 = vld [vmem:[#allocation5 + $0x138] sm:$0xf0]  ;;  %v2340_v38 = vor.u32 %v2786_v36, %v2337_v37  ;;  %v2580_v39 = vor.u32 %v2846_v30, %v2577_v41  ;;  %v2401_v53 = vld [vmem:[#allocation5 + $0x88] sm:$0xf0]  ;;  %v2844_v5 = vld [vmem:[#allocation5 + $0x1d4] sm:$0xf] }
  0xec   : > { %v3639_v28 = vadd.f32 %v1096_v11, %v1048_v8  ;;  %4085 = vst [vmem:[#allocation27_spill] sm:$0xff] %v3650_v63  ;;  %v2481_v3 = vld [vmem:[#allocation5 + $0x128] sm:$0xf0]  ;;  %v2473_v41 = vld [vmem:[#allocation5 + $0x118] sm:$0xf0] }
  0xed   : > { %1477 = vmatpush.bf16.msra.mxu1 %v2588_v10  ;;  %1337 = vmatpush.bf16.msra.mxu2 %v2340_v38  ;;  %v2842_v38 = vld [vmem:[#allocation5 + $0x1c4] sm:$0xf] }
  0xef   : > { %v1067_v40 = vpop.f32.mrf.mxu2 }
  0xf0   : > { %v1068_v54 = vadd.f32 %v1067_v40, %v3616_v13  ;;  %v1116_v57 = vpop.f32.mrf.mxu3  ;;  %v2492_v40 = vor.u32 %v2824_v26, %v2489_v31  ;;  %v2569_v26 = vld [vmem:[#allocation5 + $0x1d8] sm:$0xf0] }
  0xf1   : > { %v1050_v8 = vpop.f32.mrf.mxu0  ;;  %1478 = vmatpush.bf16.msra.mxu1 %v2580_v39  ;;  %v2572_v30 = vor.u32 %v2844_v5, %v2569_v26  ;;  %v385_v5 = vld [vmem:[%s3431_s10 + $0x258] sm:$0xff]  ;;  %v391_v26 = vld [vmem:[%s3431_s10 + $0x288] sm:$0xff] }
  0xf2   : > { %v3654_v11 = vadd.f32 %v1116_v57, %v1068_v54  ;;  %v1051_v12 = vadd.f32 %v1050_v8, %v3616_v13  ;;  %1432 = vmatpush.bf16.msra.mxu0 %v2492_v40  ;;  %v2404_v57 = vor.u32 %v2802_v50, %v2401_v53  ;;  %v2820_v40 = vld [vmem:[#allocation5 + $0x114] sm:$0xf]  ;;  %v2561_v53 = vld [vmem:[#allocation5 + $0x1c8] sm:$0xf0] }
  0xf3   : > { %v1099_v19 = vpop.f32.mrf.mxu1  ;;  %v2476_v50 = vor.u32 %v2820_v40, %v2473_v41 }
  0xf4   : > { %1167 = vmatmul.bf16.gmra.mxu2 %v3648_v62  ;;  %1265 = vmatmul.bf16.gmra.mxu0 %v3650_v63  ;;  %v3661_v24 = vadd.f32 %v1099_v19, %v1051_v12  ;;  %v2822_v19 = vld [vmem:[#allocation5 + $0x124] sm:$0xf] }
  0xf5   : > { %1216 = vmatmul.bf16.gmra.mxu3 %v3652_v9  ;;  %v2484_v12 = vor.u32 %v2822_v19, %v2481_v3  ;;  %1479 = vmatpush.bf16.msra.mxu1 %v2572_v30  ;;  %v2564_v3 = vor.u32 %v2842_v38, %v2561_v53  ;;  %v2468_v30 = vor.u32 %v2818_v49, %v2465_v47  ;;  %v2553_v38 = vld [vmem:[#allocation5 + $0x1b8] sm:$0xf0] }
  0xf6   : > { %1314 = vmatmul.bf16.gmra.mxu1 %v3657_v27  ;;  %1386 = vmatpush.bf16.msra.mxu3 %v2404_v57  ;;  %v390_v57 = vld [vmem:[%s3431_s10 + $0x280] sm:$0xff]  ;;  %v393_v27 = vld [vmem:[%s3431_s10 + $0x298] sm:$0xff]  ;;  %v3684_v53 = vpack.c.bf16 %v391_v26, %v385_v5  ;;  %v2556_v21 = vor.u32 %v2840_v23, %v2553_v38  ;;  %v2864_v23 = vld [vmem:[#allocation5 + $0x274] sm:$0xf] }
  0xf7   : > { %v1070_v54 = vpop.f32.mrf.mxu2  ;;  %1433 = vmatpush.bf16.msra.mxu0 %v2484_v12  ;;  %v2649_v49 = vld [vmem:[#allocation5 + $0x278] sm:$0xf0]  ;;  %v2836_v26 = vld [vmem:[#allocation5 + $0x194] sm:$0xf] }
  0xf8   : > { %v1071_v8 = vadd.f32 %v1070_v54, %v3616_v13  ;;  %v1119_v10 = vpop.f32.mrf.mxu3  ;;  %v384_v54 = vld [vmem:[%s3431_s10 + $0x250] sm:$0xff]  ;;  %v2713_v5 = vld [vmem:[#allocation5 + $0x2f8] sm:$0xf0] }
  0xf9   : > { %v1052_v31 = vpop.f32.mrf.mxu0  ;;  %v3680_v41 = vpack.c.bf16 %v390_v57, %v384_v54  ;;  %1480 = vmatpush.bf16.msra.mxu1 %v2564_v3  ;;  %v2545_v54 = vld [vmem:[#allocation5 + $0x1a8] sm:$0xf0]  ;;  %v2880_v3 = vld [vmem:[#allocation5 + $0x2f4] sm:$0xf] }
  0xfa   : > { %v3666_v36 = vadd.f32 %v1119_v10, %v1071_v8  ;;  %v1053_v37 = vadd.f32 %v1052_v31, %v3616_v13  ;;  %v386_v8 = vld [vmem:[%s3431_s10 + $0x260] sm:$0xff]  ;;  %v392_v10 = vld [vmem:[%s3431_s10 + $0x290] sm:$0xff]  ;;  %v387_v31 = vld [vmem:[%s3431_s10 + $0x268] sm:$0xff] }
  0xfb   : > { %v1101_v39 = vpop.f32.mrf.mxu1  ;;  %1434 = vmatpush.bf16.msra.mxu0 %v2476_v50  ;;  %v3689_v59 = vpack.c.bf16 %v393_v27, %v387_v31  ;;  %v2652_v27 = vor.u32 %v2864_v23, %v2649_v49  ;;  %v2537_v31 = vld [vmem:[#allocation5 + $0x198] sm:$0xf0]  ;;  %v402_v49 = vld [vmem:[%s3431_s10 + $0x2e0] sm:$0xff] }
  0xfc   : > { %v3671_v19 = vadd.f32 %v1101_v39, %v1053_v37  ;;  %v3682_v37 = vpack.c.bf16 %v392_v10, %v386_v8  ;;  %v2716_v10 = vor.u32 %v2880_v3, %v2713_v5  ;;  %v398_v3 = vld [vmem:[%s3431_s10 + $0x2c0] sm:$0xff]  ;;  %v397_v5 = vld [vmem:[%s3431_s10 + $0x2b8] sm:$0xff] }
  0xfd   : > { %4088 = vst [vmem:[#allocation30_spill] sm:$0xff] %v3689_v59  ;;  %1481 = vmatpush.bf16.msra.mxu1 %v2556_v21  ;;  %1526 = vmatpush.bf16.msrb.mxu2 %v2652_v27  ;;  %v404_v27 = vld [vmem:[%s3431_s10 + $0x2f0] sm:$0xff] }
  0xfe   : > { %4087 = vst [vmem:[#allocation29_spill] sm:$0xff] %v3682_v37  ;;  %1575 = vmatpush.bf16.msrb.mxu3 %v2716_v10 }
  0xff   : > { %v1072_v63 = vpop.f32.mrf.mxu2  ;;  %1435 = vmatpush.bf16.msra.mxu0 %v2468_v30 }
 0x100   : > { %v1073_v12 = vadd.f32 %v1072_v63, %v3616_v13  ;;  %v1121_v40 = vpop.f32.mrf.mxu3  ;;  %v2838_v63 = vld [vmem:[#allocation5 + $0x1a4] sm:$0xf] }
 0x101   : > { %v1055_v39 = vpop.f32.mrf.mxu0  ;;  %v2548_v57 = vor.u32 %v2838_v63, %v2545_v54  ;;  %v2529_v63 = vld [vmem:[#allocation5 + $0x188] sm:$0xf0]  ;;  %v396_v54 = vld [vmem:[%s3431_s10 + $0x2b0] sm:$0xff] }
 0x102   : > { %v3686_v61 = vadd.f32 %v1121_v40, %v1073_v12  ;;  %v1056_v50 = vadd.f32 %v1055_v39, %v3616_v13  ;;  %v2540_v40 = vor.u32 %v2836_v26, %v2537_v31  ;;  %v399_v26 = vld [vmem:[%s3431_s10 + $0x2c8] sm:$0xff]  ;;  %v405_v31 = vld [vmem:[%s3431_s10 + $0x2f8] sm:$0xff] }
 0x103   : > { %v1104_v35 = vpop.f32.mrf.mxu1  ;;  %1482 = vmatpush.bf16.msra.mxu1 %v2548_v57 }
 0x104   : > { %1172 = vmatmul.bf16.gmra.mxu2 %v3680_v41  ;;  %1270 = vmatmul.bf16.gmra.mxu0 %v3682_v37  ;;  %v3693_v47 = vadd.f32 %v1104_v35, %v1056_v50  ;;  %v2834_v50 = vld [vmem:[#allocation5 + $0x184] sm:$0xf] }
 0x105   : > { %1221 = vmatmul.bf16.gmra.mxu3 %v3684_v53  ;;  %v2532_v57 = vor.u32 %v2834_v50, %v2529_v63  ;;  %v3721_v50 = vpack.c.bf16 %v405_v31, %v399_v26  ;;  %v2878_v31 = vld [vmem:[#allocation5 + $0x2e4] sm:$0xf] }
 0x106   : > { %1319 = vmatmul.bf16.gmra.mxu1 %v3689_v59  ;;  %v3714_v59 = vpack.c.bf16 %v404_v27, %v398_v3 }
 0x107   : > { %v1075_v8 = vpop.f32.mrf.mxu2  ;;  %1483 = vmatpush.bf16.msra.mxu1 %v2540_v40  ;;  %4090 = vst [vmem:[#allocation32_spill] sm:$0xff] %v3721_v50 }
 0x108   : > { %v1076_v35 = vadd.f32 %v1075_v8, %v3616_v13  ;;  %v1124_v12 = vpop.f32.mrf.mxu3  ;;  %v403_v8 = vld [vmem:[%s3431_s10 + $0x2e8] sm:$0xff]  ;;  %4089 = vst [vmem:[#allocation31_spill] sm:$0xff] %v3714_v59 }
 0x109   : > { %v1057_v21 = vpop.f32.mrf.mxu0 }
 0x10a   : > { %v3698_v30 = vadd.f32 %v1124_v12, %v1076_v35  ;;  %v1058_v38 = vadd.f32 %v1057_v21, %v3616_v13  ;;  %v3712_v21 = vpack.c.bf16 %v402_v49, %v396_v54  ;;  %v2862_v54 = vld [vmem:[#allocation5 + $0x264] sm:$0xf]  ;;  %v2641_v49 = vld [vmem:[#allocation5 + $0x268] sm:$0xf0] }
 0x10b   : > { %v1106_v39 = vpop.f32.mrf.mxu1  ;;  %1484 = vmatpush.bf16.msra.mxu1 %v2532_v57  ;;  %v2644_v3 = vor.u32 %v2862_v54, %v2641_v49 }
 0x10c   : > { %v3702_v23 = vadd.f32 %v1106_v39, %v1058_v38  ;;  %v3716_v38 = vpack.c.bf16 %v403_v8, %v397_v5 }
 0x10d   : > { %1527 = vmatpush.bf16.msrb.mxu2 %v2644_v3 }
 0x10f   : > { %v1077_v10 = vpop.f32.mrf.mxu2 }
 0x110   : > { %v1078_v35 = vadd.f32 %v1077_v10, %v3616_v13  ;;  %v1126_v12 = vpop.f32.mrf.mxu3 }
 0x111   : > { %v1060_v37 = vpop.f32.mrf.mxu0 }
 0x112   : > { %v3718_v39 = vadd.f32 %v1126_v12, %v1078_v35  ;;  %v1061_v40 = vadd.f32 %v1060_v37, %v3616_v13  ;;  %v2705_v35 = vld [vmem:[#allocation5 + $0x2e8] sm:$0xf0] }
 0x113   : > { %v1109_v63 = vpop.f32.mrf.mxu1 }
 0x114   : > { %1177 = vmatmul.bf16.gmra.mxu2 %v3712_v21  ;;  %1275 = vmatmul.bf16.gmra.mxu0 %v3714_v59  ;;  %v3725_v10 = vadd.f32 %v1109_v63, %v1061_v40  ;;  %v2708_v40 = vor.u32 %v2878_v31, %v2705_v35  ;;  %v2697_v35 = vld [vmem:[#allocation5 + $0x2d8] sm:$0xf0] }
 0x115   : > { %1226 = vmatmul.bf16.gmra.mxu3 %v3716_v38 }
 0x116   : > { %1324 = vmatmul.bf16.gmra.mxu1 %v3721_v50  ;;  %1576 = vmatpush.bf16.msrb.mxu3 %v2708_v40 }
 0x117   : > { %v1080_v27 = vpop.f32.mrf.mxu2 }
 0x118   : > { %v1081_v57 = vadd.f32 %v1080_v27, %v3616_v13  ;;  %v1129_v37 = vpop.f32.mrf.mxu3 }
 0x119   : > { %v1062_v5 = vpop.f32.mrf.mxu0 }
 0x11a   : > { %v3730_v8 = vadd.f32 %v1129_v37, %v1081_v57  ;;  %v1063_v26 = vadd.f32 %v1062_v5, %v3616_v13  ;;  %v2860_v57 = vld [vmem:[#allocation5 + $0x254] sm:$0xf]  ;;  %v2633_v37 = vld [vmem:[#allocation5 + $0x258] sm:$0xf0] }
 0x11b   : > { %v1111_v12 = vpop.f32.mrf.mxu1  ;;  %v2636_v5 = vor.u32 %v2860_v57, %v2633_v37 }
 0x11c   : > { %v3733_v63 = vadd.f32 %v1111_v12, %v1063_v26 }
 0x11d   : > { %1528 = vmatpush.bf16.msrb.mxu2 %v2636_v5  ;;  %v2858_v5 = vld [vmem:[#allocation5 + $0x244] sm:$0xf] }
 0x11f   : > { %v1082_v59 = vpop.f32.mrf.mxu2 }
 0x120   : > { %v1083_v54 = vadd.f32 %v1082_v59, %v3616_v13  ;;  %v1131_v49 = vpop.f32.mrf.mxu3  ;;  %v2876_v13 = vld [vmem:[#allocation5 + $0x2d4] sm:$0xf] }
 0x121   : > { %v1241_v50 = vpop.f32.mrf.mxu0  ;;  %v2700_v40 = vor.u32 %v2876_v13, %v2697_v35 }
 0x122   : > { %v3736_v27 = vadd.f32 %v1131_v49, %v1083_v54 }
 0x123   : > { %v1290_v3 = vpop.f32.mrf.mxu1  ;;  %1577 = vmatpush.bf16.msrb.mxu3 %v2700_v40 }
 0x124   : > { %1338 = vmatmul.bf16.vlgmr.msra.gmra.mxu2 %v3453_v0  ;;  %1436 = vmatmul.bf16.vlgmr.msra.gmra.mxu0 %v3533_v32 }
 0x125   : > { %1387 = vmatmul.bf16.vlgmr.msra.gmra.mxu3 %v3459_v6 }
 0x126   : > { %1485 = vmatmul.bf16.vlgmr.msra.gmra.mxu1 %v3537_v34 }
 0x127   : > { %v1143_v26 = vpop.f32.mrf.mxu2 }
 0x128   : > { %v1144_v31 = vadd.f32 %v1143_v26, %v3629_v29  ;;  %v1192_v59 = vpop.f32.mrf.mxu3  ;;  %v2625_v26 = vld [vmem:[#allocation5 + $0x248] sm:$0xf0] }
 0x129   : > { %v1243_v12 = vpop.f32.mrf.mxu0 }
 0x12a   : > { %v1193_v54 = vadd.f32 %v1192_v59, %v1144_v31 }
 0x12b   : > { %v1292_v0 = vpop.f32.mrf.mxu1 }
 0x12c   : > { %v1242_v49 = vadd.f32 %v1241_v50, %v1193_v54  ;;  %v2628_v50 = vor.u32 %v2858_v5, %v2625_v26  ;;  %v2856_v5 = vld [vmem:[#allocation5 + $0x234] sm:$0xf]  ;;  %v2617_v26 = vld [vmem:[#allocation5 + $0x238] sm:$0xf0] }
 0x12e   : > { %v1291_v37 = vadd.f32 %v1290_v3, %v1242_v49  ;;  %1529 = vmatpush.bf16.msrb.mxu2 %v2628_v50  ;;  %v2874_v3 = vld [vmem:[#allocation5 + $0x2c4] sm:$0xf] }
 0x12f   : > { %v1145_v32 = vpop.f32.mrf.mxu2 }
 0x130   : > { %v1146_v6 = vadd.f32 %v1145_v32, %v3639_v28  ;;  %v1194_v2 = vpop.f32.mrf.mxu3  ;;  %v1624_v28 = vmax.f32 %v1291_v37, 0.0 }
 0x131   : > { %v1246_v33 = vpop.f32.mrf.mxu0 }
 0x132   : > { %v1195_v34 = vadd.f32 %v1194_v2, %v1146_v6 }
 0x133   : > { %v1295_v57 = vpop.f32.mrf.mxu1 }
 0x134   : > { %1343 = vmatmul.bf16.gmra.mxu2 %v3473_v51  ;;  %1441 = vmatmul.bf16.gmra.mxu0 %v3553_v58  ;;  %v1244_v29 = vadd.f32 %v1243_v12, %v1195_v34  ;;  %v2689_v51 = vld [vmem:[#allocation5 + $0x2c8] sm:$0xf0] }
 0x135   : > { %1392 = vmatmul.bf16.gmra.mxu3 %v3479_v56  ;;  %v2692_v58 = vor.u32 %v2874_v3, %v2689_v51 }
 0x136   : > { %v1293_v31 = vadd.f32 %v1292_v0, %v1244_v29  ;;  %1490 = vmatmul.bf16.gmra.mxu1 %v3557_v60 }
 0x137   : > { %v1148_v59 = vpop.f32.mrf.mxu2  ;;  %1578 = vmatpush.bf16.msrb.mxu3 %v2692_v58 }
 0x138   : > { %v1626_v13 = vmax.f32 %v1293_v31, 0.0  ;;  %v1149_v2 = vadd.f32 %v1148_v59, %v3661_v24  ;;  %v1197_v35 = vpop.f32.mrf.mxu3 }
 0x139   : > { %v1248_v40 = vpop.f32.mrf.mxu0 }
 0x13a   : > { %v3749_v12 = vpack.c.bf16 %v1626_v13, %v1624_v28  ;;  %v1198_v56 = vadd.f32 %v1197_v35, %v1149_v2 }
 0x13b   : > { %v1297_v54 = vpop.f32.mrf.mxu1 }
 0x13c   : > { %v1247_v32 = vadd.f32 %v1246_v33, %v1198_v56  ;;  %v2620_v33 = vor.u32 %v2856_v5, %v2617_v26 }
 0x13e   : > { %v1296_v24 = vadd.f32 %v1295_v57, %v1247_v32  ;;  %1530 = vmatpush.bf16.msrb.mxu2 %v2620_v33  ;;  %v2872_v57 = vld [vmem:[#allocation5 + $0x2b4] sm:$0xf] }
 0x13f   : > { %v1150_v0 = vpop.f32.mrf.mxu2 }
 0x140   : > { %v1151_v60 = vadd.f32 %v1150_v0, %v3671_v19  ;;  %v1199_v49 = vpop.f32.mrf.mxu3  ;;  %v1628_v19 = vmax.f32 %v1296_v24, 0.0 }
 0x141   : > { %v1251_v6 = vpop.f32.mrf.mxu0 }
 0x142   : > { %v1200_v34 = vadd.f32 %v1199_v49, %v1151_v60  ;;  %v2854_v60 = vld [vmem:[#allocation5 + $0x224] sm:$0xf]  ;;  %v2609_v49 = vld [vmem:[#allocation5 + $0x228] sm:$0xf0] }
 0x143   : > { %v1300_v37 = vpop.f32.mrf.mxu1 }
 0x144   : > { %1348 = vmatmul.bf16.gmra.mxu2 %v3493_v42  ;;  %1446 = vmatmul.bf16.gmra.mxu0 %v3573_v20  ;;  %v1249_v29 = vadd.f32 %v1248_v40, %v1200_v34  ;;  %v2681_v42 = vld [vmem:[#allocation5 + $0x2b8] sm:$0xf0] }
 0x145   : > { %1397 = vmatmul.bf16.gmra.mxu3 %v3499_v46  ;;  %v2684_v20 = vor.u32 %v2872_v57, %v2681_v42 }
 0x146   : > { %v1298_v31 = vadd.f32 %v1297_v54, %v1249_v29  ;;  %1495 = vmatmul.bf16.gmra.mxu1 %v3577_v22 }
 0x147   : > { %v1153_v50 = vpop.f32.mrf.mxu2  ;;  %1579 = vmatpush.bf16.msrb.mxu3 %v2684_v20  ;;  %v2889_v20 = vld [vmem:[#allocation8 + $0x38] sm:$0xff] }
 0x148   : > { %v1630_v59 = vmax.f32 %v1298_v31, 0.0  ;;  %v1154_v28 = vadd.f32 %v1153_v50, %v3693_v47  ;;  %v1202_v13 = vpop.f32.mrf.mxu3  ;;  %1804 = vmatpush.bf16.msrb.mxu0 %v2889_v20 }
 0x149   : > { %v1253_v2 = vpop.f32.mrf.mxu0 }
 0x14a   : > { %v1203_v35 = vadd.f32 %v1202_v13, %v1154_v28  ;;  %v3757_v3 = vpack.c.bf16 %v1630_v59, %v1628_v19 }
 0x14b   : > { %v1302_v46 = vpop.f32.mrf.mxu1 }
 0x14c   : > { %v1252_v40 = vadd.f32 %v1251_v6, %v1203_v35  ;;  %v2612_v6 = vor.u32 %v2854_v60, %v2609_v49  ;;  %v2852_v35 = vld [vmem:[#allocation5 + $0x214] sm:$0xf] }
 0x14e   : > { %v1301_v47 = vadd.f32 %v1300_v37, %v1252_v40  ;;  %1531 = vmatpush.bf16.msrb.mxu2 %v2612_v6  ;;  %v2870_v37 = vld [vmem:[#allocation5 + $0x2a4] sm:$0xf] }
 0x14f   : > { %v1155_v51 = vpop.f32.mrf.mxu2 }
 0x150   : > { %v1156_v22 = vadd.f32 %v1155_v51, %v3702_v23  ;;  %v1204_v58 = vpop.f32.mrf.mxu3  ;;  %v1632_v23 = vmax.f32 %v1301_v47, 0.0 }
 0x151   : > { %v1256_v56 = vpop.f32.mrf.mxu0 }
 0x152   : > { %v1205_v54 = vadd.f32 %v1204_v58, %v1156_v22 }
 0x153   : > { %v1305_v0 = vpop.f32.mrf.mxu1 }
 0x154   : > { %1353 = vmatmul.bf16.gmra.mxu2 %v3513_v14  ;;  %1451 = vmatmul.bf16.gmra.mxu0 %v3593_v45  ;;  %v1254_v32 = vadd.f32 %v1253_v2, %v1205_v54  ;;  %v2673_v14 = vld [vmem:[#allocation5 + $0x2a8] sm:$0xf0] }
 0x155   : > { %1402 = vmatmul.bf16.gmra.mxu3 %v3519_v17  ;;  %v2676_v45 = vor.u32 %v2870_v37, %v2673_v14 }
 0x156   : > { %v1303_v34 = vadd.f32 %v1302_v46, %v1254_v32  ;;  %1500 = vmatmul.bf16.gmra.mxu1 %v3597_v48  ;;  %v2601_v46 = vld [vmem:[#allocation5 + $0x218] sm:$0xf0] }
 0x157   : > { %v1158_v24 = vpop.f32.mrf.mxu2  ;;  %1580 = vmatpush.bf16.msrb.mxu3 %v2676_v45  ;;  %v2604_v40 = vor.u32 %v2852_v35, %v2601_v46  ;;  %v2850_v45 = vld [vmem:[#allocation5 + $0x204] sm:$0xf] }
 0x158   : > { %v1634_v29 = vmax.f32 %v1303_v34, 0.0  ;;  %v1159_v5 = vadd.f32 %v1158_v24, %v3725_v10  ;;  %v1207_v26 = vpop.f32.mrf.mxu3 }
 0x159   : > { %v1258_v31 = vpop.f32.mrf.mxu0  ;;  %1532 = vmatpush.bf16.msrb.mxu2 %v2604_v40  ;;  %v2882_v40 = vld [vmem:[#allocation8] sm:$0xff] }
 0x15a   : > { %v1208_v33 = vadd.f32 %v1207_v26, %v1159_v5  ;;  %v3765_v50 = vpack.c.bf16 %v1634_v29, %v1632_v23  ;;  %v2886_v23 = vld [vmem:[#allocation8 + $0x20] sm:$0xff] }
 0x15b   : > { %v1307_v17 = vpop.f32.mrf.mxu1 }
 0x15c   : > { %v1257_v19 = vadd.f32 %v1256_v56, %v1208_v33  ;;  %v2593_v33 = vld [vmem:[#allocation5 + $0x208] sm:$0xf0] }
 0x15e   : > { %v1306_v42 = vadd.f32 %v1305_v0, %v1257_v19  ;;  %v2888_v0 = vld [vmem:[#allocation8 + $0x30] sm:$0xff] }
 0x15f   : > { %v1160_v59 = vpop.f32.mrf.mxu2  ;;  %1805 = vmatpush.bf16.msrb.mxu0 %v2888_v0 }
 0x160   : > { %v1161_v48 = vadd.f32 %v1160_v59, %v3733_v63  ;;  %v1209_v28 = vpop.f32.mrf.mxu3  ;;  %v1636_v63 = vmax.f32 %v1306_v42, 0.0 }
 0x161   : > { %v1261_v13 = vpop.f32.mrf.mxu0 }
 0x162   : > { %v1210_v57 = vadd.f32 %v1209_v28, %v1161_v48 }
 0x163   : > { %v1310_v10 = vpop.f32.mrf.mxu1 }
 0x164   : > { %1358 = vmatmul.bf16.gmra.mxu2 %v3455_v1  ;;  %1456 = vmatmul.bf16.gmra.mxu0 %v3618_v18  ;;  %v1259_v2 = vadd.f32 %v1258_v31, %v1210_v57  ;;  %v2868_v1 = vld [vmem:[#allocation5 + $0x294] sm:$0xf]  ;;  %v2665_v18 = vld [vmem:[#allocation5 + $0x298] sm:$0xf0] }
 0x165   : > { %1407 = vmatmul.bf16.gmra.mxu3 %v3457_v4  ;;  %v2668_v32 = vor.u32 %v2868_v1, %v2665_v18  ;;  %v2885_v31 = vld [vmem:[#allocation8 + $0x18] sm:$0xff]  ;;  %v2884_v57 = vld [vmem:[#allocation8 + $0x10] sm:$0xff] }
 0x166   : > { %v1308_v51 = vadd.f32 %v1307_v17, %v1259_v2  ;;  %1505 = vmatmul.bf16.gmra.mxu1 %v3622_v25  ;;  %v2887_v25 = vld [vmem:[#allocation8 + $0x28] sm:$0xff] }
 0x167   : > { %v1163_v22 = vpop.f32.mrf.mxu2  ;;  %1581 = vmatpush.bf16.msrb.mxu3 %v2668_v32  ;;  %1806 = vmatpush.bf16.msrb.mxu0 %v2887_v25 }
 0x168   : > { %v1638_v58 = vmax.f32 %v1308_v51, 0.0  ;;  %v1164_v56 = vadd.f32 %v1163_v22, %v3634_v7  ;;  %v1212_v54 = vpop.f32.mrf.mxu3 }
 0x169   : > { %v1263_v47 = vpop.f32.mrf.mxu0 }
 0x16a   : > { %v1213_v4 = vadd.f32 %v1212_v54, %v1164_v56  ;;  %v3773_v60 = vpack.c.bf16 %v1638_v58, %v1636_v63 }
 0x16b   : > { %v1312_v49 = vpop.f32.mrf.mxu1  ;;  %1807 = vmatpush.bf16.msrb.mxu0 %v2886_v23 }
 0x16c   : > { %v1262_v34 = vadd.f32 %v1261_v13, %v1213_v4 }
 0x16e   : > { %v1311_v26 = vadd.f32 %v1310_v10, %v1262_v34 }
 0x16f   : > { %v1165_v6 = vpop.f32.mrf.mxu2  ;;  %1808 = vmatpush.bf16.msrb.mxu0 %v2885_v31 }
 0x170   : > { %v1166_v24 = vadd.f32 %v1165_v6, %v3654_v11  ;;  %v1214_v7 = vpop.f32.mrf.mxu3  ;;  %v2596_v11 = vor.u32 %v2850_v45, %v2593_v33  ;;  %v1640_v19 = vmax.f32 %v1311_v26, 0.0  ;;  %v2897_v33 = vld [vmem:[#allocation8 + $0x78] sm:$0xff] }
 0x171   : > { %v1266_v29 = vpop.f32.mrf.mxu0  ;;  %1853 = vmatpush.bf16.msrb.mxu1 %v2897_v33 }
 0x172   : > { %v1215_v5 = vadd.f32 %v1214_v7, %v1166_v24  ;;  %1533 = vmatpush.bf16.msrb.mxu2 %v2596_v11 }
 0x173   : > { %v1315_v37 = vpop.f32.mrf.mxu1  ;;  %1809 = vmatpush.bf16.msrb.mxu0 %v2884_v57 }
 0x174   : > { %1363 = vmatmul.bf16.gmra.mxu2 %v3475_v52  ;;  %1461 = vmatmul.bf16.gmra.mxu0 %v3648_v62  ;;  %v1264_v14 = vadd.f32 %v1263_v47, %v1215_v5  ;;  %v2866_v52 = vld [vmem:[#allocation5 + $0x284] sm:$0xf]  ;;  %v2657_v62 = vld [vmem:[#allocation5 + $0x288] sm:$0xf0] }
 0x175   : > { %1412 = vmatmul.bf16.gmra.mxu3 %v3477_v55  ;;  %v2660_v10 = vor.u32 %v2866_v52, %v2657_v62  ;;  %v4093_v62 = vld [vmem:[#allocation17_spill] sm:$0xff] }
 0x176   : > { %v1313_v17 = vadd.f32 %v1312_v49, %v1264_v14  ;;  %1510 = vmatmul.bf16.gmra.mxu1 %v3652_v9  ;;  %v2883_v9 = vld [vmem:[#allocation8 + $0x8] sm:$0xff] }
 0x177   : > { %v1168_v59 = vpop.f32.mrf.mxu2  ;;  %1582 = vmatpush.bf16.msrb.mxu3 %v2660_v10  ;;  %1810 = vmatpush.bf16.msrb.mxu0 %v2883_v9 }
 0x178   : > { %v1642_v48 = vmax.f32 %v1313_v17, 0.0  ;;  %v1169_v28 = vadd.f32 %v1168_v59, %v3666_v36  ;;  %v1217_v13 = vpop.f32.mrf.mxu3 }
 0x179   : > { %v1268_v42 = vpop.f32.mrf.mxu0 }
 0x17a   : > { %v1218_v55 = vadd.f32 %v1217_v13, %v1169_v28  ;;  %v3781_v2 = vpack.c.bf16 %v1642_v48, %v1640_v19  ;;  %v4091_v28 = vld [vmem:[#allocation16_spill] sm:$0xff] }
 0x17b   : > { %v1317_v20 = vpop.f32.mrf.mxu1  ;;  %1811 = vmatpush.bf16.msrb.mxu0 %v2882_v40  ;;  %v4092_v13 = vld [vmem:[#allocation24_spill] sm:$0xff] }
 0x17c   : > { %v1267_v46 = vadd.f32 %v1266_v29, %v1218_v55  ;;  %v3803_v52 = vperm.slane %v4092_v13, 1 }
 0x17e   : > { %v1316_v58 = vadd.f32 %v1315_v37, %v1267_v46  ;;  %v2896_v46 = vld [vmem:[#allocation8 + $0x70] sm:$0xff] }
 0x17f   : > { %v1170_v35 = vpop.f32.mrf.mxu2  ;;  %1854 = vmatpush.bf16.msrb.mxu1 %v2896_v46 }
 0x180   : > { %v1171_v51 = vadd.f32 %v1170_v35, %v3686_v61  ;;  %v1219_v36 = vpop.f32.mrf.mxu3  ;;  %v1644_v0 = vmax.f32 %v1316_v58, 0.0 }
 0x181   : > { %v1271_v63 = vpop.f32.mrf.mxu0 }
 0x182   : > { %v1220_v22 = vadd.f32 %v1219_v36, %v1171_v51 }
 0x183   : > { %v1320_v54 = vpop.f32.mrf.mxu1 }
 0x184   : > { %1368 = vmatmul.bf16.gmra.mxu2 %v3495_v43  ;;  %1466 = vmatmul.bf16.gmra.mxu0 %v3680_v41  ;;  %v1269_v56 = vadd.f32 %v1268_v42, %v1220_v22 }
 0x185   : > { %1417 = vmatmul.bf16.gmra.mxu3 %v3497_v44 }
 0x186   : > { %v1318_v1 = vadd.f32 %v1317_v20, %v1269_v56  ;;  %1515 = vmatmul.bf16.gmra.mxu1 %v3684_v53  ;;  %v4094_v56 = vld [vmem:[#allocation18_spill] sm:$0xff] }
 0x187   : > { %v1173_v18 = vpop.f32.mrf.mxu2 }
 0x188   : > { %v1646_v61 = vmax.f32 %v1318_v1, 0.0  ;;  %v1174_v47 = vadd.f32 %v1173_v18, %v3698_v30  ;;  %v1222_v32 = vpop.f32.mrf.mxu3  ;;  %v4095_v1 = vld [vmem:[#allocation19_spill] sm:$0xff] }
 0x189   : > { %v1273_v4 = vpop.f32.mrf.mxu0 }
 0x18a   : > { %v1223_v49 = vadd.f32 %v1222_v32, %v1174_v47  ;;  %v3789_v25 = vpack.c.bf16 %v1646_v61, %v1644_v0  ;;  %v2895_v32 = vld [vmem:[#allocation8 + $0x68] sm:$0xff] }
 0x18b   : > { %v1322_v34 = vpop.f32.mrf.mxu1  ;;  %1855 = vmatpush.bf16.msrb.mxu1 %v2895_v32 }
 0x18c   : > { %v1272_v41 = vadd.f32 %v1271_v63, %v1223_v49 }
 0x18e   : > { %v1321_v23 = vadd.f32 %v1320_v54, %v1272_v41 }
 0x18f   : > { %v1175_v43 = vpop.f32.mrf.mxu2 }
 0x190   : > { %v1176_v6 = vadd.f32 %v1175_v43, %v3718_v39  ;;  %v1224_v44 = vpop.f32.mrf.mxu3  ;;  %v1648_v5 = vmax.f32 %v1321_v23, 0.0 }
 0x191   : > { %v1276_v24 = vpop.f32.mrf.mxu0 }
 0x192   : > { %v1225_v7 = vadd.f32 %v1224_v44, %v1176_v6 }
 0x193   : > { %v1325_v31 = vpop.f32.mrf.mxu1 }
 0x194   : > { %1373 = vmatmul.bf16.gmra.mxu2 %v3515_v15  ;;  %1471 = vmatmul.bf16.gmra.mxu0 %v3712_v21  ;;  %v1274_v53 = vadd.f32 %v1273_v4, %v1225_v7  ;;  %v4097_v7 = vld [vmem:[#allocation21_spill] sm:$0xff] }
 0x195   : > { %1422 = vmatmul.bf16.gmra.mxu3 %v3517_v16 }
 0x196   : > { %v1323_v30 = vadd.f32 %v1322_v34, %v1274_v53  ;;  %1520 = vmatmul.bf16.gmra.mxu1 %v3716_v38 }
 0x197   : > { %v1178_v29 = vpop.f32.mrf.mxu2 }
 0x198   : > { %v1650_v26 = vmax.f32 %v1323_v30, 0.0  ;;  %v1179_v37 = vadd.f32 %v1178_v29, %v3730_v8  ;;  %v1227_v39 = vpop.f32.mrf.mxu3 }
 0x199   : > { %v1278_v14 = vpop.f32.mrf.mxu0 }
 0x19a   : > { %v1228_v45 = vadd.f32 %v1227_v39, %v1179_v37  ;;  %v3797_v17 = vpack.c.bf16 %v1650_v26, %v1648_v5  ;;  %v2894_v5 = vld [vmem:[#allocation8 + $0x60] sm:$0xff] }
 0x19b   : > { %v1327_v59 = vpop.f32.mrf.mxu1  ;;  %1856 = vmatpush.bf16.msrb.mxu1 %v2894_v5 }
 0x19c   : > { %v1277_v21 = vadd.f32 %v1276_v24, %v1228_v45  ;;  %v4098_v45 = vld [vmem:[#allocation22_spill] sm:$0xff] }
 0x19e   : > { %v1326_v48 = vadd.f32 %v1325_v31, %v1277_v21 }
 0x19f   : > { %v1180_v15 = vpop.f32.mrf.mxu2 }
 0x1a0   : > { %v1181_v16 = vadd.f32 %v1180_v15, %v3736_v27  ;;  %v1229_v11 = vpop.f32.mrf.mxu3  ;;  %v1652_v10 = vmax.f32 %v1326_v48, 0.0  ;;  %v4099_v15 = vld [vmem:[#allocation23_spill] sm:$0xff] }
 0x1a1   : > { %v1437_v19 = vpop.f32.mrf.mxu0 }
 0x1a2   : > { %v1230_v38 = vadd.f32 %v1229_v11, %v1181_v16 }
 0x1a4   : > { %1534 = vmatmul.bf16.vlgmr.msrb.gmra.mxu2 %v4091_v28  ;;  %1812 = vmatmul.bf16.vlgmr.msrb.gmra.mxu0 %v3749_v12  ;;  %v1279_v8 = vadd.f32 %v1278_v14, %v1230_v38 }
 0x1a5   : > { %1583 = vmatmul.bf16.vlgmr.msrb.gmra.mxu3 %v4093_v62 }
 0x1a6   : > { %v1328_v57 = vadd.f32 %v1327_v59, %v1279_v8  ;;  %v2893_v59 = vld [vmem:[#allocation8 + $0x58] sm:$0xff] }
 0x1a7   : > { %v1339_v42 = vpop.f32.mrf.mxu2  ;;  %1857 = vmatpush.bf16.msrb.mxu1 %v2893_v59 }
 0x1a8   : > { %v1654_v55 = vmax.f32 %v1328_v57, 0.0  ;;  %v1340_v27 = vadd.f32 %v1339_v42, %v3803_v52  ;;  %v1388_v20 = vpop.f32.mrf.mxu3  ;;  %v4100_v57 = vld [vmem:[#allocation25_spill] sm:$0xff] }
 0x1a9   : > { %v1439_v9 = vpop.f32.mrf.mxu0 }
 0x1aa   : > { %v1389_v35 = vadd.f32 %v1388_v20, %v1340_v27  ;;  %v3807_v51 = vpack.c.bf16 %v1654_v55, %v1652_v10  ;;  %v4101_v10 = vld [vmem:[#allocation26_spill] sm:$0xff] }
 0x1ac   : > { %v3809_v36 = vadd.f32 %v1437_v19, %v1389_v35  ;;  %v2892_v35 = vld [vmem:[#allocation8 + $0x50] sm:$0xff] }
 0x1ad   : > { %1858 = vmatpush.bf16.msrb.mxu1 %v2892_v35 }
 0x1af   : > { %v1341_v12 = vpop.f32.mrf.mxu2 }
 0x1b0   : > { %v1342_v40 = vadd.f32 %v1341_v12, %v3803_v52  ;;  %v1390_v63 = vpop.f32.mrf.mxu3 }
 0x1b1   : > { %v1442_v22 = vpop.f32.mrf.mxu0 }
 0x1b2   : > { %v1391_v58 = vadd.f32 %v1390_v63, %v1342_v40 }
 0x1b4   : > { %1539 = vmatmul.bf16.gmra.mxu2 %v4094_v56  ;;  %1817 = vmatmul.bf16.gmra.mxu0 %v3757_v3  ;;  %v3814_v54 = vadd.f32 %v1439_v9, %v1391_v58  ;;  %v4096_v3 = vld [vmem:[#allocation20_spill] sm:$0xff] }
 0x1b5   : > { %1588 = vmatmul.bf16.gmra.mxu3 %v4095_v1 }
 0x1b7   : > { %v1344_v18 = vpop.f32.mrf.mxu2 }
 0x1b8   : > { %v1345_v0 = vadd.f32 %v1344_v18, %v3803_v52  ;;  %v1393_v61 = vpop.f32.mrf.mxu3 }
 0x1b9   : > { %v1444_v4 = vpop.f32.mrf.mxu0 }
 0x1ba   : > { %v1394_v47 = vadd.f32 %v1393_v61, %v1345_v0  ;;  %v2891_v0 = vld [vmem:[#allocation8 + $0x48] sm:$0xff] }
 0x1bb   : > { %1859 = vmatpush.bf16.msrb.mxu1 %v2891_v0 }
 0x1bc   : > { %v3818_v49 = vadd.f32 %v1442_v22, %v1394_v47  ;;  %v4102_v22 = vld [vmem:[#allocation27_spill] sm:$0xff] }
 0x1bf   : > { %v1346_v43 = vpop.f32.mrf.mxu2 }
 0x1c0   : > { %v1347_v34 = vadd.f32 %v1346_v43, %v3803_v52  ;;  %v1395_v41 = vpop.f32.mrf.mxu3  ;;  %v4104_v43 = vld [vmem:[#allocation29_spill] sm:$0xff] }
 0x1c1   : > { %v1447_v24 = vpop.f32.mrf.mxu0 }
 0x1c2   : > { %v1396_v6 = vadd.f32 %v1395_v41, %v1347_v34  ;;  %v4105_v34 = vld [vmem:[#allocation30_spill] sm:$0xff] }
 0x1c4   : > { %1544 = vmatmul.bf16.gmra.mxu2 %v4096_v3  ;;  %1822 = vmatmul.bf16.gmra.mxu0 %v3765_v50  ;;  %v3823_v44 = vadd.f32 %v1444_v4, %v1396_v6 }
 0x1c5   : > { %1593 = vmatmul.bf16.gmra.mxu3 %v4097_v7  ;;  %v2890_v7 = vld [vmem:[#allocation8 + $0x40] sm:$0xff] }
 0x1c6   : > { %1860 = vmatpush.bf16.msrb.mxu1 %v2890_v7 }
 0x1c7   : > { %v1349_v23 = vpop.f32.mrf.mxu2 }
 0x1c8   : > { %v1350_v53 = vadd.f32 %v1349_v23, %v3803_v52  ;;  %v1398_v30 = vpop.f32.mrf.mxu3 }
 0x1c9   : > { %v1449_v37 = vpop.f32.mrf.mxu0 }
 0x1ca   : > { %v1399_v29 = vadd.f32 %v1398_v30, %v1350_v53 }
 0x1cc   : > { %v3827_v26 = vadd.f32 %v1447_v24, %v1399_v29 }
 0x1cf   : > { %v1351_v39 = vpop.f32.mrf.mxu2 }
 0x1d0   : > { %v1352_v14 = vadd.f32 %v1351_v39, %v3803_v52  ;;  %v1400_v31 = vpop.f32.mrf.mxu3 }
 0x1d1   : > { %v1452_v19 = vpop.f32.mrf.mxu0 }
 0x1d2   : > { %v1401_v50 = vadd.f32 %v1400_v31, %v1352_v14 }
 0x1d4   : > { %1549 = vmatmul.bf16.gmra.mxu2 %v4098_v45  ;;  %1827 = vmatmul.bf16.gmra.mxu0 %v3773_v60  ;;  %v3832_v33 = vadd.f32 %v1449_v37, %v1401_v50  ;;  %v4106_v37 = vld [vmem:[#allocation31_spill] sm:$0xff] }
 0x1d5   : > { %1598 = vmatmul.bf16.gmra.mxu3 %v4099_v15 }
 0x1d7   : > { %v1354_v21 = vpop.f32.mrf.mxu2 }
 0x1d8   : > { %v1355_v16 = vadd.f32 %v1354_v21, %v3803_v52  ;;  %v1403_v11 = vpop.f32.mrf.mxu3 }
 0x1d9   : > { %v1454_v60 = vpop.f32.mrf.mxu0 }
 0x1da   : > { %v1404_v38 = vadd.f32 %v1403_v11, %v1355_v16 }
 0x1dc   : > { %v3836_v48 = vadd.f32 %v1452_v19, %v1404_v38 }
 0x1df   : > { %v1356_v28 = vpop.f32.mrf.mxu2 }
 0x1e0   : > { %v1357_v8 = vadd.f32 %v1356_v28, %v3803_v52  ;;  %v1405_v13 = vpop.f32.mrf.mxu3 }
 0x1e2   : > { %v1406_v62 = vadd.f32 %v1405_v13, %v1357_v8 }
 0x1e4   : > { %1554 = vmatmul.bf16.gmra.mxu2 %v4100_v57  ;;  %1832 = vmatmul.bf16.gmra.mxu0 %v3781_v2  ;;  %v3841_v42 = vadd.f32 %v1454_v60, %v1406_v62  ;;  %v4103_v2 = vld [vmem:[#allocation28_spill] sm:$0xff] }
 0x1e5   : > { %1603 = vmatmul.bf16.gmra.mxu3 %v4101_v10 }
 0x1e7   : > { %v1359_v55 = vpop.f32.mrf.mxu2 }
 0x1e8   : > { %v1360_v27 = vadd.f32 %v1359_v55, %v3803_v52  ;;  %v1408_v20 = vpop.f32.mrf.mxu3 }
 0x1ea   : > { %v3845_v9 = vadd.f32 %v1408_v20, %v1360_v27 }
 0x1ef   : > { %v1361_v46 = vpop.f32.mrf.mxu2 }
 0x1f0   : > { %v1362_v12 = vadd.f32 %v1361_v46, %v3803_v52  ;;  %v1410_v40 = vpop.f32.mrf.mxu3 }
 0x1f2   : > { %v3848_v63 = vadd.f32 %v1410_v40, %v1362_v12 }
 0x1f4   : > { %1559 = vmatmul.bf16.gmra.mxu2 %v4102_v22  ;;  %1837 = vmatmul.bf16.gmra.mxu0 %v3789_v25  ;;  %v1486_v25 = vpop.f32.mrf.mxu1 }
 0x1f5   : > { %1608 = vmatmul.bf16.gmra.mxu3 %v4103_v2 }
 0x1f7   : > { %v1364_v58 = vpop.f32.mrf.mxu2 }
 0x1f8   : > { %v1365_v56 = vadd.f32 %v1364_v58, %v3803_v52  ;;  %v1413_v1 = vpop.f32.mrf.mxu3 }
 0x1fa   : > { %v3854_v18 = vadd.f32 %v1413_v1, %v1365_v56 }
 0x1fc   : > { %v1488_v23 = vpop.f32.mrf.mxu1 }
 0x1fd   : > { %v1489_v13 = vadd.f32 %v1488_v23, %v3814_v54 }
 0x1ff   : > { %v1366_v61 = vpop.f32.mrf.mxu2 }
 0x200   : > { %v1367_v47 = vadd.f32 %v1366_v61, %v3803_v52  ;;  %v1415_v32 = vpop.f32.mrf.mxu3  ;;  %v1457_v61 = vpop.f32.mrf.mxu0 }
 0x202   : > { %v3857_v4 = vadd.f32 %v1415_v32, %v1367_v47 }
 0x204   : > { %1564 = vmatmul.bf16.gmra.mxu2 %v4104_v43  ;;  %1842 = vmatmul.bf16.gmra.mxu0 %v3797_v17  ;;  %v4107_v17 = vld [vmem:[#allocation32_spill] sm:$0xff]  ;;  %v1491_v50 = vpop.f32.mrf.mxu1 }
 0x205   : > { %1613 = vmatmul.bf16.gmra.mxu3 %v4105_v34  ;;  %v1492_v40 = vadd.f32 %v1491_v50, %v3818_v49 }
 0x207   : > { %v1369_v41 = vpop.f32.mrf.mxu2 }
 0x208   : > { %v1370_v6 = vadd.f32 %v1369_v41, %v3803_v52  ;;  %v1418_v3 = vpop.f32.mrf.mxu3 }
 0x20a   : > { %v3863_v24 = vadd.f32 %v1418_v3, %v1370_v6  ;;  %v1459_v3 = vpop.f32.mrf.mxu0 }
 0x20c   : > { %v1493_v19 = vpop.f32.mrf.mxu1 }
 0x20f   : > { %v1371_v53 = vpop.f32.mrf.mxu2 }
 0x210   : > { %v1372_v30 = vadd.f32 %v1371_v53, %v3803_v52  ;;  %v1420_v29 = vpop.f32.mrf.mxu3 }
 0x212   : > { %v3866_v5 = vadd.f32 %v1420_v29, %v1372_v30 }
 0x214   : > { %1569 = vmatmul.bf16.gmra.mxu2 %v4106_v37  ;;  %1847 = vmatmul.bf16.gmra.mxu0 %v3807_v51  ;;  %v1487_v51 = vadd.f32 %v1486_v25, %v3809_v36  ;;  %v1496_v8 = vpop.f32.mrf.mxu1  ;;  %v1494_v36 = vadd.f32 %v1493_v19, %v3823_v44 }
 0x215   : > { %1618 = vmatmul.bf16.gmra.mxu3 %v4107_v17  ;;  %v1497_v41 = vadd.f32 %v1496_v8, %v3827_v26 }
 0x217   : > { %v1374_v39 = vpop.f32.mrf.mxu2 }
 0x218   : > { %v1375_v14 = vadd.f32 %v1374_v39, %v3803_v52  ;;  %v1423_v31 = vpop.f32.mrf.mxu3 }
 0x21a   : > { %v3872_v45 = vadd.f32 %v1423_v31, %v1375_v14  ;;  %v1462_v31 = vpop.f32.mrf.mxu0 }
 0x21c   : > { %v1498_v35 = vpop.f32.mrf.mxu1 }
 0x21d   : > { %v1499_v44 = vadd.f32 %v1498_v35, %v3832_v33 }
 0x21f   : > { %v1376_v15 = vpop.f32.mrf.mxu2 }
 0x220   : > { %v1377_v21 = vadd.f32 %v1376_v15, %v3803_v52  ;;  %v1425_v16 = vpop.f32.mrf.mxu3 }
 0x222   : > { %v3875_v11 = vadd.f32 %v1425_v16, %v1377_v21 }
 0x224   : > { %v1501_v1 = vpop.f32.mrf.mxu1 }
 0x225   : > { %v1502_v26 = vadd.f32 %v1501_v1, %v3836_v48 }
 0x227   : > { %v1535_v38 = vpop.f32.mrf.mxu2 }
 0x228   : > { %v1584_v59 = vpop.f32.mrf.mxu3  ;;  %v1536_v28 = vadd.f32 %v1535_v38, %v1487_v51 }
 0x22a   : > { %v1585_v60 = vadd.f32 %v1584_v59, %v1536_v28  ;;  %v1464_v28 = vpop.f32.mrf.mxu0 }
 0x22c   : > { %v1625_v27 = vmax.f32 %v1585_v60, 0.0  ;;  %v1503_v6 = vpop.f32.mrf.mxu1  ;;  %v1458_v60 = vadd.f32 %v1457_v61, %v3845_v9 }
 0x22d   : > { %v1504_v16 = vadd.f32 %v1503_v6, %v3841_v42 }
 0x22f   : > { %v1537_v62 = vpop.f32.mrf.mxu2 }
 0x230   : > { %v1538_v57 = vadd.f32 %v1537_v62, %v1489_v13  ;;  %v1586_v10 = vpop.f32.mrf.mxu3 }
 0x232   : > { %v1587_v55 = vadd.f32 %v1586_v10, %v1538_v57  ;;  %v1467_v42 = vpop.f32.mrf.mxu0 }
 0x234   : > { %v1627_v20 = vmax.f32 %v1587_v55, 0.0  ;;  %v1506_v39 = vpop.f32.mrf.mxu1 }
 0x235   : > { %v1507_v48 = vadd.f32 %v1506_v39, %v1458_v60 }
 0x236   : > { %v1657_v52 = vpack.c.bf16 %v1627_v20, %v1625_v27  ;;  %v1460_v20 = vadd.f32 %v1459_v3, %v3848_v63  ;;  %v1465_v63 = vadd.f32 %v1464_v28, %v3857_v4 }
 0x237   : > { %v1540_v46 = vpop.f32.mrf.mxu2 }
 0x238   : > { %v1589_v12 = vpop.f32.mrf.mxu3  ;;  %1861 = vmatmul.bf16.vlgmr.msrb.gmra.mxu1 %v1657_v52  ;;  %v1541_v22 = vadd.f32 %v1540_v46, %v1492_v40 }
 0x23a   : > { %v1590_v58 = vadd.f32 %v1589_v12, %v1541_v22  ;;  %v1469_v9 = vpop.f32.mrf.mxu0 }
 0x23b   : > { %v1470_v39 = vadd.f32 %v1469_v9, %v3866_v5 }
 0x23c   : > { %v1629_v47 = vmax.f32 %v1590_v58, 0.0  ;;  %v1508_v19 = vpop.f32.mrf.mxu1 }
 0x23d   : > { %v1509_v35 = vadd.f32 %v1508_v19, %v1460_v20 }
 0x23f   : > { %v1542_v2 = vpop.f32.mrf.mxu2 }
 0x240   : > { %v1543_v54 = vadd.f32 %v1542_v2, %v1494_v36  ;;  %v1591_v56 = vpop.f32.mrf.mxu3 }
 0x242   : > { %v1592_v0 = vadd.f32 %v1591_v56, %v1543_v54  ;;  %v1463_v56 = vadd.f32 %v1462_v31, %v3854_v18  ;;  %v1468_v18 = vadd.f32 %v1467_v42, %v3863_v24 }
 0x244   : > { %v1631_v32 = vmax.f32 %v1592_v0, 0.0  ;;  %v1511_v27 = vpop.f32.mrf.mxu1 }
 0x246   : > { %v1659_v43 = vpack.c.bf16 %v1631_v32, %v1629_v47  ;;  %v1512_v47 = vadd.f32 %v1511_v27, %v1463_v56 }
 0x247   : > { %v1545_v25 = vpop.f32.mrf.mxu2 }
 0x248   : > { %v1594_v34 = vpop.f32.mrf.mxu3  ;;  %1866 = vmatmul.bf16.gmra.mxu1 %v1659_v43  ;;  %v1546_v49 = vadd.f32 %v1545_v25, %v1497_v41 }
 0x24a   : > { %v1595_v23 = vadd.f32 %v1594_v34, %v1546_v49  ;;  %v1472_v34 = vpop.f32.mrf.mxu0 }
 0x24c   : > { %v1633_v37 = vmax.f32 %v1595_v23, 0.0  ;;  %v1513_v2 = vpop.f32.mrf.mxu1 }
 0x24d   : > { %v1514_v25 = vadd.f32 %v1513_v2, %v1465_v63 }
 0x24f   : > { %v1547_v7 = vpop.f32.mrf.mxu2 }
 0x250   : > { %v1548_v53 = vadd.f32 %v1547_v7, %v1499_v44  ;;  %v1596_v30 = vpop.f32.mrf.mxu3 }
 0x252   : > { %v1597_v29 = vadd.f32 %v1596_v30, %v1548_v53 }
 0x254   : > { %v1635_v17 = vmax.f32 %v1597_v29, 0.0  ;;  %v1516_v43 = vpop.f32.mrf.mxu1 }
 0x255   : > { %v1517_v4 = vadd.f32 %v1516_v43, %v1468_v18 }
 0x256   : > { %v1661_v14 = vpack.c.bf16 %v1635_v17, %v1633_v37  ;;  %v1474_v17 = vpop.f32.mrf.mxu0 }
 0x257   : > { %v1550_v50 = vpop.f32.mrf.mxu2  ;;  %v1475_v5 = vadd.f32 %v1474_v17, %v3875_v11 }
 0x258   : > { %v1599_v15 = vpop.f32.mrf.mxu3  ;;  %1871 = vmatmul.bf16.gmra.mxu1 %v1661_v14  ;;  %v1551_v21 = vadd.f32 %v1550_v50, %v1502_v26 }
 0x25a   : > { %v1600_v38 = vadd.f32 %v1599_v15, %v1551_v21 }
 0x25c   : > { %v1637_v13 = vmax.f32 %v1600_v38, 0.0  ;;  %v1518_v30 = vpop.f32.mrf.mxu1 }
 0x25d   : > { %v1519_v31 = vadd.f32 %v1518_v30, %v1470_v39 }
 0x25f   : > { %v1552_v33 = vpop.f32.mrf.mxu2 }
 0x260   : > { %v1553_v59 = vadd.f32 %v1552_v33, %v1504_v16  ;;  %v1601_v51 = vpop.f32.mrf.mxu3  ;;  %v1813_v33 = vpop.f32.mrf.mxu0 }
 0x262   : > { %v1602_v8 = vadd.f32 %v1601_v51, %v1553_v59  ;;  %v1473_v59 = vadd.f32 %v1472_v34, %v3872_v45 }
 0x264   : > { %v1639_v62 = vmax.f32 %v1602_v8, 0.0  ;;  %v1521_v16 = vpop.f32.mrf.mxu1 }
 0x266   : > { %v1663_v57 = vpack.c.bf16 %v1639_v62, %v1637_v13  ;;  %v1522_v13 = vadd.f32 %v1521_v16, %v1473_v59 }
 0x267   : > { %v1555_v10 = vpop.f32.mrf.mxu2 }
 0x268   : > { %v1604_v55 = vpop.f32.mrf.mxu3  ;;  %1876 = vmatmul.bf16.gmra.mxu1 %v1663_v57  ;;  %v1556_v52 = vadd.f32 %v1555_v10, %v1507_v48  ;;  %v1815_v57 = vpop.f32.mrf.mxu0 }
 0x26a   : > { %v1605_v12 = vadd.f32 %v1604_v55, %v1556_v52 }
 0x26c   : > { %v1641_v58 = vmax.f32 %v1605_v12, 0.0  ;;  %v1523_v62 = vpop.f32.mrf.mxu1  ;;  %v3893_v12 = vld [vmem:[#allocation10] ss:$0 sm:$0xff] }
 0x26d   : > { %v1524_v10 = vadd.f32 %v1523_v62, %v1475_v5 }
 0x26f   : > { %v1557_v46 = vpop.f32.mrf.mxu2 }
 0x270   : > { %v1558_v40 = vadd.f32 %v1557_v46, %v1509_v35  ;;  %v1606_v22 = vpop.f32.mrf.mxu3  ;;  %v1818_v45 = vpop.f32.mrf.mxu0 }
 0x272   : > { %v1607_v36 = vadd.f32 %v1606_v22, %v1558_v40  ;;  %v1814_v22 = vadd.f32 %v3893_v12, %v1813_v33 }
 0x274   : > { %v1643_v54 = vmax.f32 %v1607_v36, 0.0 }
 0x276   : > { %v1665_v1 = vpack.c.bf16 %v1643_v54, %v1641_v58  ;;  %v1816_v54 = vadd.f32 %v3893_v12, %v1815_v57 }
 0x277   : > { %v1560_v0 = vpop.f32.mrf.mxu2 }
 0x278   : > { %v1609_v61 = vpop.f32.mrf.mxu3  ;;  %1881 = vmatmul.bf16.gmra.mxu1 %v1665_v1  ;;  %v1561_v32 = vadd.f32 %v1560_v0, %v1512_v47  ;;  %v1820_v40 = vpop.f32.mrf.mxu0  ;;  %v1819_v0 = vadd.f32 %v3893_v12, %v1818_v45 }
 0x279   : > { %v1821_v43 = vadd.f32 %v3893_v12, %v1820_v40 }
 0x27a   : > { %v1610_v6 = vadd.f32 %v1609_v61, %v1561_v32 }
 0x27c   : > { %v1645_v7 = vmax.f32 %v1610_v6, 0.0 }
 0x27f   : > { %v1562_v41 = vpop.f32.mrf.mxu2 }
 0x280   : > { %v1563_v49 = vadd.f32 %v1562_v41, %v1514_v25  ;;  %v1611_v3 = vpop.f32.mrf.mxu3  ;;  %v1823_v58 = vpop.f32.mrf.mxu0 }
 0x282   : > { %v1612_v44 = vadd.f32 %v1611_v3, %v1563_v49  ;;  %v1824_v49 = vadd.f32 %v3893_v12, %v1823_v58 }
 0x284   : > { %v1647_v23 = vmax.f32 %v1612_v44, 0.0 }
 0x286   : > { %v1667_v53 = vpack.c.bf16 %v1647_v23, %v1645_v7 }
 0x287   : > { %v1565_v29 = vpop.f32.mrf.mxu2 }
 0x288   : > { %v1614_v37 = vpop.f32.mrf.mxu3  ;;  %1886 = vmatmul.bf16.gmra.mxu1 %v1667_v53  ;;  %v1566_v14 = vadd.f32 %v1565_v29, %v1517_v4  ;;  %v1825_v61 = vpop.f32.mrf.mxu0 }
 0x289   : > { %v1826_v18 = vadd.f32 %v3893_v12, %v1825_v61 }
 0x28a   : > { %v1615_v15 = vadd.f32 %v1614_v37, %v1566_v14 }
 0x28c   : > { %v1649_v38 = vmax.f32 %v1615_v15, 0.0 }
 0x28f   : > { %v1567_v50 = vpop.f32.mrf.mxu2 }
 0x290   : > { %v1568_v26 = vadd.f32 %v1567_v50, %v1519_v31  ;;  %v1616_v21 = vpop.f32.mrf.mxu3  ;;  %v1828_v41 = vpop.f32.mrf.mxu0 }
 0x291   : > { %v1829_v17 = vadd.f32 %v3893_v12, %v1828_v41 }
 0x292   : > { %v1617_v19 = vadd.f32 %v1616_v21, %v1568_v26 }
 0x294   : > { %v1651_v24 = vmax.f32 %v1617_v19, 0.0 }
 0x296   : > { %v1669_v51 = vpack.c.bf16 %v1651_v24, %v1649_v38 }
 0x297   : > { %v1570_v28 = vpop.f32.mrf.mxu2 }
 0x298   : > { %v1619_v8 = vpop.f32.mrf.mxu3  ;;  %1891 = vmatmul.bf16.gmra.mxu1 %v1669_v51  ;;  %v1571_v60 = vadd.f32 %v1570_v28, %v1522_v13  ;;  %v1830_v23 = vpop.f32.mrf.mxu0 }
 0x299   : > { %v1831_v31 = vadd.f32 %v3893_v12, %v1830_v23 }
 0x29a   : > { %v1620_v27 = vadd.f32 %v1619_v8, %v1571_v60 }
 0x29c   : > { %v1653_v52 = vmax.f32 %v1620_v27, 0.0 }
 0x29f   : > { %v1572_v55 = vpop.f32.mrf.mxu2 }
 0x2a0   : > { %v1573_v48 = vadd.f32 %v1572_v55, %v1524_v10  ;;  %v1621_v20 = vpop.f32.mrf.mxu3  ;;  %v1833_v37 = vpop.f32.mrf.mxu0 }
 0x2a1   : > { %v1834_v16 = vadd.f32 %v3893_v12, %v1833_v37 }
 0x2a2   : > { %v1622_v42 = vadd.f32 %v1621_v20, %v1573_v48 }
 0x2a4   : > { %v1655_v35 = vmax.f32 %v1622_v42, 0.0 }
 0x2a6   : > { %v1671_v46 = vpack.c.bf16 %v1655_v35, %v1653_v52 }
 0x2a8   : > { %1896 = vmatmul.bf16.gmra.mxu1 %v1671_v46  ;;  %v1835_v50 = vpop.f32.mrf.mxu0 }
 0x2a9   : > { %v1836_v59 = vadd.f32 %v3893_v12, %v1835_v50 }
 0x2b0   : > { %v1838_v38 = vpop.f32.mrf.mxu0 }
 0x2b1   : > { %v1839_v5 = vadd.f32 %v3893_v12, %v1838_v38 }
 0x2b5   : > { %v1862_v11 = vpop.f32.mrf.mxu1 }
 0x2b6   : > { %v3896_v36 = vadd.f32 %v1862_v11, %v1814_v22 }
 0x2b8   : > { %v1902_v2 = vmul.f32 %v3896_v36, %v3896_v36  ;;  %v1840_v13 = vpop.f32.mrf.mxu0 }
 0x2b9   : > { %v1841_v55 = vadd.f32 %v3893_v12, %v1840_v13 }
 0x2ba   : > { %1918 = vadd.xlane.f32.xlu0 %v1902_v2 }
 0x2bd   : > { %v1864_v9 = vpop.f32.mrf.mxu1 }
 0x2be   : > { %v3901_v56 = vadd.f32 %v1864_v9, %v1816_v54 }
 0x2c0   : > { %v1903_v1 = vmul.f32 %v3901_v56, %v3901_v56  ;;  %v1843_v10 = vpop.f32.mrf.mxu0 }
 0x2c1   : > { %v1844_v42 = vadd.f32 %v3893_v12, %v1843_v10 }
 0x2c2   : > { %1920 = vadd.xlane.f32.xlu0 %v1903_v1 }
 0x2c5   : > { %v1867_v47 = vpop.f32.mrf.mxu1 }
 0x2c6   : > { %v3906_v63 = vadd.f32 %v1867_v47, %v1819_v0 }
 0x2c8   : > { %v1904_v32 = vmul.f32 %v3906_v63, %v3906_v63  ;;  %v1845_v52 = vpop.f32.mrf.mxu0 }
 0x2c9   : > { %v1846_v40 = vadd.f32 %v3893_v12, %v1845_v52 }
 0x2ca   : > { %1922 = vadd.xlane.f32.xlu1 %v1904_v32 }
 0x2cd   : > { %v1869_v25 = vpop.f32.mrf.mxu1 }
 0x2ce   : > { %v3911_v34 = vadd.f32 %v1869_v25, %v1821_v43 }
 0x2d0   : > { %v1905_v6 = vmul.f32 %v3911_v34, %v3911_v34  ;;  %v1848_v2 = vpop.f32.mrf.mxu0 }
 0x2d1   : > { %v1849_v54 = vadd.f32 %v3893_v12, %v1848_v2 }
 0x2d2   : > { %1924 = vadd.xlane.f32.xlu1 %v1905_v6 }
 0x2d5   : > { %v1872_v3 = vpop.f32.mrf.mxu1 }
 0x2d6   : > { %v3916_v44 = vadd.f32 %v1872_v3, %v1824_v49 }
 0x2d8   : > { %v1906_v7 = vmul.f32 %v3916_v44, %v3916_v44  ;;  %v1850_v61 = vpop.f32.mrf.mxu0 }
 0x2d9   : > { %v1851_v47 = vadd.f32 %v3893_v12, %v1850_v61 }
 0x2da   : > { %1926 = vadd.xlane.f32.xlu2 %v1906_v7 }
 0x2dd   : > { %v1874_v53 = vpop.f32.mrf.mxu1 }
 0x2de   : > { %v3921_v30 = vadd.f32 %v1874_v53, %v1826_v18 }
 0x2e0   : > { %v1907_v29 = vmul.f32 %v3921_v30, %v3921_v30 }
 0x2e2   : > { %1928 = vadd.xlane.f32.xlu2 %v1907_v29 }
 0x2e5   : > { %v1877_v4 = vpop.f32.mrf.mxu1 }
 0x2e6   : > { %v3926_v39 = vadd.f32 %v1877_v4, %v1829_v17 }
 0x2e8   : > { %v1908_v14 = vmul.f32 %v3926_v39, %v3926_v39 }
 0x2ea   : > { %1930 = vadd.xlane.f32.xlu0 %v1908_v14 }
 0x2ed   : > { %v1879_v15 = vpop.f32.mrf.mxu1 }
 0x2ee   : > { %v3931_v26 = vadd.f32 %v1879_v15, %v1831_v31 }
 0x2f0   : > { %v1909_v21 = vmul.f32 %v3931_v26, %v3931_v26 }
 0x2f2   : > { %1932 = vadd.xlane.f32.xlu1 %v1909_v21 }
 0x2f5   : > { %v1882_v19 = vpop.f32.mrf.mxu1 }
 0x2f6   : > { %v3936_v33 = vadd.f32 %v1882_v19, %v1834_v16 }
 0x2f8   : > { %v1910_v24 = vmul.f32 %v3936_v33, %v3936_v33 }
 0x2fa   : > { %1934 = vadd.xlane.f32.xlu2 %v1910_v24 }
 0x2fd   : > { %v1884_v51 = vpop.f32.mrf.mxu1 }
 0x2fe   : > { %v3941_v28 = vadd.f32 %v1884_v51, %v1836_v59 }
 0x300   : > { %v1911_v8 = vmul.f32 %v3941_v28, %v3941_v28 }
 0x302   : > { %1936 = vadd.xlane.f32.xlu0 %v1911_v8 }
 0x305   : > { %v1887_v62 = vpop.f32.mrf.mxu1 }
 0x306   : > { %v3946_v60 = vadd.f32 %v1887_v62, %v1839_v5 }
 0x308   : > { %v1912_v57 = vmul.f32 %v3946_v60, %v3946_v60 }
 0x30a   : > { %1938 = vadd.xlane.f32.xlu1 %v1912_v57 }
 0x30d   : > { %v1889_v27 = vpop.f32.mrf.mxu1 }
 0x30e   : > { %v3951_v48 = vadd.f32 %v1889_v27, %v1841_v55 }
 0x310   : > { %v1913_v20 = vmul.f32 %v3951_v48, %v3951_v48 }
 0x312   : > { %1940 = vadd.xlane.f32.xlu2 %v1913_v20 }
 0x315   : > { %v1892_v35 = vpop.f32.mrf.mxu1 }
 0x316   : > { %v3956_v46 = vadd.f32 %v1892_v35, %v1844_v42 }
 0x318   : > { %v1914_v45 = vmul.f32 %v3956_v46, %v3956_v46 }
 0x31a   : > { %1942 = vadd.xlane.f32.xlu0 %v1914_v45 }
 0x31d   : > { %v1894_v22 = vpop.f32.mrf.mxu1 }
 0x31e   : > { %v3961_v11 = vadd.f32 %v1894_v22, %v1846_v40 }
 0x320   : > { %v1915_v58 = vmul.f32 %v3961_v11, %v3961_v11 }
 0x322   : > { %1944 = vadd.xlane.f32.xlu1 %v1915_v58 }
 0x325   : > { %v1897_v9 = vpop.f32.mrf.mxu1 }
 0x326   : > { %v3966_v1 = vadd.f32 %v1897_v9, %v1849_v54 }
 0x328   : > { %v1916_v0 = vmul.f32 %v3966_v1, %v3966_v1 }
 0x32a   : > { %1946 = vadd.xlane.f32.xlu2 %v1916_v0 }
 0x32d   : > { %v1899_v32 = vpop.f32.mrf.mxu1  ;;  %v1919_v43 = vpop.xlane.xlu0 %1918 }
 0x32e   : > { %v3971_v25 = vadd.f32 %v1899_v32, %v1851_v47  ;;  %v1950_v41 = vmax.f32 %v1919_v43, 1e-24 }
 0x330   : > { %3014 = vrsqrt.f32 %v1950_v41  ;;  %v1917_v6 = vmul.f32 %v3971_v25, %v3971_v25  ;;  %vm1972_vm1 = vweird.f32 %v1950_v41 }
 0x332   : > { %1948 = vadd.xlane.f32.xlu0 %v1917_v6 }
 0x335   : > { %v1921_v49 = vpop.xlane.xlu0 %1920 }
 0x336   : > { %v3015_v3 = vpop.eup %3014  ;;  %v1951_v7 = vmax.f32 %v1921_v49, 1e-24 }
 0x337   : > { %v1967_v23 = vmul.f32 %v3015_v3, %v1950_v41  ;;  %vm1973_vm0 = vweird.f32 %v3015_v3 }
 0x338   : > { %3016 = vrsqrt.f32 %v1951_v7  ;;  %vm1974_vm2 = vmor %vm1972_vm1, %vm1973_vm0  ;;  %vm1982_vm5 = vweird.f32 %v1951_v7 }
 0x339   : > { %v1968_v18 = vmul.f32 %v3015_v3, %v1967_v23 }
 0x33b   : > { %v1969_v53 = vmul.f32 0.5, %v1968_v18 }
 0x33d   : > { %v1970_v29 = vsub.f32 1.5, %v1969_v53  ;;  %v1923_v12 = vpop.xlane.xlu1 %1922 }
 0x33e   : > { %v3017_v37 = vpop.eup %3016  ;;  %v1952_v17 = vmax.f32 %v1923_v12, 1e-24 }
 0x33f   : > { %v1971_v4 = vmul.f32 %v3015_v3, %v1970_v29  ;;  %v1977_v14 = vmul.f32 %v3017_v37, %v1951_v7  ;;  %vm1983_vm4 = vweird.f32 %v3017_v37 }
 0x340   : > { %3018 = vrsqrt.f32 %v1952_v17  ;;  %vm1984_vm6 = vmor %vm1982_vm5, %vm1983_vm4  ;;  %vm1992_vm9 = vweird.f32 %v1952_v17 }
 0x341   : > { %v1975_v31 = vsel %vm1974_vm2, %v3015_v3, %v1971_v4  ;;  %v1978_v50 = vmul.f32 %v3017_v37, %v1977_v14 }
 0x342   : > { %v2126_v15 = vmul.f32 %v1975_v31, %v3896_v36 }
 0x343   : > { %v1979_v21 = vmul.f32 0.5, %v1978_v50 }
 0x344   : > { %vm2142_vm3 = vcmp.ne.f32.partialorder %v2126_v15, %v2126_v15 }
 0x345   : > { %v2158_v16 = vsel %vm2142_vm3, 0.0, %v2126_v15  ;;  %v1980_v19 = vsub.f32 1.5, %v1979_v21  ;;  %v1925_v38 = vpop.xlane.xlu1 %1924 }
 0x346   : > { %v3019_v24 = vpop.eup %3018  ;;  %2174 = vst [vmem:[%s3977_s29] sm:$0xff] %v2158_v16  ;;  %v1953_v59 = vmax.f32 %v1925_v38, 1e-24 }
 0x347   : > { %v1981_v51 = vmul.f32 %v3017_v37, %v1980_v19  ;;  %v1987_v8 = vmul.f32 %v3019_v24, %v1952_v17  ;;  %vm1993_vm8 = vweird.f32 %v3019_v24 }
 0x348   : > { %3020 = vrsqrt.f32 %v1953_v59  ;;  %vm1994_vm10 = vmor %vm1992_vm9, %vm1993_vm8  ;;  %vm2002_vm13 = vweird.f32 %v1953_v59 }
 0x349   : > { %v1985_v13 = vsel %vm1984_vm6, %v3017_v37, %v1981_v51  ;;  %v1988_v36 = vmul.f32 %v3019_v24, %v1987_v8 }
 0x34a   : > { %v2127_v5 = vmul.f32 %v1985_v13, %v3901_v56 }
 0x34b   : > { %v1989_v62 = vmul.f32 0.5, %v1988_v36 }
 0x34c   : > { %vm2143_vm7 = vcmp.ne.f32.partialorder %v2127_v5, %v2127_v5 }
 0x34d   : > { %v2159_v57 = vsel %vm2143_vm7, 0.0, %v2127_v5  ;;  %v1990_v10 = vsub.f32 1.5, %v1989_v62  ;;  %v1927_v55 = vpop.xlane.xlu2 %1926 }
 0x34e   : > { %v3021_v27 = vpop.eup %3020  ;;  %2175 = vst [vmem:[%s3977_s29 + $0x8] sm:$0xff] %v2159_v57  ;;  %v1954_v20 = vmax.f32 %v1927_v55, 1e-24 }
 0x34f   : > { %v1991_v42 = vmul.f32 %v3019_v24, %v1990_v10  ;;  %v1997_v52 = vmul.f32 %v3021_v27, %v1953_v59  ;;  %vm2003_vm12 = vweird.f32 %v3021_v27 }
 0x350   : > { %3022 = vrsqrt.f32 %v1954_v20  ;;  %vm2004_vm14 = vmor %vm2002_vm13, %vm2003_vm12  ;;  %vm2012_vm1 = vweird.f32 %v1954_v20 }
 0x351   : > { %v1995_v35 = vsel %vm1994_vm10, %v3019_v24, %v1991_v42  ;;  %v1998_v45 = vmul.f32 %v3021_v27, %v1997_v52 }
 0x352   : > { %v2128_v40 = vmul.f32 %v1995_v35, %v3906_v63 }
 0x353   : > { %v1999_v56 = vmul.f32 0.5, %v1998_v45 }
 0x354   : > { %vm2144_vm11 = vcmp.ne.f32.partialorder %v2128_v40, %v2128_v40 }
 0x355   : > { %v2160_v22 = vsel %vm2144_vm11, 0.0, %v2128_v40  ;;  %v2000_v2 = vsub.f32 1.5, %v1999_v56  ;;  %v1929_v58 = vpop.xlane.xlu2 %1928 }
 0x356   : > { %v3023_v54 = vpop.eup %3022  ;;  %2176 = vst [vmem:[%s3977_s29 + $0x10] sm:$0xff] %v2160_v22  ;;  %v1955_v9 = vmax.f32 %v1929_v58, 1e-24 }
 0x357   : > { %v2001_v0 = vmul.f32 %v3021_v27, %v2000_v2  ;;  %v2007_v61 = vmul.f32 %v3023_v54, %v1954_v20  ;;  %vm2013_vm0 = vweird.f32 %v3023_v54 }
 0x358   : > { %3024 = vrsqrt.f32 %v1955_v9  ;;  %vm2014_vm2 = vmor %vm2012_vm1, %vm2013_vm0  ;;  %vm2022_vm5 = vweird.f32 %v1955_v9 }
 0x359   : > { %v2005_v47 = vsel %vm2004_vm14, %v3021_v27, %v2001_v0  ;;  %v2008_v32 = vmul.f32 %v3023_v54, %v2007_v61 }
 0x35a   : > { %v2129_v43 = vmul.f32 %v2005_v47, %v3911_v34 }
 0x35b   : > { %v2009_v63 = vmul.f32 0.5, %v2008_v32 }
 0x35c   : > { %vm2145_vm15 = vcmp.ne.f32.partialorder %v2129_v43, %v2129_v43 }
 0x35d   : > { %v2161_v41 = vsel %vm2145_vm15, 0.0, %v2129_v43  ;;  %v2010_v6 = vsub.f32 1.5, %v2009_v63  ;;  %v1931_v49 = vpop.xlane.xlu0 %1930 }
 0x35e   : > { %v3025_v3 = vpop.eup %3024  ;;  %2177 = vst [vmem:[%s3977_s29 + $0x18] sm:$0xff] %v2161_v41  ;;  %v1956_v7 = vmax.f32 %v1931_v49, 1e-24 }
 0x35f   : > { %v2011_v23 = vmul.f32 %v3023_v54, %v2010_v6  ;;  %v2017_v18 = vmul.f32 %v3025_v3, %v1955_v9  ;;  %vm2023_vm4 = vweird.f32 %v3025_v3 }
 0x360   : > { %3026 = vrsqrt.f32 %v1956_v7  ;;  %vm2024_vm6 = vmor %vm2022_vm5, %vm2023_vm4  ;;  %vm2032_vm9 = vweird.f32 %v1956_v7 }
 0x361   : > { %v2015_v53 = vsel %vm2014_vm2, %v3023_v54, %v2011_v23  ;;  %v2018_v29 = vmul.f32 %v3025_v3, %v2017_v18 }
 0x362   : > { %v2130_v12 = vmul.f32 %v2015_v53, %v3916_v44 }
 0x363   : > { %v2019_v34 = vmul.f32 0.5, %v2018_v29 }
 0x364   : > { %vm2146_vm3 = vcmp.ne.f32.partialorder %v2130_v12, %v2130_v12 }
 0x365   : > { %v2162_v37 = vsel %vm2146_vm3, 0.0, %v2130_v12  ;;  %v2020_v17 = vsub.f32 1.5, %v2019_v34  ;;  %v1933_v4 = vpop.xlane.xlu1 %1932 }
 0x366   : > { %v3027_v14 = vpop.eup %3026  ;;  %2178 = vst [vmem:[%s3977_s29 + $0x20] sm:$0xff] %v2162_v37  ;;  %v1957_v31 = vmax.f32 %v1933_v4, 1e-24 }
 0x367   : > { %v2021_v50 = vmul.f32 %v3025_v3, %v2020_v17  ;;  %v2027_v15 = vmul.f32 %v3027_v14, %v1956_v7  ;;  %vm2033_vm8 = vweird.f32 %v3027_v14 }
 0x368   : > { %3028 = vrsqrt.f32 %v1957_v31  ;;  %vm2034_vm10 = vmor %vm2032_vm9, %vm2033_vm8  ;;  %vm2042_vm13 = vweird.f32 %v1957_v31 }
 0x369   : > { %v2025_v21 = vsel %vm2024_vm6, %v3025_v3, %v2021_v50  ;;  %v2028_v16 = vmul.f32 %v3027_v14, %v2027_v15 }
 0x36a   : > { %v2131_v19 = vmul.f32 %v2025_v21, %v3921_v30 }
 0x36b   : > { %v2029_v44 = vmul.f32 0.5, %v2028_v16 }
 0x36c   : > { %vm2147_vm7 = vcmp.ne.f32.partialorder %v2131_v19, %v2131_v19 }
 0x36d   : > { %v2163_v38 = vsel %vm2147_vm7, 0.0, %v2131_v19  ;;  %v2030_v24 = vsub.f32 1.5, %v2029_v44  ;;  %v1935_v59 = vpop.xlane.xlu2 %1934 }
 0x36e   : > { %v3029_v51 = vpop.eup %3028  ;;  %2179 = vst [vmem:[%s3977_s29 + $0x28] sm:$0xff] %v2163_v38  ;;  %v1958_v8 = vmax.f32 %v1935_v59, 1e-24 }
 0x36f   : > { %v2031_v13 = vmul.f32 %v3027_v14, %v2030_v24  ;;  %v2037_v36 = vmul.f32 %v3029_v51, %v1957_v31  ;;  %vm2043_vm12 = vweird.f32 %v3029_v51 }
 0x370   : > { %3030 = vrsqrt.f32 %v1958_v8  ;;  %vm2044_vm14 = vmor %vm2042_vm13, %vm2043_vm12  ;;  %vm2052_vm1 = vweird.f32 %v1958_v8 }
 0x371   : > { %v2035_v5 = vsel %vm2034_vm10, %v3027_v14, %v2031_v13  ;;  %v2038_v62 = vmul.f32 %v3029_v51, %v2037_v36 }
 0x372   : > { %v2132_v57 = vmul.f32 %v2035_v5, %v3926_v39 }
 0x373   : > { %v2039_v30 = vmul.f32 0.5, %v2038_v62 }
 0x374   : > { %vm2148_vm11 = vcmp.ne.f32.partialorder %v2132_v57, %v2132_v57 }
 0x375   : > { %v2164_v10 = vsel %vm2148_vm11, 0.0, %v2132_v57  ;;  %v2040_v55 = vsub.f32 1.5, %v2039_v30  ;;  %v1937_v27 = vpop.xlane.xlu0 %1936 }
 0x376   : > { %v3031_v20 = vpop.eup %3030  ;;  %2180 = vst [vmem:[%s3977_s29 + $0x30] sm:$0xff] %v2164_v10  ;;  %v1959_v42 = vmax.f32 %v1937_v27, 1e-24 }
 0x377   : > { %v2041_v52 = vmul.f32 %v3029_v51, %v2040_v55  ;;  %v2047_v35 = vmul.f32 %v3031_v20, %v1958_v8  ;;  %vm2053_vm0 = vweird.f32 %v3031_v20 }
 0x378   : > { %3032 = vrsqrt.f32 %v1959_v42  ;;  %vm2054_vm2 = vmor %vm2052_vm1, %vm2053_vm0  ;;  %vm2062_vm5 = vweird.f32 %v1959_v42 }
 0x379   : > { %v2045_v45 = vsel %vm2044_vm14, %v3029_v51, %v2041_v52  ;;  %v2048_v40 = vmul.f32 %v3031_v20, %v2047_v35 }
 0x37a   : > { %v2133_v56 = vmul.f32 %v2045_v45, %v3931_v26 }
 0x37b   : > { %v2049_v39 = vmul.f32 0.5, %v2048_v40 }
 0x37c   : > { %vm2149_vm15 = vcmp.ne.f32.partialorder %v2133_v56, %v2133_v56 }
 0x37d   : > { %v2165_v22 = vsel %vm2149_vm15, 0.0, %v2133_v56  ;;  %v2050_v2 = vsub.f32 1.5, %v2049_v39  ;;  %v1939_v58 = vpop.xlane.xlu1 %1938 }
 0x37e   : > { %v3033_v54 = vpop.eup %3032  ;;  %2181 = vst [vmem:[%s3977_s29 + $0x38] sm:$0xff] %v2165_v22  ;;  %v1960_v9 = vmax.f32 %v1939_v58, 1e-24 }
 0x37f   : > { %v2051_v0 = vmul.f32 %v3031_v20, %v2050_v2  ;;  %v2057_v61 = vmul.f32 %v3033_v54, %v1959_v42  ;;  %vm2063_vm4 = vweird.f32 %v3033_v54 }
 0x380   : > { %3034 = vrsqrt.f32 %v1960_v9  ;;  %vm2064_vm6 = vmor %vm2062_vm5, %vm2063_vm4  ;;  %vm2072_vm9 = vweird.f32 %v1960_v9 }
 0x381   : > { %v2055_v47 = vsel %vm2054_vm2, %v3031_v20, %v2051_v0  ;;  %v2058_v32 = vmul.f32 %v3033_v54, %v2057_v61 }
 0x382   : > { %v2134_v43 = vmul.f32 %v2055_v47, %v3936_v33 }
 0x383   : > { %v2059_v26 = vmul.f32 0.5, %v2058_v32 }
 0x384   : > { %vm2150_vm3 = vcmp.ne.f32.partialorder %v2134_v43, %v2134_v43 }
 0x385   : > { %v2166_v63 = vsel %vm2150_vm3, 0.0, %v2134_v43  ;;  %v2060_v41 = vsub.f32 1.5, %v2059_v26  ;;  %v1941_v6 = vpop.xlane.xlu2 %1940 }
 0x386   : > { %v3035_v49 = vpop.eup %3034  ;;  %2182 = vst [vmem:[%s3977_s29 + $0x40] sm:$0xff] %v2166_v63  ;;  %v1961_v3 = vmax.f32 %v1941_v6, 1e-24 }
 0x387   : > { %v2061_v7 = vmul.f32 %v3033_v54, %v2060_v41  ;;  %v2067_v23 = vmul.f32 %v3035_v49, %v1960_v9  ;;  %vm2073_vm8 = vweird.f32 %v3035_v49 }
 0x388   : > { %3036 = vrsqrt.f32 %v1961_v3  ;;  %vm2074_vm10 = vmor %vm2072_vm9, %vm2073_vm8  ;;  %vm2082_vm13 = vweird.f32 %v1961_v3 }
 0x389   : > { %v2065_v18 = vsel %vm2064_vm6, %v3033_v54, %v2061_v7  ;;  %v2068_v53 = vmul.f32 %v3035_v49, %v2067_v23 }
 0x38a   : > { %v2135_v29 = vmul.f32 %v2065_v18, %v3941_v28 }
 0x38b   : > { %v2069_v33 = vmul.f32 0.5, %v2068_v53 }
 0x38c   : > { %vm2151_vm7 = vcmp.ne.f32.partialorder %v2135_v29, %v2135_v29 }
 0x38d   : > { %v2167_v12 = vsel %vm2151_vm7, 0.0, %v2135_v29  ;;  %v2070_v34 = vsub.f32 1.5, %v2069_v33  ;;  %v1943_v37 = vpop.xlane.xlu0 %1942 }
 0x38e   : > { %v3037_v17 = vpop.eup %3036  ;;  %2183 = vst [vmem:[%s3977_s29 + $0x48] sm:$0xff] %v2167_v12  ;;  %v1962_v4 = vmax.f32 %v1943_v37, 1e-24 }
 0x38f   : > { %v2071_v14 = vmul.f32 %v3035_v49, %v2070_v34  ;;  %v2077_v31 = vmul.f32 %v3037_v17, %v1961_v3  ;;  %vm2083_vm12 = vweird.f32 %v3037_v17 }
 0x390   : > { %3038 = vrsqrt.f32 %v1962_v4  ;;  %vm2084_vm14 = vmor %vm2082_vm13, %vm2083_vm12  ;;  %vm2092_vm1 = vweird.f32 %v1962_v4 }
 0x391   : > { %v2075_v50 = vsel %vm2074_vm10, %v3035_v49, %v2071_v14  ;;  %v2078_v15 = vmul.f32 %v3037_v17, %v2077_v31 }
 0x392   : > { %v2136_v21 = vmul.f32 %v2075_v50, %v3946_v60 }
 0x393   : > { %v2079_v28 = vmul.f32 0.5, %v2078_v15 }
 0x394   : > { %vm2152_vm11 = vcmp.ne.f32.partialorder %v2136_v21, %v2136_v21 }
 0x395   : > { %v2168_v16 = vsel %vm2152_vm11, 0.0, %v2136_v21  ;;  %v2080_v19 = vsub.f32 1.5, %v2079_v28  ;;  %v1945_v44 = vpop.xlane.xlu1 %1944 }
 0x396   : > { %v3039_v38 = vpop.eup %3038  ;;  %2184 = vst [vmem:[%s3977_s29 + $0x50] sm:$0xff] %v2168_v16  ;;  %v1963_v24 = vmax.f32 %v1945_v44, 1e-24 }
 0x397   : > { %v2081_v59 = vmul.f32 %v3037_v17, %v2080_v19  ;;  %v2087_v51 = vmul.f32 %v3039_v38, %v1962_v4  ;;  %vm2093_vm0 = vweird.f32 %v3039_v38 }
 0x398   : > { %3040 = vrsqrt.f32 %v1963_v24  ;;  %vm2094_vm2 = vmor %vm2092_vm1, %vm2093_vm0  ;;  %vm2102_vm5 = vweird.f32 %v1963_v24 }
 0x399   : > { %v2085_v8 = vsel %vm2084_vm14, %v3037_v17, %v2081_v59  ;;  %v2088_v13 = vmul.f32 %v3039_v38, %v2087_v51 }
 0x39a   : > { %v2137_v36 = vmul.f32 %v2085_v8, %v3951_v48 }
 0x39b   : > { %v2089_v60 = vmul.f32 0.5, %v2088_v13 }
 0x39c   : > { %vm2153_vm15 = vcmp.ne.f32.partialorder %v2137_v36, %v2137_v36 }
 0x39d   : > { %v2169_v5 = vsel %vm2153_vm15, 0.0, %v2137_v36  ;;  %v2090_v62 = vsub.f32 1.5, %v2089_v60  ;;  %v1947_v57 = vpop.xlane.xlu2 %1946 }
 0x39e   : > { %v3041_v30 = vpop.eup %3040  ;;  %2185 = vst [vmem:[%s3977_s29 + $0x58] sm:$0xff] %v2169_v5  ;;  %v1964_v10 = vmax.f32 %v1947_v57, 1e-24 }
 0x39f   : > { %v2091_v55 = vmul.f32 %v3039_v38, %v2090_v62  ;;  %v2097_v27 = vmul.f32 %v3041_v30, %v1963_v24  ;;  %vm2103_vm4 = vweird.f32 %v3041_v30 }
 0x3a0   : > { %3042 = vrsqrt.f32 %v1964_v10  ;;  %vm2104_vm6 = vmor %vm2102_vm5, %vm2103_vm4  ;;  %vm2112_vm9 = vweird.f32 %v1964_v10 }
 0x3a1   : > { %v2095_v20 = vsel %vm2094_vm2, %v3039_v38, %v2091_v55  ;;  %v2098_v42 = vmul.f32 %v3041_v30, %v2097_v27 }
 0x3a2   : > { %v2138_v52 = vmul.f32 %v2095_v20, %v3956_v46 }
 0x3a3   : > { %v2099_v48 = vmul.f32 0.5, %v2098_v42 }
 0x3a4   : > { %vm2154_vm3 = vcmp.ne.f32.partialorder %v2138_v52, %v2138_v52 }
 0x3a5   : > { %v2170_v35 = vsel %vm2154_vm3, 0.0, %v2138_v52  ;;  %v2100_v45 = vsub.f32 1.5, %v2099_v48  ;;  %v1949_v40 = vpop.xlane.xlu0 %1948 }
 0x3a6   : > { %v3043_v56 = vpop.eup %3042  ;;  %2186 = vst [vmem:[%s3977_s29 + $0x60] sm:$0xff] %v2170_v35  ;;  %v1965_v39 = vmax.f32 %v1949_v40, 1e-24 }
 0x3a7   : > { %v2101_v22 = vmul.f32 %v3041_v30, %v2100_v45  ;;  %v2107_v2 = vmul.f32 %v3043_v56, %v1964_v10  ;;  %vm2113_vm8 = vweird.f32 %v3043_v56 }
 0x3a8   : > { %3044 = vrsqrt.f32 %v1965_v39  ;;  %vm2114_vm10 = vmor %vm2112_vm9, %vm2113_vm8  ;;  %vm2122_vm13 = vweird.f32 %v1965_v39 }
 0x3a9   : > { %v2105_v58 = vsel %vm2104_vm6, %v3041_v30, %v2101_v22  ;;  %v2108_v54 = vmul.f32 %v3043_v56, %v2107_v2 }
 0x3aa   : > { %v2139_v46 = vmul.f32 %v2105_v58, %v3961_v11 }
 0x3ab   : > { %v2109_v9 = vmul.f32 0.5, %v2108_v54 }
 0x3ac   : > { %vm2155_vm7 = vcmp.ne.f32.partialorder %v2139_v46, %v2139_v46 }
 0x3ad   : > { %v2171_v0 = vsel %vm2155_vm7, 0.0, %v2139_v46  ;;  %v2110_v61 = vsub.f32 1.5, %v2109_v9 }
 0x3ae   : > { %v3045_v47 = vpop.eup %3044  ;;  %2187 = vst [vmem:[%s3977_s29 + $0x68] sm:$0xff] %v2171_v0 }
 0x3af   : > { %v2111_v32 = vmul.f32 %v3043_v56, %v2110_v61  ;;  %v2117_v43 = vmul.f32 %v3045_v47, %v1965_v39  ;;  %vm2123_vm12 = vweird.f32 %v3045_v47 }
 0x3b0   : > { %vm2124_vm14 = vmor %vm2122_vm13, %vm2123_vm12 }
 0x3b1   : > { %v2115_v26 = vsel %vm2114_vm10, %v3043_v56, %v2111_v32  ;;  %v2118_v63 = vmul.f32 %v3045_v47, %v2117_v43 }
 0x3b2   : > { %v2140_v41 = vmul.f32 %v2115_v26, %v3966_v1 }
 0x3b3   : > { %v2119_v6 = vmul.f32 0.5, %v2118_v63 }
 0x3b4   : > { %vm2156_vm11 = vcmp.ne.f32.partialorder %v2140_v41, %v2140_v41 }
 0x3b5   : > { %v2172_v11 = vsel %vm2156_vm11, 0.0, %v2140_v41  ;;  %v2120_v49 = vsub.f32 1.5, %v2119_v6 }
 0x3b6   : > { %2188 = vst [vmem:[%s3977_s29 + $0x70] sm:$0xff] %v2172_v11 }
 0x3b7   : > { %v2121_v3 = vmul.f32 %v3045_v47, %v2120_v49 }
 0x3b9   : > { %v2125_v1 = vsel %vm2124_vm14, %v3045_v47, %v2121_v3 }
 0x3ba   : > { %v2141_v7 = vmul.f32 %v2125_v1, %v3971_v25 }
 0x3bc   : > { %vm2157_vm15 = vcmp.ne.f32.partialorder %v2141_v7, %v2141_v7 }
 0x3bd   : > { %v2173_v23 = vsel %vm2157_vm15, 0.0, %v2141_v7 }
 0x3be   : > { %2189 = vst [vmem:[%s3977_s29 + $0x78] sm:$0xff] %v2173_v23 }
 0x3bf   : > { %3223 = shalt.err (!%p3220_p10)
}
 0x3c0   : > { %s3282_s1 = smov 128   ;;  %s3283_s10 = smov 8  }
 0x3c1   : > { %2936 = dma.vmem_to_hbm [thread:$0]  (%p3397_p0), %s2204_s12, 2048, %s2206_s13, %s2191_s22, %s3282_s1, %s3282_s1, %s3283_s10  }
 0x3c2 PF: > { %p2968_p11 = scmp.ge.s32.totalorder %s3270_s21, 2  ;;  %s2220_s24 = sand.u32 1, %s3258_s18  }
 0x3c3   : > { %s2221_s29 = scalar_lea.sflag [#allocation4], %s2220_s24 }
 0x3c4   : > { %p2956_p12 = pnand %p2968_p11, %p3349_p6 }
 0x3c6   : > { %p2957_p13 = pneg %p2956_p12 }
 0x3c8   : > { %3253 = dma.done.wait (%p2957_p13), %s2221_s29, 2048  }
 0x3c9   : > { %3255 = vsyncadd (%p2957_p13), %s2221_s29, 4294965248  ;;  %p20_p3 = scmp.ge.s32.totalorder %s3387_s11, 6   ;;  %s4108_s18 = smov %s3262_s19 }
 0x3ca   : > { %s4109_s19 = smov %s3266_s20  ;;  %s4110_s20 = smov %s3403_s15 }
 0x3cb   : > { %s4111_s21 = smov %s3387_s11  ;;  %22 = sbr.rel (!%p20_p3) target bundleno = 9 (0x9), region = 101 }
 0x3d0   :  { %2227 = vsyncpa [#allocation3], 1 }
 0x3d1   :  { %2229 = vsyncpa [#allocation3 + $0x1], 1 }
 0x3d2   :  { %2230 = vsyncpa [#allocation6], 1 }
 0x3d3   :  { %2231 = vsyncpa [#allocation9], 1 }
 0x3d4   :  { %2232 = vsyncpa [#allocation4], 1 }
 0x3d5   :  { %2234 = vsyncpa [#allocation4 + $0x1], 1 }

</bundles_post_ra>
